<compile_context>
chip_gen: v6e
topology: v6e:2x2x1
jax: 0.10.0
libtpu: 0.0.40
codegen_flags: <defaults>
</compile_context>

<pallas_src>
import numpy as np
import jax
import jax.numpy as jnp
from jax import lax
from jax.experimental import pallas as pl
from jax.experimental.pallas import tpu as pltpu

C1P = 8            # conv1 output channels, zero-padded 6 -> 8
C2 = 16            # conv2 output channels
L1 = 24 * C1P      # conv1 output lanes: w-major, c-minor  (192)
L2 = 8 * C2        # conv2 output lanes: w-major, c-minor  (128)
HID = 128          # all FC widths zero-padded to 128 (lane-dense)
DEF_BT = 32        # default batch tile (multiple of 8)


def _shift_lanes(a, s):
    # a'[..., l] = a[..., l + s] for l < L - s (tail lanes are garbage and are
    # zero-weighted by the consuming matmul).  2-piece lane concat only.
    return jnp.concatenate([a[..., s:], a[..., :s]], axis=-1)


# ----------------------------------------------------------------------------
# Kernel: the whole LeNet5 forward for one batch tile.
# ----------------------------------------------------------------------------
def _lenet5_kernel(x_ref, w1_ref, b1_ref, w2_ref, b2_ref,
                   wf1_ref, bf1_ref, wf2_ref, bf2_ref, wf3_ref, bf3_ref,
                   o_ref):
    bt = o_ref.shape[0]
    x = x_ref[...]                                       # (28, bt, 28) = (H, B, W)

    # ---- conv1: 5 accumulated banded matmuls (kj taps folded into the weight).
    y = jnp.dot(x[0:24].reshape(24 * bt, 28), w1_ref[0],
                preferred_element_type=jnp.float32)
    for ki in range(1, 5):
        y = y + jnp.dot(x[ki:ki + 24].reshape(24 * bt, 28), w1_ref[ki],
                        preferred_element_type=jnp.float32)
    y = jnp.maximum(y + b1_ref[...], 0.0)                # (24*bt, 192)
    y = y.reshape(24, bt, L1)                            # [h, b, 8*w + c]

    # ---- pool1: H over leading dim (free), W via 8-lane shift + max.
    yr = y.reshape(12, 2, bt, L1)
    y = jnp.maximum(yr[:, 0], yr[:, 1])                  # (12, bt, 192)
    y = jnp.maximum(y, _shift_lanes(y, C1P))             # valid at lanes 16*p + c

    # ---- conv2: 5 accumulated banded matmuls (no im2col, no lane concat).
    g = jnp.dot(y[0:8].reshape(8 * bt, L1), w2_ref[0],
                preferred_element_type=jnp.float32)
    for ki in range(1, 5):
        g = g + jnp.dot(y[ki:ki + 8].reshape(8 * bt, L1), w2_ref[ki],
                        preferred_element_type=jnp.float32)
    g = jnp.maximum(g + b2_ref[...], 0.0)                # (8*bt, 128)
    g = g.reshape(8, bt, L2)                             # [h, b, 16*w + c]

    # ---- pool2: same tricks.
    gr = g.reshape(4, 2, bt, L2)
    g = jnp.maximum(gr[:, 0], gr[:, 1])                  # (4, bt, 128)
    g = jnp.maximum(g, _shift_lanes(g, C2))              # valid at lanes 32*p + c

    # ---- fc1 with the torch NCHW flatten folded in: sum of 4 per-row matmuls.
    z = jnp.dot(g[0], wf1_ref[0], preferred_element_type=jnp.float32)
    for h in range(1, 4):
        z = z + jnp.dot(g[h], wf1_ref[h], preferred_element_type=jnp.float32)
    z = jnp.maximum(z + bf1_ref[...], 0.0)

    # ---- fc2 / fc3 (all 128-lane dense).
    z = jnp.maximum(jnp.dot(z, wf2_ref[...], preferred_element_type=jnp.float32)
                    + bf2_ref[...], 0.0)
    o_ref[...] = (jnp.dot(z, wf3_ref[...], preferred_element_type=jnp.float32)
                  + bf3_ref[...])


# ----------------------------------------------------------------------------
# Wrapper: weight banding / padding (done once, outside the kernel).
# ----------------------------------------------------------------------------
def _prep_params(params):
    f32 = jnp.float32

    # conv1 -> banded weight (5, 28, 192): w1[ki, j, 8w+c] = conv1_w[c,0,ki,j-w]
    cw1 = params["conv1_w"].astype(f32).reshape(6, 5, 5)        # (c, ki, kj)
    sel1 = np.zeros((28, 24, 5), np.float32)
    for w in range(24):
        for kj in range(5):
            sel1[w + kj, w, kj] = 1.0
    w1 = jnp.einsum("jwt,cit->ijwc", jnp.asarray(sel1), cw1)    # (5, 28, 24, 6)
    w1 = jnp.pad(w1, ((0, 0), (0, 0), (0, 0), (0, C1P - 6))).reshape(5, 28, L1)
    b1 = jnp.tile(jnp.pad(params["conv1_b"].astype(f32), (0, C1P - 6)),
                  24).reshape(1, L1)

    # conv2 -> banded weight (5, 192, 128); rows for pool-garbage lanes and the
    # two padded input channels are zero.
    cw2 = params["conv2_w"].astype(f32)                          # (o, c, ki, kj)
    sel2 = np.zeros((L1, 8, 5, 6), np.float32)
    for wo in range(8):
        for kj in range(5):
            for c in range(6):
                sel2[2 * C1P * (wo + kj) + c, wo, kj, c] = 1.0
    w2 = jnp.einsum("lwtc,ocit->ilwo", jnp.asarray(sel2), cw2).reshape(5, L1, L2)
    b2 = jnp.tile(params["conv2_b"].astype(f32), 8).reshape(1, L2)

    # fc1 with the torch NCHW flatten and the pool2 lane layout folded in.
    sel3 = np.zeros((4, L2, 256), np.float32)
    for h in range(4):
        for p in range(4):
            for c in range(16):
                sel3[h, 2 * C2 * p + c, c * 16 + h * 4 + p] = 1.0
    wf1 = jnp.einsum("hlf,of->hlo", jnp.asarray(sel3),
                     params["fc1_w"].astype(f32))                # (4, 128, 120)
    wf1 = jnp.pad(wf1, ((0, 0), (0, 0), (0, HID - 120)))
    bf1 = jnp.pad(params["fc1_b"].astype(f32), (0, HID - 120)).reshape(1, HID)

    wf2 = jnp.pad(params["fc2_w"].astype(f32).T, ((0, HID - 120), (0, HID - 84)))
    bf2 = jnp.pad(params["fc2_b"].astype(f32), (0, HID - 84)).reshape(1, HID)
    wf3 = jnp.pad(params["fc3_w"].astype(f32).T, ((0, HID - 84), (0, HID - 10)))
    bf3 = jnp.pad(params["fc3_b"].astype(f32), (0, HID - 10)).reshape(1, HID)
    return w1, b1, w2, b2, wf1, bf1, wf2, bf2, wf3, bf3


def lenet5_forward(x_nchw, params, *, batch_tile=DEF_BT):
    B = x_nchw.shape[0]
    x = x_nchw.astype(jnp.float32).reshape(B, 28, 28)            # Cin == 1

    bt = max(8, (int(batch_tile) // 8) * 8)                      # sublane-aligned
    bt = min(bt, max(8, ((B + 7) // 8) * 8))                     # don't over-pad
    pad_b = (-B) % bt
    if pad_b:
        x = jnp.pad(x, ((0, pad_b), (0, 0), (0, 0)))
    pb = B + pad_b
    x_hbw = jnp.transpose(x, (1, 0, 2))                          # (28, pb, 28)

    w1, b1, w2, b2, wf1, bf1, wf2, bf2, wf3, bf3 = _prep_params(params)

    out = pl.pallas_call(
        _lenet5_kernel,
        out_shape=jax.ShapeDtypeStruct((pb, HID), jnp.float32),
        grid_spec=pltpu.PrefetchScalarGridSpec(
            num_scalar_prefetch=0,
            grid=(pb // bt,),
            in_specs=[
                pl.BlockSpec((28, bt, 28), lambda i: (0, i, 0)),
                pl.BlockSpec((5, 28, L1), lambda i: (0, 0, 0)),
                pl.BlockSpec((1, L1), lambda i: (0, 0)),
                pl.BlockSpec((5, L1, L2), lambda i: (0, 0, 0)),
                pl.BlockSpec((1, L2), lambda i: (0, 0)),
                pl.BlockSpec((4, HID, HID), lambda i: (0, 0, 0)),
                pl.BlockSpec((1, HID), lambda i: (0, 0)),
                pl.BlockSpec((HID, HID), lambda i: (0, 0)),
                pl.BlockSpec((1, HID), lambda i: (0, 0)),
                pl.BlockSpec((HID, HID), lambda i: (0, 0)),
                pl.BlockSpec((1, HID), lambda i: (0, 0)),
            ],
            out_specs=pl.BlockSpec((bt, HID), lambda i: (i, 0)),
        ),
        compiler_params=pltpu.CompilerParams(
            dimension_semantics=("parallel",),
            vmem_limit_bytes=32 * 1024 * 1024),
    )(x_hbw, w1, b1, w2, b2, wf1, bf1, wf2, bf2, wf3, bf3)

    # drop batch padding and the 10 -> 128 output lane padding.
    return out[:B, :10]


# ----------------------------------------------------------------------------
# Pure-JAX reference (mirrors the PyTorch forward) for validation.
# ----------------------------------------------------------------------------
def lenet5_reference(x, params):
    def conv(h, w, b):
        y = lax.conv_general_dilated(
            h, w, (1, 1), "VALID", dimension_numbers=("NCHW", "OIHW", "NCHW"))
        return y + b[None, :, None, None]

    def pool(h):
        Bb, C, H, W = h.shape
        return h.reshape(Bb, C, H // 2, 2, W // 2, 2).max(axis=(3, 5))

    h = pool(jnp.maximum(conv(x, params["conv1_w"], params["conv1_b"]), 0.0))
    h = pool(jnp.maximum(conv(h, params["conv2_w"], params["conv2_b"]), 0.0))
    h = h.reshape(x.shape[0], -1)
    h = jnp.maximum(h @ params["fc1_w"].T + params["fc1_b"], 0.0)
    h = jnp.maximum(h @ params["fc2_w"].T + params["fc2_b"], 0.0)
    return h @ params["fc3_w"].T + params["fc3_b"]


# ----------------------------------------------------------------------------
if __name__ == "__main__":
    key = jax.random.PRNGKey(0)
    keys = jax.random.split(key, 11)
    B = 2
    params = {
        "conv1_w": 0.10 * jax.random.normal(keys[0], (6, 1, 5, 5), jnp.float32),
        "conv1_b": 0.10 * jax.random.normal(keys[1], (6,), jnp.float32),
        "conv2_w": 0.10 * jax.random.normal(keys[2], (16, 6, 5, 5), jnp.float32),
        "conv2_b": 0.10 * jax.random.normal(keys[3], (16,), jnp.float32),
        "fc1_w": 0.05 * jax.random.normal(keys[4], (120, 256), jnp.float32),
        "fc1_b": 0.05 * jax.random.normal(keys[5], (120,), jnp.float32),
        "fc2_w": 0.05 * jax.random.normal(keys[6], (84, 120), jnp.float32),
        "fc2_b": 0.05 * jax.random.normal(keys[7], (84,), jnp.float32),
        "fc3_w": 0.05 * jax.random.normal(keys[8], (10, 84), jnp.float32),
        "fc3_b": 0.05 * jax.random.normal(keys[9], (10,), jnp.float32),
    }
    # LeNet5's fc1 (16*4*4) implies 1x28x28 inputs; batch kept small (B=2).
    x = jax.random.normal(keys[10], (B, 1, 28, 28), jnp.float32)

    out = jax.block_until_ready(lenet5_forward(x, params))
    ref = jax.block_until_ready(lenet5_reference(x, params))

    assert out.shape == (B, 10), out.shape
    if not bool(jnp.allclose(out, ref, atol=1e-2, rtol=1e-2)):
        raise AssertionError(
            f"mismatch vs reference, max abs diff = "
            f"{float(jnp.max(jnp.abs(out - ref)))}")
    print("KERNEL_OK")
</pallas_src>

<mosaic_0001>
module attributes {stable_mosaic.version = 11 : i64} {
  func.func @_lenet5_kernel(%arg0: i32, %arg1: memref<28x8x28xf32, #tpu.memory_space<vmem>>, %arg2: memref<5x28x192xf32, #tpu.memory_space<vmem>>, %arg3: memref<1x192xf32, #tpu.memory_space<vmem>>, %arg4: memref<5x192x128xf32, #tpu.memory_space<vmem>>, %arg5: memref<1x128xf32, #tpu.memory_space<vmem>>, %arg6: memref<4x128x128xf32, #tpu.memory_space<vmem>>, %arg7: memref<1x128xf32, #tpu.memory_space<vmem>>, %arg8: memref<128x128xf32, #tpu.memory_space<vmem>>, %arg9: memref<1x128xf32, #tpu.memory_space<vmem>>, %arg10: memref<128x128xf32, #tpu.memory_space<vmem>>, %arg11: memref<1x128xf32, #tpu.memory_space<vmem>>, %arg12: memref<8x128xf32, #tpu.memory_space<vmem>>) attributes {dimension_semantics = [#tpu.dimension_semantics<parallel>], iteration_bounds = array<i64: 1>, scalar_prefetch = 0 : i64, scratch_operands = 0 : i64, tpu.core_type = #tpu.core_type<tc>, window_params = [{transform_indices = @transform_0, window_bounds = array<i64: 28, 8, 28>}, {pipeline_mode = #tpu.pipeline_mode<synchronous>, transform_indices = @transform_1, window_bounds = array<i64: 5, 28, 192>}, {pipeline_mode = #tpu.pipeline_mode<synchronous>, transform_indices = @transform_2, window_bounds = array<i64: 1, 192>}, {pipeline_mode = #tpu.pipeline_mode<synchronous>, transform_indices = @transform_3, window_bounds = array<i64: 5, 192, 128>}, {pipeline_mode = #tpu.pipeline_mode<synchronous>, transform_indices = @transform_4, window_bounds = array<i64: 1, 128>}, {pipeline_mode = #tpu.pipeline_mode<synchronous>, transform_indices = @transform_5, window_bounds = array<i64: 4, 128, 128>}, {pipeline_mode = #tpu.pipeline_mode<synchronous>, transform_indices = @transform_6, window_bounds = array<i64: 1, 128>}, {pipeline_mode = #tpu.pipeline_mode<synchronous>, transform_indices = @transform_7, window_bounds = array<i64: 128, 128>}, {pipeline_mode = #tpu.pipeline_mode<synchronous>, transform_indices = @transform_8, window_bounds = array<i64: 1, 128>}, {pipeline_mode = #tpu.pipeline_mode<synchronous>, transform_indices = @transform_9, window_bounds = array<i64: 128, 128>}, {pipeline_mode = #tpu.pipeline_mode<synchronous>, transform_indices = @transform_10, window_bounds = array<i64: 1, 128>}, {transform_indices = @transform_11, window_bounds = array<i64: 8, 128>}]} {
    %c0 = arith.constant 0 : index
    %c0_0 = arith.constant 0 : index
    %c0_1 = arith.constant 0 : index
    %0 = vector.load %arg1[%c0, %c0_0, %c0_1] : memref<28x8x28xf32, #tpu.memory_space<vmem>>, vector<28x8x28xf32>
    %1 = vector.extract_strided_slice %0 {offsets = [0, 0, 0], sizes = [24, 8, 28], strides = [1, 1, 1]} : vector<28x8x28xf32> to vector<24x8x28xf32>
    %2 = vector.shape_cast %1 : vector<24x8x28xf32> to vector<192x28xf32>
    %c0_2 = arith.constant 0 : index
    %c0_3 = arith.constant 0 : index
    %c0_4 = arith.constant 0 : index
    %3 = vector.load %arg2[%c0_2, %c0_3, %c0_4] : memref<5x28x192xf32, #tpu.memory_space<vmem>>, vector<1x28x192xf32>
    %4 = vector.shape_cast %3 : vector<1x28x192xf32> to vector<28x192xf32>
    %cst = arith.constant dense<0.000000e+00> : vector<192x192xf32>
    %5 = tpu.matmul %2, %4, %cst {dimension_numbers = #tpu.dot_dimension_numbers<[1], [0], [0], [1], [0, 0, 1, 1], [], []>} : vector<192x28xf32>, vector<28x192xf32>, vector<192x192xf32> -> vector<192x192xf32>
    %6 = vector.extract_strided_slice %0 {offsets = [1, 0, 0], sizes = [24, 8, 28], strides = [1, 1, 1]} : vector<28x8x28xf32> to vector<24x8x28xf32>
    %7 = vector.shape_cast %6 : vector<24x8x28xf32> to vector<192x28xf32>
    %c1 = arith.constant 1 : index
    %c0_5 = arith.constant 0 : index
    %c0_6 = arith.constant 0 : index
    %8 = vector.load %arg2[%c1, %c0_5, %c0_6] : memref<5x28x192xf32, #tpu.memory_space<vmem>>, vector<1x28x192xf32>
    %9 = vector.shape_cast %8 : vector<1x28x192xf32> to vector<28x192xf32>
    %cst_7 = arith.constant dense<0.000000e+00> : vector<192x192xf32>
    %10 = tpu.matmul %7, %9, %cst_7 {dimension_numbers = #tpu.dot_dimension_numbers<[1], [0], [0], [1], [0, 0, 1, 1], [], []>} : vector<192x28xf32>, vector<28x192xf32>, vector<192x192xf32> -> vector<192x192xf32>
    %11 = arith.addf %5, %10 : vector<192x192xf32>
    %12 = vector.extract_strided_slice %0 {offsets = [2, 0, 0], sizes = [24, 8, 28], strides = [1, 1, 1]} : vector<28x8x28xf32> to vector<24x8x28xf32>
    %13 = vector.shape_cast %12 : vector<24x8x28xf32> to vector<192x28xf32>
    %c2 = arith.constant 2 : index
    %c0_8 = arith.constant 0 : index
    %c0_9 = arith.constant 0 : index
    %14 = vector.load %arg2[%c2, %c0_8, %c0_9] : memref<5x28x192xf32, #tpu.memory_space<vmem>>, vector<1x28x192xf32>
    %15 = vector.shape_cast %14 : vector<1x28x192xf32> to vector<28x192xf32>
    %cst_10 = arith.constant dense<0.000000e+00> : vector<192x192xf32>
    %16 = tpu.matmul %13, %15, %cst_10 {dimension_numbers = #tpu.dot_dimension_numbers<[1], [0], [0], [1], [0, 0, 1, 1], [], []>} : vector<192x28xf32>, vector<28x192xf32>, vector<192x192xf32> -> vector<192x192xf32>
    %17 = arith.addf %11, %16 : vector<192x192xf32>
    %18 = vector.extract_strided_slice %0 {offsets = [3, 0, 0], sizes = [24, 8, 28], strides = [1, 1, 1]} : vector<28x8x28xf32> to vector<24x8x28xf32>
    %19 = vector.shape_cast %18 : vector<24x8x28xf32> to vector<192x28xf32>
    %c3 = arith.constant 3 : index
    %c0_11 = arith.constant 0 : index
    %c0_12 = arith.constant 0 : index
    %20 = vector.load %arg2[%c3, %c0_11, %c0_12] : memref<5x28x192xf32, #tpu.memory_space<vmem>>, vector<1x28x192xf32>
    %21 = vector.shape_cast %20 : vector<1x28x192xf32> to vector<28x192xf32>
    %cst_13 = arith.constant dense<0.000000e+00> : vector<192x192xf32>
    %22 = tpu.matmul %19, %21, %cst_13 {dimension_numbers = #tpu.dot_dimension_numbers<[1], [0], [0], [1], [0, 0, 1, 1], [], []>} : vector<192x28xf32>, vector<28x192xf32>, vector<192x192xf32> -> vector<192x192xf32>
    %23 = arith.addf %17, %22 : vector<192x192xf32>
    %24 = vector.extract_strided_slice %0 {offsets = [4, 0, 0], sizes = [24, 8, 28], strides = [1, 1, 1]} : vector<28x8x28xf32> to vector<24x8x28xf32>
    %25 = vector.shape_cast %24 : vector<24x8x28xf32> to vector<192x28xf32>
    %c4 = arith.constant 4 : index
    %c0_14 = arith.constant 0 : index
    %c0_15 = arith.constant 0 : index
    %26 = vector.load %arg2[%c4, %c0_14, %c0_15] : memref<5x28x192xf32, #tpu.memory_space<vmem>>, vector<1x28x192xf32>
    %27 = vector.shape_cast %26 : vector<1x28x192xf32> to vector<28x192xf32>
    %cst_16 = arith.constant dense<0.000000e+00> : vector<192x192xf32>
    %28 = tpu.matmul %25, %27, %cst_16 {dimension_numbers = #tpu.dot_dimension_numbers<[1], [0], [0], [1], [0, 0, 1, 1], [], []>} : vector<192x28xf32>, vector<28x192xf32>, vector<192x192xf32> -> vector<192x192xf32>
    %29 = arith.addf %23, %28 : vector<192x192xf32>
    %c0_17 = arith.constant 0 : index
    %c0_18 = arith.constant 0 : index
    %30 = vector.load %arg3[%c0_17, %c0_18] : memref<1x192xf32, #tpu.memory_space<vmem>>, vector<1x192xf32>
    %31 = vector.broadcast %30 : vector<1x192xf32> to vector<192x192xf32>
    %32 = arith.addf %29, %31 : vector<192x192xf32>
    %cst_19 = arith.constant 0.000000e+00 : f32
    %33 = vector.broadcast %cst_19 : f32 to vector<192x192xf32>
    %34 = arith.maximumf %32, %33 : vector<192x192xf32>
    %35 = vector.shape_cast %34 : vector<192x192xf32> to vector<24x8x192xf32>
    %36 = vector.shape_cast %35 : vector<24x8x192xf32> to vector<12x2x8x192xf32>
    %37 = vector.extract_strided_slice %36 {offsets = [0, 0, 0, 0], sizes = [12, 1, 8, 192], strides = [1, 1, 1, 1]} : vector<12x2x8x192xf32> to vector<12x1x8x192xf32>
    %38 = vector.shape_cast %37 : vector<12x1x8x192xf32> to vector<12x8x192xf32>
    %39 = vector.extract_strided_slice %36 {offsets = [0, 1, 0, 0], sizes = [12, 1, 8, 192], strides = [1, 1, 1, 1]} : vector<12x2x8x192xf32> to vector<12x1x8x192xf32>
    %40 = vector.shape_cast %39 : vector<12x1x8x192xf32> to vector<12x8x192xf32>
    %41 = arith.maximumf %38, %40 : vector<12x8x192xf32>
    %42 = vector.extract_strided_slice %41 {offsets = [0, 0, 8], sizes = [12, 8, 184], strides = [1, 1, 1]} : vector<12x8x192xf32> to vector<12x8x184xf32>
    %43 = vector.extract_strided_slice %41 {offsets = [0, 0, 0], sizes = [12, 8, 8], strides = [1, 1, 1]} : vector<12x8x192xf32> to vector<12x8x8xf32>
    %44 = tpu.concatenate %42, %43 in 2 : vector<12x8x184xf32>, vector<12x8x8xf32> -> vector<12x8x192xf32>
    %45 = arith.maximumf %41, %44 : vector<12x8x192xf32>
    %46 = vector.extract_strided_slice %45 {offsets = [0, 0, 0], sizes = [8, 8, 192], strides = [1, 1, 1]} : vector<12x8x192xf32> to vector<8x8x192xf32>
    %47 = vector.shape_cast %46 : vector<8x8x192xf32> to vector<64x192xf32>
    %c0_20 = arith.constant 0 : index
    %c0_21 = arith.constant 0 : index
    %c0_22 = arith.constant 0 : index
    %48 = vector.load %arg4[%c0_20, %c0_21, %c0_22] : memref<5x192x128xf32, #tpu.memory_space<vmem>>, vector<1x192x128xf32>
    %49 = vector.shape_cast %48 : vector<1x192x128xf32> to vector<192x128xf32>
    %cst_23 = arith.constant dense<0.000000e+00> : vector<64x128xf32>
    %50 = tpu.matmul %47, %49, %cst_23 {dimension_numbers = #tpu.dot_dimension_numbers<[1], [0], [0], [1], [0, 0, 1, 1], [], []>} : vector<64x192xf32>, vector<192x128xf32>, vector<64x128xf32> -> vector<64x128xf32>
    %51 = vector.extract_strided_slice %45 {offsets = [1, 0, 0], sizes = [8, 8, 192], strides = [1, 1, 1]} : vector<12x8x192xf32> to vector<8x8x192xf32>
    %52 = vector.shape_cast %51 : vector<8x8x192xf32> to vector<64x192xf32>
    %c1_24 = arith.constant 1 : index
    %c0_25 = arith.constant 0 : index
    %c0_26 = arith.constant 0 : index
    %53 = vector.load %arg4[%c1_24, %c0_25, %c0_26] : memref<5x192x128xf32, #tpu.memory_space<vmem>>, vector<1x192x128xf32>
    %54 = vector.shape_cast %53 : vector<1x192x128xf32> to vector<192x128xf32>
    %cst_27 = arith.constant dense<0.000000e+00> : vector<64x128xf32>
    %55 = tpu.matmul %52, %54, %cst_27 {dimension_numbers = #tpu.dot_dimension_numbers<[1], [0], [0], [1], [0, 0, 1, 1], [], []>} : vector<64x192xf32>, vector<192x128xf32>, vector<64x128xf32> -> vector<64x128xf32>
    %56 = arith.addf %50, %55 : vector<64x128xf32>
    %57 = vector.extract_strided_slice %45 {offsets = [2, 0, 0], sizes = [8, 8, 192], strides = [1, 1, 1]} : vector<12x8x192xf32> to vector<8x8x192xf32>
    %58 = vector.shape_cast %57 : vector<8x8x192xf32> to vector<64x192xf32>
    %c2_28 = arith.constant 2 : index
    %c0_29 = arith.constant 0 : index
    %c0_30 = arith.constant 0 : index
    %59 = vector.load %arg4[%c2_28, %c0_29, %c0_30] : memref<5x192x128xf32, #tpu.memory_space<vmem>>, vector<1x192x128xf32>
    %60 = vector.shape_cast %59 : vector<1x192x128xf32> to vector<192x128xf32>
    %cst_31 = arith.constant dense<0.000000e+00> : vector<64x128xf32>
    %61 = tpu.matmul %58, %60, %cst_31 {dimension_numbers = #tpu.dot_dimension_numbers<[1], [0], [0], [1], [0, 0, 1, 1], [], []>} : vector<64x192xf32>, vector<192x128xf32>, vector<64x128xf32> -> vector<64x128xf32>
    %62 = arith.addf %56, %61 : vector<64x128xf32>
    %63 = vector.extract_strided_slice %45 {offsets = [3, 0, 0], sizes = [8, 8, 192], strides = [1, 1, 1]} : vector<12x8x192xf32> to vector<8x8x192xf32>
    %64 = vector.shape_cast %63 : vector<8x8x192xf32> to vector<64x192xf32>
    %c3_32 = arith.constant 3 : index
    %c0_33 = arith.constant 0 : index
    %c0_34 = arith.constant 0 : index
    %65 = vector.load %arg4[%c3_32, %c0_33, %c0_34] : memref<5x192x128xf32, #tpu.memory_space<vmem>>, vector<1x192x128xf32>
    %66 = vector.shape_cast %65 : vector<1x192x128xf32> to vector<192x128xf32>
    %cst_35 = arith.constant dense<0.000000e+00> : vector<64x128xf32>
    %67 = tpu.matmul %64, %66, %cst_35 {dimension_numbers = #tpu.dot_dimension_numbers<[1], [0], [0], [1], [0, 0, 1, 1], [], []>} : vector<64x192xf32>, vector<192x128xf32>, vector<64x128xf32> -> vector<64x128xf32>
    %68 = arith.addf %62, %67 : vector<64x128xf32>
    %69 = vector.extract_strided_slice %45 {offsets = [4, 0, 0], sizes = [8, 8, 192], strides = [1, 1, 1]} : vector<12x8x192xf32> to vector<8x8x192xf32>
    %70 = vector.shape_cast %69 : vector<8x8x192xf32> to vector<64x192xf32>
    %c4_36 = arith.constant 4 : index
    %c0_37 = arith.constant 0 : index
    %c0_38 = arith.constant 0 : index
    %71 = vector.load %arg4[%c4_36, %c0_37, %c0_38] : memref<5x192x128xf32, #tpu.memory_space<vmem>>, vector<1x192x128xf32>
    %72 = vector.shape_cast %71 : vector<1x192x128xf32> to vector<192x128xf32>
    %cst_39 = arith.constant dense<0.000000e+00> : vector<64x128xf32>
    %73 = tpu.matmul %70, %72, %cst_39 {dimension_numbers = #tpu.dot_dimension_numbers<[1], [0], [0], [1], [0, 0, 1, 1], [], []>} : vector<64x192xf32>, vector<192x128xf32>, vector<64x128xf32> -> vector<64x128xf32>
    %74 = arith.addf %68, %73 : vector<64x128xf32>
    %c0_40 = arith.constant 0 : index
    %c0_41 = arith.constant 0 : index
    %75 = vector.load %arg5[%c0_40, %c0_41] : memref<1x128xf32, #tpu.memory_space<vmem>>, vector<1x128xf32>
    %76 = vector.broadcast %75 : vector<1x128xf32> to vector<64x128xf32>
    %77 = arith.addf %74, %76 : vector<64x128xf32>
    %cst_42 = arith.constant 0.000000e+00 : f32
    %78 = vector.broadcast %cst_42 : f32 to vector<64x128xf32>
    %79 = arith.maximumf %77, %78 : vector<64x128xf32>
    %80 = vector.shape_cast %79 : vector<64x128xf32> to vector<8x8x128xf32>
    %81 = vector.shape_cast %80 : vector<8x8x128xf32> to vector<4x2x8x128xf32>
    %82 = vector.extract_strided_slice %81 {offsets = [0, 0, 0, 0], sizes = [4, 1, 8, 128], strides = [1, 1, 1, 1]} : vector<4x2x8x128xf32> to vector<4x1x8x128xf32>
    %83 = vector.shape_cast %82 : vector<4x1x8x128xf32> to vector<4x8x128xf32>
    %84 = vector.extract_strided_slice %81 {offsets = [0, 1, 0, 0], sizes = [4, 1, 8, 128], strides = [1, 1, 1, 1]} : vector<4x2x8x128xf32> to vector<4x1x8x128xf32>
    %85 = vector.shape_cast %84 : vector<4x1x8x128xf32> to vector<4x8x128xf32>
    %86 = arith.maximumf %83, %85 : vector<4x8x128xf32>
    %87 = vector.extract_strided_slice %86 {offsets = [0, 0, 16], sizes = [4, 8, 112], strides = [1, 1, 1]} : vector<4x8x128xf32> to vector<4x8x112xf32>
    %88 = vector.extract_strided_slice %86 {offsets = [0, 0, 0], sizes = [4, 8, 16], strides = [1, 1, 1]} : vector<4x8x128xf32> to vector<4x8x16xf32>
    %89 = tpu.concatenate %87, %88 in 2 : vector<4x8x112xf32>, vector<4x8x16xf32> -> vector<4x8x128xf32>
    %90 = arith.maximumf %86, %89 : vector<4x8x128xf32>
    %91 = vector.extract_strided_slice %90 {offsets = [0, 0, 0], sizes = [1, 8, 128], strides = [1, 1, 1]} : vector<4x8x128xf32> to vector<1x8x128xf32>
    %92 = vector.shape_cast %91 : vector<1x8x128xf32> to vector<8x128xf32>
    %c0_43 = arith.constant 0 : index
    %c0_44 = arith.constant 0 : index
    %c0_45 = arith.constant 0 : index
    %93 = vector.load %arg6[%c0_43, %c0_44, %c0_45] : memref<4x128x128xf32, #tpu.memory_space<vmem>>, vector<1x128x128xf32>
    %94 = vector.shape_cast %93 : vector<1x128x128xf32> to vector<128x128xf32>
    %cst_46 = arith.constant dense<0.000000e+00> : vector<8x128xf32>
    %95 = tpu.matmul %92, %94, %cst_46 {dimension_numbers = #tpu.dot_dimension_numbers<[1], [0], [0], [1], [0, 0, 1, 1], [], []>} : vector<8x128xf32>, vector<128x128xf32>, vector<8x128xf32> -> vector<8x128xf32>
    %96 = vector.extract_strided_slice %90 {offsets = [1, 0, 0], sizes = [1, 8, 128], strides = [1, 1, 1]} : vector<4x8x128xf32> to vector<1x8x128xf32>
    %97 = vector.shape_cast %96 : vector<1x8x128xf32> to vector<8x128xf32>
    %c1_47 = arith.constant 1 : index
    %c0_48 = arith.constant 0 : index
    %c0_49 = arith.constant 0 : index
    %98 = vector.load %arg6[%c1_47, %c0_48, %c0_49] : memref<4x128x128xf32, #tpu.memory_space<vmem>>, vector<1x128x128xf32>
    %99 = vector.shape_cast %98 : vector<1x128x128xf32> to vector<128x128xf32>
    %cst_50 = arith.constant dense<0.000000e+00> : vector<8x128xf32>
    %100 = tpu.matmul %97, %99, %cst_50 {dimension_numbers = #tpu.dot_dimension_numbers<[1], [0], [0], [1], [0, 0, 1, 1], [], []>} : vector<8x128xf32>, vector<128x128xf32>, vector<8x128xf32> -> vector<8x128xf32>
    %101 = arith.addf %95, %100 : vector<8x128xf32>
    %102 = vector.extract_strided_slice %90 {offsets = [2, 0, 0], sizes = [1, 8, 128], strides = [1, 1, 1]} : vector<4x8x128xf32> to vector<1x8x128xf32>
    %103 = vector.shape_cast %102 : vector<1x8x128xf32> to vector<8x128xf32>
    %c2_51 = arith.constant 2 : index
    %c0_52 = arith.constant 0 : index
    %c0_53 = arith.constant 0 : index
    %104 = vector.load %arg6[%c2_51, %c0_52, %c0_53] : memref<4x128x128xf32, #tpu.memory_space<vmem>>, vector<1x128x128xf32>
    %105 = vector.shape_cast %104 : vector<1x128x128xf32> to vector<128x128xf32>
    %cst_54 = arith.constant dense<0.000000e+00> : vector<8x128xf32>
    %106 = tpu.matmul %103, %105, %cst_54 {dimension_numbers = #tpu.dot_dimension_numbers<[1], [0], [0], [1], [0, 0, 1, 1], [], []>} : vector<8x128xf32>, vector<128x128xf32>, vector<8x128xf32> -> vector<8x128xf32>
    %107 = arith.addf %101, %106 : vector<8x128xf32>
    %108 = vector.extract_strided_slice %90 {offsets = [3, 0, 0], sizes = [1, 8, 128], strides = [1, 1, 1]} : vector<4x8x128xf32> to vector<1x8x128xf32>
    %109 = vector.shape_cast %108 : vector<1x8x128xf32> to vector<8x128xf32>
    %c3_55 = arith.constant 3 : index
    %c0_56 = arith.constant 0 : index
    %c0_57 = arith.constant 0 : index
    %110 = vector.load %arg6[%c3_55, %c0_56, %c0_57] : memref<4x128x128xf32, #tpu.memory_space<vmem>>, vector<1x128x128xf32>
    %111 = vector.shape_cast %110 : vector<1x128x128xf32> to vector<128x128xf32>
    %cst_58 = arith.constant dense<0.000000e+00> : vector<8x128xf32>
    %112 = tpu.matmul %109, %111, %cst_58 {dimension_numbers = #tpu.dot_dimension_numbers<[1], [0], [0], [1], [0, 0, 1, 1], [], []>} : vector<8x128xf32>, vector<128x128xf32>, vector<8x128xf32> -> vector<8x128xf32>
    %113 = arith.addf %107, %112 : vector<8x128xf32>
    %c0_59 = arith.constant 0 : index
    %c0_60 = arith.constant 0 : index
    %114 = vector.load %arg7[%c0_59, %c0_60] : memref<1x128xf32, #tpu.memory_space<vmem>>, vector<1x128xf32>
    %115 = vector.broadcast %114 : vector<1x128xf32> to vector<8x128xf32>
    %116 = arith.addf %113, %115 : vector<8x128xf32>
    %cst_61 = arith.constant 0.000000e+00 : f32
    %117 = vector.broadcast %cst_61 : f32 to vector<8x128xf32>
    %118 = arith.maximumf %116, %117 : vector<8x128xf32>
    %c0_62 = arith.constant 0 : index
    %c0_63 = arith.constant 0 : index
    %119 = vector.load %arg8[%c0_62, %c0_63] : memref<128x128xf32, #tpu.memory_space<vmem>>, vector<128x128xf32>
    %cst_64 = arith.constant dense<0.000000e+00> : vector<8x128xf32>
    %120 = tpu.matmul %118, %119, %cst_64 {dimension_numbers = #tpu.dot_dimension_numbers<[1], [0], [0], [1], [0, 0, 1, 1], [], []>} : vector<8x128xf32>, vector<128x128xf32>, vector<8x128xf32> -> vector<8x128xf32>
    %c0_65 = arith.constant 0 : index
    %c0_66 = arith.constant 0 : index
    %121 = vector.load %arg9[%c0_65, %c0_66] : memref<1x128xf32, #tpu.memory_space<vmem>>, vector<1x128xf32>
    %122 = vector.broadcast %121 : vector<1x128xf32> to vector<8x128xf32>
    %123 = arith.addf %120, %122 : vector<8x128xf32>
    %cst_67 = arith.constant 0.000000e+00 : f32
    %124 = vector.broadcast %cst_67 : f32 to vector<8x128xf32>
    %125 = arith.maximumf %123, %124 : vector<8x128xf32>
    %c0_68 = arith.constant 0 : index
    %c0_69 = arith.constant 0 : index
    %126 = vector.load %arg10[%c0_68, %c0_69] : memref<128x128xf32, #tpu.memory_space<vmem>>, vector<128x128xf32>
    %cst_70 = arith.constant dense<0.000000e+00> : vector<8x128xf32>
    %127 = tpu.matmul %125, %126, %cst_70 {dimension_numbers = #tpu.dot_dimension_numbers<[1], [0], [0], [1], [0, 0, 1, 1], [], []>} : vector<8x128xf32>, vector<128x128xf32>, vector<8x128xf32> -> vector<8x128xf32>
    %c0_71 = arith.constant 0 : index
    %c0_72 = arith.constant 0 : index
    %128 = vector.load %arg11[%c0_71, %c0_72] : memref<1x128xf32, #tpu.memory_space<vmem>>, vector<1x128xf32>
    %129 = vector.broadcast %128 : vector<1x128xf32> to vector<8x128xf32>
    %130 = arith.addf %127, %129 : vector<8x128xf32>
    %c0_73 = arith.constant 0 : index
    %c0_74 = arith.constant 0 : index
    %131 = vector.load %arg12[%c0_73, %c0_74] : memref<8x128xf32, #tpu.memory_space<vmem>>, vector<8x128xf32>
    tpu.vector_store %arg12[%c0_73, %c0_74], %130 {strides = array<i32>} : memref<8x128xf32, #tpu.memory_space<vmem>>, vector<8x128xf32>,
    return
  }
  func.func @transform_0(%arg0: i32) -> (i32, i32, i32) {
    %c0_i32 = arith.constant 0 : i32
    %c0_i32_0 = arith.constant 0 : i32
    %c0_i32_1 = arith.constant 0 : i32
    return %c0_i32, %arg0, %c0_i32_0 : i32, i32, i32
  }
  func.func @transform_1(%arg0: i32) -> (i32, i32, i32) {
    %c0_i32 = arith.constant 0 : i32
    %c0_i32_0 = arith.constant 0 : i32
    %c0_i32_1 = arith.constant 0 : i32
    %c0_i32_2 = arith.constant 0 : i32
    return %c0_i32, %c0_i32_0, %c0_i32_1 : i32, i32, i32
  }
  func.func @transform_2(%arg0: i32) -> (i32, i32) {
    %c0_i32 = arith.constant 0 : i32
    %c0_i32_0 = arith.constant 0 : i32
    %c0_i32_1 = arith.constant 0 : i32
    return %c0_i32, %c0_i32_0 : i32, i32
  }
  func.func @transform_3(%arg0: i32) -> (i32, i32, i32) {
    %c0_i32 = arith.constant 0 : i32
    %c0_i32_0 = arith.constant 0 : i32
    %c0_i32_1 = arith.constant 0 : i32
    %c0_i32_2 = arith.constant 0 : i32
    return %c0_i32, %c0_i32_0, %c0_i32_1 : i32, i32, i32
  }
  func.func @transform_4(%arg0: i32) -> (i32, i32) {
    %c0_i32 = arith.constant 0 : i32
    %c0_i32_0 = arith.constant 0 : i32
    %c0_i32_1 = arith.constant 0 : i32
    return %c0_i32, %c0_i32_0 : i32, i32
  }
  func.func @transform_5(%arg0: i32) -> (i32, i32, i32) {
    %c0_i32 = arith.constant 0 : i32
    %c0_i32_0 = arith.constant 0 : i32
    %c0_i32_1 = arith.constant 0 : i32
    %c0_i32_2 = arith.constant 0 : i32
    return %c0_i32, %c0_i32_0, %c0_i32_1 : i32, i32, i32
  }
  func.func @transform_6(%arg0: i32) -> (i32, i32) {
    %c0_i32 = arith.constant 0 : i32
    %c0_i32_0 = arith.constant 0 : i32
    %c0_i32_1 = arith.constant 0 : i32
    return %c0_i32, %c0_i32_0 : i32, i32
  }
  func.func @transform_7(%arg0: i32) -> (i32, i32) {
    %c0_i32 = arith.constant 0 : i32
    %c0_i32_0 = arith.constant 0 : i32
    %c0_i32_1 = arith.constant 0 : i32
    return %c0_i32, %c0_i32_0 : i32, i32
  }
  func.func @transform_8(%arg0: i32) -> (i32, i32) {
    %c0_i32 = arith.constant 0 : i32
    %c0_i32_0 = arith.constant 0 : i32
    %c0_i32_1 = arith.constant 0 : i32
    return %c0_i32, %c0_i32_0 : i32, i32
  }
  func.func @transform_9(%arg0: i32) -> (i32, i32) {
    %c0_i32 = arith.constant 0 : i32
    %c0_i32_0 = arith.constant 0 : i32
    %c0_i32_1 = arith.constant 0 : i32
    return %c0_i32, %c0_i32_0 : i32, i32
  }
  func.func @transform_10(%arg0: i32) -> (i32, i32) {
    %c0_i32 = arith.constant 0 : i32
    %c0_i32_0 = arith.constant 0 : i32
    %c0_i32_1 = arith.constant 0 : i32
    return %c0_i32, %c0_i32_0 : i32, i32
  }
  func.func @transform_11(%arg0: i32) -> (i32, i32) {
    %c0_i32 = arith.constant 0 : i32
    %c0_i32_0 = arith.constant 0 : i32
    return %arg0, %c0_i32 : i32, i32
  }
}

</mosaic_0001>

<bundles_post_ra>
// kernel: tpu_custom_call.1
= control target key start
LH: loop header
LB: loop body
LE: loop exit
PB: predicated region body
PF: predicated region fallthrough
CT: control target
= control target key end

     0   :  { %16 = vsyncpa [#allocation3], 0  ;;  %s5509_s0 = inlined_call_operand.hbm [shape: f32[28,8,28], index: 0, kind: input, shape index: {}]   ;;  %s5510_s1 = inlined_call_operand.hbm [shape: f32[5,28,192], index: 1, kind: input, shape index: {}]   ;;  %s5511_s2 = inlined_call_operand.vmem [shape: f32[1,192], index: 2, kind: input, shape index: {}]   ;;  %s5512_s3 = inlined_call_operand.hbm [shape: f32[5,192,128], index: 3, kind: input, shape index: {}]   ;;  %s5513_s4 = inlined_call_operand.vmem [shape: f32[1,128], index: 4, kind: input, shape index: {}]   ;;  %s5514_s5 = inlined_call_operand.hbm [shape: f32[4,128,128], index: 5, kind: input, shape index: {}]   ;;  %s5515_s6 = inlined_call_operand.vmem [shape: f32[1,128], index: 6, kind: input, shape index: {}]   ;;  %s5516_s7 = inlined_call_operand.hbm [shape: f32[128,128], index: 7, kind: input, shape index: {}]   ;;  %s5517_s8 = inlined_call_operand.vmem [shape: f32[1,128], index: 8, kind: input, shape index: {}]   ;;  %s5518_s9 = inlined_call_operand.hbm [shape: f32[128,128], index: 9, kind: input, shape index: {}]   ;;  %s5519_s10 = inlined_call_operand.vmem [shape: f32[1,128], index: 10, kind: input, shape index: {}]   ;;  %s5520_s11 = inlined_call_operand.hbm [shape: f32[8,128], index: 11, kind: output, shape index: {}]  }
   0x1   :  { %17 = vsyncpa [#allocation6], 0 }
   0x2   :  { %18 = vsyncpa [#allocation9], 0 }
   0x3   :  { %19 = vsyncpa [#allocation12], 0 }
   0x4   :  { %20 = vsyncpa [#allocation4], 0  ;;  %s3808_s17 = smov [#allocation5]  }
   0x5   :  { %s38_s18 = sshll.u32 %s3808_s17, 4  ;;  %s39_s18 = int_to_ptr.vmem [resolvable:$true] %s38_s18 }
   0x6   :  { %s3666_s19 = scalar_lea.vmem %s39_s18, 5120  ;;  %p3671_p1 = scmp.lt.s32.totalorder %s39_s18, %s39_s18 }
   0x7   :  { %p3667_p0 = scmp.ne.s32.totalorder %s39_s18, %s3666_s19  ;;  %p3672_p2 = scmp.lt.s32.totalorder %s3666_s19, %s3666_s19 }
   0x9   :  { %p3673_p3 = por %p3672_p2, %p3671_p1 }
   0xb   :  { %p3674_p4 = pnand %p3673_p3, %p3667_p0 }
   0xd   :  { %3677 = shalt.err (!%p3674_p4)
}
   0xe   :  { %s3809_s20 = smov 256   ;;  %s3810_s21 = smov 16  }
   0xf   :  { %44 = dma.hbm_to_vmem [thread:$0]  %s5510_s1, 5120, %s39_s18, [#allocation6], %s3809_s20, %s3809_s20, %s3810_s21  }
  0x10   :  { %s3811_s24 = smov [#allocation8]   ;;  %s3812_s26 = smov [#allocation2]  }
  0x11   :  { %s66_s25 = sshll.u32 %s3811_s24, 4  ;;  %s26_s27 = sshll.u32 %s3812_s26, 4  ;;  %s67_s25 = int_to_ptr.vmem [resolvable:$true] %s66_s25  ;;  %s27_s27 = int_to_ptr.vmem [resolvable:$true] %s26_s27 }
  0x12   :  { %s3686_s28 = scalar_lea.vmem %s67_s25, 8192  ;;  %p3691_p6 = scmp.lt.s32.totalorder %s67_s25, %s67_s25 }
  0x13   :  { %p3687_p5 = scmp.ne.s32.totalorder %s67_s25, %s3686_s28  ;;  %p3692_p7 = scmp.lt.s32.totalorder %s3686_s28, %s3686_s28 }
  0x15   :  { %p3693_p8 = por %p3692_p7, %p3691_p6 }
  0x17   :  { %p3694_p9 = pnand %p3693_p8, %p3687_p5 }
  0x19   :  { %3697 = shalt.err (!%p3694_p9)
}
  0x1a   :  { %s3813_s29 = smov 128   ;;  %s3814_s30 = smov 8  }
  0x1b   :  { %72 = dma.hbm_to_vmem [thread:$0]  %s5514_s5, 8192, %s67_s25, [#allocation9], %s3813_s29, %s3813_s29, %s3814_s30  }
  0x1c   :  { %s3706_s1 = scalar_lea.vmem %s27_s27, 3584  ;;  %p3711_p11 = scmp.lt.s32.totalorder %s27_s27, %s27_s27 }
  0x1d   :  { %p3707_p10 = scmp.ne.s32.totalorder %s27_s27, %s3706_s1  ;;  %p3712_p12 = scmp.lt.s32.totalorder %s3706_s1, %s3706_s1 }
  0x1f   :  { %p3713_p13 = por %p3712_p12, %p3711_p11 }
  0x21   :  { %p3714_p0 = pnand %p3713_p13, %p3707_p10 }
  0x23   :  { %3717 = shalt.err (!%p3714_p0)
}
  0x24   :  { %32 = dma.hbm_to_vmem [thread:$0]  %s5509_s0, 3584, %s27_s27, [#allocation3], %s3813_s29, %s3813_s29, %s3814_s30  }
  0x25   :  { %s3815_s16 = smov [#allocation7]   ;;  %s3816_s18 = smov [#allocation10]  }
  0x26   :  { %s52_s17 = sshll.u32 %s3815_s16, 4  ;;  %s80_s5 = sshll.u32 %s3816_s18, 4  ;;  %s53_s17 = int_to_ptr.vmem [resolvable:$true] %s52_s17  ;;  %s81_s5 = int_to_ptr.vmem [resolvable:$true] %s80_s5 }
  0x27   :  { %s3726_s19 = scalar_lea.vmem %s53_s17, 15360  ;;  %p3731_p2 = scmp.lt.s32.totalorder %s53_s17, %s53_s17 }
  0x28   :  { %p3727_p1 = scmp.ne.s32.totalorder %s53_s17, %s3726_s19  ;;  %p3732_p3 = scmp.lt.s32.totalorder %s3726_s19, %s3726_s19 }
  0x2a   :  { %p3733_p4 = por %p3732_p3, %p3731_p2 }
  0x2c   :  { %p3734_p5 = pnand %p3733_p4, %p3727_p1 }
  0x2e   :  { %3737 = shalt.err (!%p3734_p5)
}
  0x2f   :  { %58 = dma.hbm_to_vmem [thread:$0]  %s5512_s3, 15360, %s53_s17, [#allocation6], %s3813_s29, %s3813_s29, %s3814_s30  }
  0x30   :  { %s3746_s0 = scalar_lea.vmem %s81_s5, 2048  ;;  %p3751_p7 = scmp.lt.s32.totalorder %s81_s5, %s81_s5 }
  0x31   :  { %p3747_p6 = scmp.ne.s32.totalorder %s81_s5, %s3746_s0  ;;  %p3752_p8 = scmp.lt.s32.totalorder %s3746_s0, %s3746_s0 }
  0x33   :  { %p3753_p9 = por %p3752_p8, %p3751_p7 }
  0x35   :  { %p3754_p10 = pnand %p3753_p9, %p3747_p6 }
  0x37   :  { %3757 = shalt.err (!%p3754_p10)
}
  0x38   :  { %86 = dma.hbm_to_vmem [thread:$0]  %s5516_s7, 2048, %s81_s5, [#allocation9], %s3813_s29, %s3813_s29, %s3814_s30  }
  0x39   :  { %s3817_s24 = smov [#allocation11]  }
  0x3a   :  { %s94_s25 = sshll.u32 %s3817_s24, 4  ;;  %s95_s25 = int_to_ptr.vmem [resolvable:$true] %s94_s25 }
  0x3b   :  { %s3766_s26 = scalar_lea.vmem %s95_s25, 2048  ;;  %p3771_p12 = scmp.lt.s32.totalorder %s95_s25, %s95_s25 }
  0x3c   :  { %p3767_p11 = scmp.ne.s32.totalorder %s95_s25, %s3766_s26  ;;  %p3772_p13 = scmp.lt.s32.totalorder %s3766_s26, %s3766_s26 }
  0x3e   :  { %p3773_p0 = por %p3772_p13, %p3771_p12 }
  0x40   :  { %p3774_p1 = pnand %p3773_p0, %p3767_p11 }
  0x42   :  { %3777 = shalt.err (!%p3774_p1)
}
  0x43   :  { %100 = dma.hbm_to_vmem [thread:$0]  %s5518_s9, 2048, %s95_s25, [#allocation12], %s3813_s29, %s3813_s29, %s3814_s30  }
  0x44   :  { %3798 = dma.done.wait [#allocation3], 3584  }
  0x45   :  { %3799 = vsyncadd [#allocation3], 4294963712 }
  0x46   :  { %3800 = dma.done.wait [#allocation6], 20480  }
  0x47   :  { %3801 = vsyncadd [#allocation6], 4294946816 }
  0x48   :  { %3802 = dma.done.wait [#allocation9], 10240  }
  0x49   :  { %3803 = vsyncadd [#allocation9], 4294957056 }
  0x4a   :  { %3804 = dma.done.wait [#allocation12], 2048  }
  0x4b   :  { %3805 = vsyncadd [#allocation12], 4294965248  ;;  %v5521_v0 = vmov 0.0   ;;  %vm239_vm0 = vcmask 1043456   ;;  %v165_v1 = vld [vmem:[#allocation5 + $0x78] sm:$0xf] }
  0x4c   :  { %310 = vmatprep.mubr.f32.mxu0 %v5521_v0  ;;  %540 = vmatprep.mubr.f32.mxu1 %v5521_v0  ;;  %v164_v2 = vld [vmem:[#allocation5 + $0x70] sm:$0xf]  ;;  %v163_v3 = vld [vmem:[#allocation5 + $0x68] sm:$0xff]  ;;  %v162_v4 = vld [vmem:[#allocation5 + $0x60] sm:$0xff]  ;;  %vm166_vm1 = vcmask 228352   ;;  %s3820_s28 = smov 56  }
  0x4d   :  { %3133 = vmatprep.subr.msk.mxu0 %vm239_vm0, %v165_v1  ;;  %v161_v5 = vld [vmem:[#allocation5 + $0x58] sm:$0xff]  ;;  %v160_v6 = vld [vmem:[#allocation5 + $0x50] sm:$0xff]  ;;  %v154_v9 = vld [vmem:[#allocation5 + $0x28] sm:$0xff]  ;;  %vm1702_vm2 = vcmask 982016   ;;  %vm1775_vm3 = vcmask 457728   ;;  %vm1861_vm4 = vcmask 523264  }
  0x4e   :  { %3134 = vmatpush1.msk.msra.mxu0 %vm239_vm0, %v164_v2  ;;  %v156_v7 = vld [vmem:[#allocation5 + $0x38] sm:$0xf]  ;;  %v155_v8 = vld [vmem:[#allocation5 + $0x30] sm:$0xf]  ;;  %v159_v10 = vld [vmem:[#allocation5 + $0x48] sm:$0xff]  ;;  %vm3821_vm5 = vmmov 0  }
  0x4f   :  { %272 = vmatprep.subr.mxu0 %v163_v3  ;;  %3619 = vmatprep.subr.msk.mxu1 %vm239_vm0, %v156_v7  ;;  %v153_v11 = vld [vmem:[#allocation5 + $0x20] sm:$0xff]  ;;  %v152_v13 = vld [vmem:[#allocation5 + $0x18] sm:$0xff]  ;;  %v3923_v14 = vld [vmem:[#allocation2 + $0x8] sm:$0xff]  ;;  %s3823_s16 = smov [#allocation13]  }
  0x50   :  { %273 = vmatpush1.msra.mxu0 %v162_v4  ;;  %v158_v12 = vld [vmem:[#allocation5 + $0x40] sm:$0xff]  ;;  %3623 = vmatpush1.msk.msra.mxu1 %vm239_vm0, %v155_v8  ;;  %v151_v15 = vld [vmem:[#allocation5 + $0x10] sm:$0xff]  ;;  %v150_v16 = vld [vmem:[#allocation5 + $0x8] sm:$0xff]  ;;  %s3121_s17 = sshll.u32 %s3823_s16, 4  ;;  %s3122_s17 = int_to_ptr.vmem [resolvable:$true] %s3121_s17 }
  0x51   :  { %274 = vmatprep.subr.mxu0 %v161_v5  ;;  %3620 = vmatprep.subr.mxu1 %v154_v9  ;;  %v3930_v17 = vld [vmem:[#allocation2 + $0x10] sm:$0xff]  ;;  %v149_v18 = vld [vmem:[#allocation5] sm:$0xff]  ;;  %v3935_v19 = vld [vmem:[#allocation2 + $0x18] sm:$0xff]  ;;  %s3778_s18 = scalar_lea.vmem %s3122_s17, 128  ;;  %p3783_p3 = scmp.lt.s32.totalorder %s3122_s17, %s3122_s17 }
  0x52   :  { %275 = vmatpush1.msra.mxu0 %v160_v6  ;;  %3624 = vmatpush1.msra.mxu1 %v153_v11  ;;  %v956_v20 = vld [vmem:[#allocation5 + $0xf8] sm:$0xf]  ;;  %v955_v22 = vld [vmem:[#allocation5 + $0xf0] sm:$0xf]  ;;  %v3944_v23 = vld [vmem:[#allocation2 + $0x20] sm:$0xff]  ;;  %p3779_p2 = scmp.ne.s32.totalorder %s3122_s17, %s3778_s18  ;;  %p3784_p4 = scmp.lt.s32.totalorder %s3778_s18, %s3778_s18 }
  0x53   :  { %276 = vmatprep.subr.mxu0 %v159_v10  ;;  %3621 = vmatprep.subr.mxu1 %v152_v13  ;;  %v681_v21 = vld [vmem:[#allocation5 + $0xb8] sm:$0xf]  ;;  %v954_v24 = vld [vmem:[#allocation5 + $0xe8] sm:$0xff]  ;;  %v953_v25 = vld [vmem:[#allocation5 + $0xe0] sm:$0xff] }
  0x54   :  { %277 = vmatpush1.msra.mxu0 %v158_v12  ;;  %3625 = vmatpush1.msra.mxu1 %v151_v15  ;;  %v952_v26 = vld [vmem:[#allocation5 + $0xd8] sm:$0xff]  ;;  %v3954_v27 = vld [vmem:[#allocation2 + $0x28] sm:$0xff]  ;;  %v951_v28 = vld [vmem:[#allocation5 + $0xd0] sm:$0xff]  ;;  %p3785_p5 = por %p3784_p4, %p3783_p3 }
  0x55   :  { %3135 = vmatmul.mubr.msk.f32.vlgmr.msra.gmra.mxu0 %vm166_vm1, %v3923_v14  ;;  %3159 = vmatprep.subr.msk.mxu0 %vm239_vm0, %v156_v7  ;;  %v950_v29 = vld [vmem:[#allocation5 + $0xc8] sm:$0xff]  ;;  %v949_v30 = vld [vmem:[#allocation5 + $0xc0] sm:$0xff]  ;;  %v3962_v31 = vld [vmem:[#allocation2 + $0x30] sm:$0xff] }
  0x56   :  { %3160 = vmatpush1.msk.msra.mxu0 %vm239_vm0, %v155_v8  ;;  %316 = vmatprep.mubr.f32.mxu0 %v5521_v0  ;;  %v3971_v32 = vld [vmem:[#allocation2 + $0x38] sm:$0xff]  ;;  %v3979_v33 = vld [vmem:[#allocation2 + $0x40] sm:$0xff]  ;;  %v3987_v34 = vld [vmem:[#allocation2 + $0x48] sm:$0xff]  ;;  %p3786_p6 = pnand %p3785_p5, %p3779_p2 }
  0x57   :  { %490 = vmatprep.subr.mxu0 %v154_v9  ;;  %3622 = vmatprep.subr.mxu1 %v150_v16  ;;  %v3995_v35 = vld [vmem:[#allocation2 + $0x50] sm:$0xff]  ;;  %v4003_v36 = vld [vmem:[#allocation2 + $0x58] sm:$0xff]  ;;  %v4011_v37 = vld [vmem:[#allocation2 + $0x60] sm:$0xff] }
  0x58   :  { %491 = vmatpush1.msra.mxu0 %v153_v11  ;;  %3626 = vmatpush1.msra.mxu1 %v149_v18  ;;  %v4019_v38 = vld [vmem:[#allocation2 + $0x68] sm:$0xff]  ;;  %v4027_v39 = vld [vmem:[#allocation2 + $0x70] sm:$0xff]  ;;  %v4035_v40 = vld [vmem:[#allocation2 + $0x78] sm:$0xff] }
  0x59   :  { %3136 = vmatmul.mubr.msk.f32.gmra.mxu0 %vm166_vm1, %v3930_v17  ;;  %3163 = vmatmul.mubr.msk.f32.vlgmr.msra.gmra.mxu1 %vm166_vm1, %v3930_v17  ;;  %v4043_v41 = vld [vmem:[#allocation2 + $0x80] sm:$0xff]  ;;  %v4051_v42 = vld [vmem:[#allocation2 + $0x88] sm:$0xff]  ;;  %v4059_v43 = vld [vmem:[#allocation2 + $0x90] sm:$0xff] }
  0x5a   :  { %322 = vmatprep.mubr.f32.mxu0 %v5521_v0  ;;  %546 = vmatprep.mubr.f32.mxu1 %v5521_v0  ;;  %v4067_v44 = vld [vmem:[#allocation2 + $0x98] sm:$0xff]  ;;  %v4075_v45 = vld [vmem:[#allocation2 + $0xa0] sm:$0xff]  ;;  %v4083_v46 = vld [vmem:[#allocation2 + $0xa8] sm:$0xff] }
  0x5b   :  { %492 = vmatprep.subr.mxu0 %v152_v13  ;;  %3211 = vmatprep.subr.msk.mxu1 %vm239_vm0, %v956_v20  ;;  %v4091_v47 = vld [vmem:[#allocation2 + $0xb0] sm:$0xff]  ;;  %v4099_v48 = vld [vmem:[#allocation2 + $0xb8] sm:$0xff]  ;;  %v4107_v49 = vld [vmem:[#allocation2 + $0xc0] sm:$0xff] }
  0x5c   :  { %493 = vmatpush1.msra.mxu0 %v151_v15  ;;  %3212 = vmatpush1.msk.msra.mxu1 %vm239_vm0, %v955_v22  ;;  %v121_v50 = vld [vmem:[#allocation2] sm:$0xff]  ;;  %v680_v51 = vld [vmem:[#allocation5 + $0xb0] sm:$0xf]  ;;  %v679_v52 = vld [vmem:[#allocation5 + $0xa8] sm:$0xff] }
  0x5d   :  { %3137 = vmatmul.mubr.msk.f32.gmra.mxu0 %vm166_vm1, %v3935_v19  ;;  %494 = vmatprep.subr.mxu0 %v150_v16  ;;  %v678_v53 = vld [vmem:[#allocation5 + $0xa0] sm:$0xff]  ;;  %v677_v54 = vld [vmem:[#allocation5 + $0x98] sm:$0xff]  ;;  %v676_v55 = vld [vmem:[#allocation5 + $0x90] sm:$0xff] }
  0x5e   :  { %328 = vmatprep.mubr.f32.mxu0 %v5521_v0  ;;  %3164 = vmatmul.mubr.msk.f32.gmra.mxu1 %vm166_vm1, %v3935_v19  ;;  %v675_v56 = vld [vmem:[#allocation5 + $0x88] sm:$0xff]  ;;  %v674_v57 = vld [vmem:[#allocation5 + $0x80] sm:$0xff]  ;;  %v1231_v58 = vld [vmem:[#allocation5 + $0x138] sm:$0xf] }
  0x5f   :  { %552 = vmatprep.mubr.f32.mxu1 %v5521_v0  ;;  %495 = vmatpush1.msra.mxu0 %v149_v18  ;;  %v1230_v59 = vld [vmem:[#allocation5 + $0x130] sm:$0xf]  ;;  %v1229_v60 = vld [vmem:[#allocation5 + $0x128] sm:$0xff]  ;;  %v1228_v61 = vld [vmem:[#allocation5 + $0x120] sm:$0xff] }
  0x60   :  { %3185 = vmatprep.subr.msk.mxu0 %vm239_vm0, %v681_v21  ;;  %992 = vmatprep.subr.mxu1 %v954_v24  ;;  %v1227_v62 = vld [vmem:[#allocation5 + $0x118] sm:$0xff]  ;;  %v1226_v63 = vld [vmem:[#allocation5 + $0x110] sm:$0xff]  ;;  %v1225_v1 = vld [vmem:[#allocation5 + $0x108] sm:$0xff] }
  0x61   :  { %3138 = vmatmul.mubr.msk.f32.gmra.mxu0 %vm166_vm1, %v3944_v23  ;;  %993 = vmatpush1.msra.mxu1 %v953_v25  ;;  %v1224_v2 = vld [vmem:[#allocation5 + $0x100] sm:$0xff]  ;;  %v4247_v3 = vld [vmem:[#allocation2 + $0xc8] sm:$0xff]  ;;  %v4255_v4 = vld [vmem:[#allocation2 + $0xd0] sm:$0xff] }
  0x62   :  { %334 = vmatprep.mubr.f32.mxu0 %v5521_v0  ;;  %3165 = vmatmul.mubr.msk.f32.gmra.mxu1 %vm166_vm1, %v3944_v23 }
  0x63   :  { %558 = vmatprep.mubr.f32.mxu1 %v5521_v0  ;;  %994 = vmatprep.subr.mxu1 %v952_v26 }
  0x64   :  { %995 = vmatpush1.msra.mxu1 %v951_v28 }
  0x65   :  { %3139 = vmatmul.mubr.msk.f32.gmra.mxu0 %vm166_vm1, %v3954_v27  ;;  %996 = vmatprep.subr.mxu1 %v950_v29 }
  0x66   :  { %340 = vmatprep.mubr.f32.mxu0 %v5521_v0  ;;  %3166 = vmatmul.mubr.msk.f32.gmra.mxu1 %vm166_vm1, %v3954_v27 }
  0x67   :  { %564 = vmatprep.mubr.f32.mxu1 %v5521_v0  ;;  %997 = vmatpush1.msra.mxu1 %v949_v30 }
  0x68   :  { %1886 = vmatprep.subr.mxu1 %v5521_v0 }
  0x69   :  { %3140 = vmatmul.mubr.msk.f32.gmra.mxu0 %vm166_vm1, %v3962_v31 }
  0x6a   :  { %346 = vmatprep.mubr.f32.mxu0 %v5521_v0  ;;  %3167 = vmatmul.mubr.msk.f32.gmra.mxu1 %vm166_vm1, %v3962_v31 }
  0x6b   :  { %570 = vmatprep.mubr.f32.mxu1 %v5521_v0 }
  0x6d   :  { %3141 = vmatmul.mubr.msk.f32.gmra.mxu0 %vm166_vm1, %v3971_v32 }
  0x6e   :  { %352 = vmatprep.mubr.f32.mxu0 %v5521_v0  ;;  %3168 = vmatmul.mubr.msk.f32.gmra.mxu1 %vm166_vm1, %v3971_v32 }
  0x6f   :  { %576 = vmatprep.mubr.f32.mxu1 %v5521_v0 }
  0x71   :  { %3142 = vmatmul.mubr.msk.f32.gmra.mxu0 %vm166_vm1, %v3979_v33 }
  0x72   :  { %358 = vmatprep.mubr.f32.mxu0 %v5521_v0  ;;  %3169 = vmatmul.mubr.msk.f32.gmra.mxu1 %vm166_vm1, %v3979_v33 }
  0x73   :  { %582 = vmatprep.mubr.f32.mxu1 %v5521_v0 }
  0x75   :  { %3143 = vmatmul.mubr.msk.f32.gmra.mxu0 %vm166_vm1, %v3987_v34 }
  0x76   :  { %364 = vmatprep.mubr.f32.mxu0 %v5521_v0  ;;  %3170 = vmatmul.mubr.msk.f32.gmra.mxu1 %vm166_vm1, %v3987_v34 }
  0x77   :  { %588 = vmatprep.mubr.f32.mxu1 %v5521_v0 }
  0x79   :  { %3144 = vmatmul.mubr.msk.f32.gmra.mxu0 %vm166_vm1, %v3995_v35 }
  0x7a   :  { %370 = vmatprep.mubr.f32.mxu0 %v5521_v0  ;;  %3171 = vmatmul.mubr.msk.f32.gmra.mxu1 %vm166_vm1, %v3995_v35 }
  0x7b   :  { %594 = vmatprep.mubr.f32.mxu1 %v5521_v0 }
  0x7d   :  { %3145 = vmatmul.mubr.msk.f32.gmra.mxu0 %vm166_vm1, %v4003_v36 }
  0x7e   :  { %376 = vmatprep.mubr.f32.mxu0 %v5521_v0  ;;  %3172 = vmatmul.mubr.msk.f32.gmra.mxu1 %vm166_vm1, %v4003_v36 }
  0x7f   :  { %600 = vmatprep.mubr.f32.mxu1 %v5521_v0 }
  0x81   :  { %3146 = vmatmul.mubr.msk.f32.gmra.mxu0 %vm166_vm1, %v4011_v37 }
  0x82   :  { %382 = vmatprep.mubr.f32.mxu0 %v5521_v0  ;;  %3173 = vmatmul.mubr.msk.f32.gmra.mxu1 %vm166_vm1, %v4011_v37 }
  0x83   :  { %606 = vmatprep.mubr.f32.mxu1 %v5521_v0 }
  0x85   :  { %3147 = vmatmul.mubr.msk.f32.gmra.mxu0 %vm166_vm1, %v4019_v38 }
  0x86   :  { %388 = vmatprep.mubr.f32.mxu0 %v5521_v0  ;;  %3174 = vmatmul.mubr.msk.f32.gmra.mxu1 %vm166_vm1, %v4019_v38 }
  0x87   :  { %612 = vmatprep.mubr.f32.mxu1 %v5521_v0 }
  0x89   :  { %3148 = vmatmul.mubr.msk.f32.gmra.mxu0 %vm166_vm1, %v4027_v39 }
  0x8a   :  { %394 = vmatprep.mubr.f32.mxu0 %v5521_v0  ;;  %3175 = vmatmul.mubr.msk.f32.gmra.mxu1 %vm166_vm1, %v4027_v39 }
  0x8b   :  { %618 = vmatprep.mubr.f32.mxu1 %v5521_v0 }
  0x8d   :  { %3149 = vmatmul.mubr.msk.f32.gmra.mxu0 %vm166_vm1, %v4035_v40 }
  0x8e   :  { %400 = vmatprep.mubr.f32.mxu0 %v5521_v0  ;;  %3176 = vmatmul.mubr.msk.f32.gmra.mxu1 %vm166_vm1, %v4035_v40 }
  0x8f   :  { %624 = vmatprep.mubr.f32.mxu1 %v5521_v0 }
  0x91   :  { %3150 = vmatmul.mubr.msk.f32.gmra.mxu0 %vm166_vm1, %v4043_v41 }
  0x92   :  { %406 = vmatprep.mubr.f32.mxu0 %v5521_v0  ;;  %3177 = vmatmul.mubr.msk.f32.gmra.mxu1 %vm166_vm1, %v4043_v41 }
  0x93   :  { %630 = vmatprep.mubr.f32.mxu1 %v5521_v0 }
  0x95   :  { %3151 = vmatmul.mubr.msk.f32.gmra.mxu0 %vm166_vm1, %v4051_v42 }
  0x96   :  { %412 = vmatprep.mubr.f32.mxu0 %v5521_v0  ;;  %3178 = vmatmul.mubr.msk.f32.gmra.mxu1 %vm166_vm1, %v4051_v42 }
  0x97   :  { %636 = vmatprep.mubr.f32.mxu1 %v5521_v0 }
  0x99   :  { %3152 = vmatmul.mubr.msk.f32.gmra.mxu0 %vm166_vm1, %v4059_v43 }
  0x9a   :  { %418 = vmatprep.mubr.f32.mxu0 %v5521_v0  ;;  %3179 = vmatmul.mubr.msk.f32.gmra.mxu1 %vm166_vm1, %v4059_v43 }
  0x9b   :  { %642 = vmatprep.mubr.f32.mxu1 %v5521_v0 }
  0x9d   :  { %3153 = vmatmul.mubr.msk.f32.gmra.mxu0 %vm166_vm1, %v4067_v44 }
  0x9e   :  { %424 = vmatprep.mubr.f32.mxu0 %v5521_v0  ;;  %3180 = vmatmul.mubr.msk.f32.gmra.mxu1 %vm166_vm1, %v4067_v44 }
  0x9f   :  { %648 = vmatprep.mubr.f32.mxu1 %v5521_v0 }
  0xa1   :  { %3154 = vmatmul.mubr.msk.f32.gmra.mxu0 %vm166_vm1, %v4075_v45 }
  0xa2   :  { %430 = vmatprep.mubr.f32.mxu0 %v5521_v0  ;;  %3181 = vmatmul.mubr.msk.f32.gmra.mxu1 %vm166_vm1, %v4075_v45 }
  0xa3   :  { %654 = vmatprep.mubr.f32.mxu1 %v5521_v0 }
  0xa5   :  { %3155 = vmatmul.mubr.msk.f32.gmra.mxu0 %vm166_vm1, %v4083_v46 }
  0xa6   :  { %436 = vmatprep.mubr.f32.mxu0 %v5521_v0  ;;  %3182 = vmatmul.mubr.msk.f32.gmra.mxu1 %vm166_vm1, %v4083_v46 }
  0xa7   :  { %660 = vmatprep.mubr.f32.mxu1 %v5521_v0 }
  0xa9   :  { %3156 = vmatmul.mubr.msk.f32.gmra.mxu0 %vm166_vm1, %v4091_v47 }
  0xaa   :  { %442 = vmatprep.mubr.f32.mxu0 %v5521_v0  ;;  %3183 = vmatmul.mubr.msk.f32.gmra.mxu1 %vm166_vm1, %v4091_v47 }
  0xab   :  { %666 = vmatprep.mubr.f32.mxu1 %v5521_v0 }
  0xad   :  { %3157 = vmatmul.mubr.msk.f32.gmra.mxu0 %vm166_vm1, %v4099_v48 }
  0xae   :  { %448 = vmatprep.mubr.f32.mxu0 %v5521_v0  ;;  %3184 = vmatmul.mubr.msk.f32.gmra.mxu1 %vm166_vm1, %v4099_v48 }
  0xaf   :  { %1030 = vmatprep.mubr.f32.mxu1 %v5521_v0 }
  0xb1   :  { %3158 = vmatmul.mubr.msk.f32.gmra.mxu0 %vm166_vm1, %v4107_v49 }
  0xb2   :  { %528 = vmatprep.mubr.f32.mxu0 %v5521_v0  ;;  %3213 = vmatmul.mubr.msk.f32.vlgmr.msra.gmra.mxu1 %vm166_vm1, %v3935_v19 }
  0xb3   :  { %1036 = vmatprep.mubr.f32.mxu1 %v5521_v0 }
  0xb5   :  { %3161 = vmatmul.mubr.msk.f32.vlgmr.msra.gmra.mxu0 %vm166_vm1, %v121_v50 }
  0xb6   :  { %3186 = vmatpush1.msk.msra.mxu0 %vm239_vm0, %v680_v51  ;;  %534 = vmatprep.mubr.f32.mxu0 %v5521_v0 }
  0xb7   :  { %717 = vmatprep.subr.mxu0 %v679_v52  ;;  %3214 = vmatmul.mubr.msk.f32.gmra.mxu1 %vm166_vm1, %v3944_v23 }
  0xb8   :  { %718 = vmatpush1.msra.mxu0 %v678_v53  ;;  %1042 = vmatprep.mubr.f32.mxu1 %v5521_v0 }
  0xb9   :  { %3162 = vmatmul.mubr.msk.f32.gmra.mxu0 %vm166_vm1, %v3923_v14  ;;  %719 = vmatprep.subr.mxu0 %v677_v54 }
  0xba   :  { %720 = vmatpush1.msra.mxu0 %v676_v55  ;;  %755 = vmatprep.mubr.f32.mxu0 %v5521_v0 }
  0xbb   :  { %721 = vmatprep.subr.mxu0 %v675_v56  ;;  %3215 = vmatmul.mubr.msk.f32.gmra.mxu1 %vm166_vm1, %v3954_v27 }
  0xbc   :  { %722 = vmatpush1.msra.mxu0 %v674_v57  ;;  %1048 = vmatprep.mubr.f32.mxu1 %v5521_v0 }
  0xbd   :  { %3187 = vmatmul.mubr.msk.f32.vlgmr.msra.gmra.mxu0 %vm166_vm1, %v3930_v17  ;;  %3237 = vmatprep.subr.msk.mxu0 %vm239_vm0, %v1231_v58 }
  0xbe   :  { %3238 = vmatpush1.msk.msra.mxu0 %vm239_vm0, %v1230_v59  ;;  %761 = vmatprep.mubr.f32.mxu0 %v5521_v0 }
  0xbf   :  { %3216 = vmatmul.mubr.msk.f32.gmra.mxu1 %vm166_vm1, %v3962_v31  ;;  %1267 = vmatprep.subr.mxu0 %v1229_v60 }
  0xc0   :  { %1054 = vmatprep.mubr.f32.mxu1 %v5521_v0  ;;  %1268 = vmatpush1.msra.mxu0 %v1228_v61 }
  0xc1   :  { %3188 = vmatmul.mubr.msk.f32.gmra.mxu0 %vm166_vm1, %v3935_v19  ;;  %1269 = vmatprep.subr.mxu0 %v1227_v62 }
  0xc2   :  { %767 = vmatprep.mubr.f32.mxu0 %v5521_v0  ;;  %1270 = vmatpush1.msra.mxu0 %v1226_v63 }
  0xc3   :  { %3217 = vmatmul.mubr.msk.f32.gmra.mxu1 %vm166_vm1, %v3971_v32  ;;  %1271 = vmatprep.subr.mxu0 %v1225_v1 }
  0xc4   :  { %1060 = vmatprep.mubr.f32.mxu1 %v5521_v0  ;;  %1272 = vmatpush1.msra.mxu0 %v1224_v2 }
  0xc5   :  { %3189 = vmatmul.mubr.msk.f32.gmra.mxu0 %vm166_vm1, %v3944_v23  ;;  %2127 = vmatprep.subr.mxu0 %v5521_v0 }
  0xc6   :  { %773 = vmatprep.mubr.f32.mxu0 %v5521_v0 }
  0xc7   :  { %3218 = vmatmul.mubr.msk.f32.gmra.mxu1 %vm166_vm1, %v3979_v33 }
  0xc8   :  { %1066 = vmatprep.mubr.f32.mxu1 %v5521_v0 }
  0xc9   :  { %3190 = vmatmul.mubr.msk.f32.gmra.mxu0 %vm166_vm1, %v3954_v27 }
  0xca   :  { %779 = vmatprep.mubr.f32.mxu0 %v5521_v0 }
  0xcb   :  { %3219 = vmatmul.mubr.msk.f32.gmra.mxu1 %vm166_vm1, %v3987_v34 }
  0xcc   :  { %1072 = vmatprep.mubr.f32.mxu1 %v5521_v0 }
  0xcd   :  { %3191 = vmatmul.mubr.msk.f32.gmra.mxu0 %vm166_vm1, %v3962_v31 }
  0xce   :  { %785 = vmatprep.mubr.f32.mxu0 %v5521_v0 }
  0xcf   :  { %3220 = vmatmul.mubr.msk.f32.gmra.mxu1 %vm166_vm1, %v3995_v35 }
  0xd0   :  { %1078 = vmatprep.mubr.f32.mxu1 %v5521_v0 }
  0xd1   :  { %3192 = vmatmul.mubr.msk.f32.gmra.mxu0 %vm166_vm1, %v3971_v32 }
  0xd2   :  { %791 = vmatprep.mubr.f32.mxu0 %v5521_v0 }
  0xd3   :  { %3221 = vmatmul.mubr.msk.f32.gmra.mxu1 %vm166_vm1, %v4003_v36 }
  0xd4   :  { %1084 = vmatprep.mubr.f32.mxu1 %v5521_v0 }
  0xd5   :  { %3193 = vmatmul.mubr.msk.f32.gmra.mxu0 %vm166_vm1, %v3979_v33 }
  0xd6   :  { %797 = vmatprep.mubr.f32.mxu0 %v5521_v0 }
  0xd7   :  { %3222 = vmatmul.mubr.msk.f32.gmra.mxu1 %vm166_vm1, %v4011_v37 }
  0xd8   :  { %1090 = vmatprep.mubr.f32.mxu1 %v5521_v0 }
  0xd9   :  { %3194 = vmatmul.mubr.msk.f32.gmra.mxu0 %vm166_vm1, %v3987_v34 }
  0xda   :  { %803 = vmatprep.mubr.f32.mxu0 %v5521_v0 }
  0xdb   :  { %3223 = vmatmul.mubr.msk.f32.gmra.mxu1 %vm166_vm1, %v4019_v38 }
  0xdc   :  { %1096 = vmatprep.mubr.f32.mxu1 %v5521_v0 }
  0xdd   :  { %3195 = vmatmul.mubr.msk.f32.gmra.mxu0 %vm166_vm1, %v3995_v35 }
  0xde   :  { %809 = vmatprep.mubr.f32.mxu0 %v5521_v0 }
  0xdf   :  { %3224 = vmatmul.mubr.msk.f32.gmra.mxu1 %vm166_vm1, %v4027_v39 }
  0xe0   :  { %1102 = vmatprep.mubr.f32.mxu1 %v5521_v0 }
  0xe1   :  { %3196 = vmatmul.mubr.msk.f32.gmra.mxu0 %vm166_vm1, %v4003_v36 }
  0xe2   :  { %815 = vmatprep.mubr.f32.mxu0 %v5521_v0 }
  0xe3   :  { %3225 = vmatmul.mubr.msk.f32.gmra.mxu1 %vm166_vm1, %v4035_v40 }
  0xe4   :  { %1108 = vmatprep.mubr.f32.mxu1 %v5521_v0 }
  0xe5   :  { %3197 = vmatmul.mubr.msk.f32.gmra.mxu0 %vm166_vm1, %v4011_v37 }
  0xe6   :  { %821 = vmatprep.mubr.f32.mxu0 %v5521_v0 }
  0xe7   :  { %3226 = vmatmul.mubr.msk.f32.gmra.mxu1 %vm166_vm1, %v4043_v41 }
  0xe8   :  { %1114 = vmatprep.mubr.f32.mxu1 %v5521_v0 }
  0xe9   :  { %3198 = vmatmul.mubr.msk.f32.gmra.mxu0 %vm166_vm1, %v4019_v38 }
  0xea   :  { %827 = vmatprep.mubr.f32.mxu0 %v5521_v0 }
  0xeb   :  { %3227 = vmatmul.mubr.msk.f32.gmra.mxu1 %vm166_vm1, %v4051_v42 }
  0xec   :  { %1120 = vmatprep.mubr.f32.mxu1 %v5521_v0 }
  0xed   :  { %3199 = vmatmul.mubr.msk.f32.gmra.mxu0 %vm166_vm1, %v4027_v39 }
  0xee   :  { %833 = vmatprep.mubr.f32.mxu0 %v5521_v0 }
  0xef   :  { %3228 = vmatmul.mubr.msk.f32.gmra.mxu1 %vm166_vm1, %v4059_v43 }
  0xf0   :  { %1126 = vmatprep.mubr.f32.mxu1 %v5521_v0 }
  0xf1   :  { %3200 = vmatmul.mubr.msk.f32.gmra.mxu0 %vm166_vm1, %v4035_v40 }
  0xf2   :  { %839 = vmatprep.mubr.f32.mxu0 %v5521_v0 }
  0xf3   :  { %3229 = vmatmul.mubr.msk.f32.gmra.mxu1 %vm166_vm1, %v4067_v44 }
  0xf4   :  { %1132 = vmatprep.mubr.f32.mxu1 %v5521_v0 }
  0xf5   :  { %3201 = vmatmul.mubr.msk.f32.gmra.mxu0 %vm166_vm1, %v4043_v41 }
  0xf6   :  { %845 = vmatprep.mubr.f32.mxu0 %v5521_v0 }
  0xf7   :  { %3230 = vmatmul.mubr.msk.f32.gmra.mxu1 %vm166_vm1, %v4075_v45 }
  0xf8   :  { %1138 = vmatprep.mubr.f32.mxu1 %v5521_v0 }
  0xf9   :  { %3202 = vmatmul.mubr.msk.f32.gmra.mxu0 %vm166_vm1, %v4051_v42 }
  0xfa   :  { %851 = vmatprep.mubr.f32.mxu0 %v5521_v0 }
  0xfb   :  { %3231 = vmatmul.mubr.msk.f32.gmra.mxu1 %vm166_vm1, %v4083_v46 }
  0xfc   :  { %1144 = vmatprep.mubr.f32.mxu1 %v5521_v0 }
  0xfd   :  { %3203 = vmatmul.mubr.msk.f32.gmra.mxu0 %vm166_vm1, %v4059_v43 }
  0xfe   :  { %857 = vmatprep.mubr.f32.mxu0 %v5521_v0 }
  0xff   :  { %3232 = vmatmul.mubr.msk.f32.gmra.mxu1 %vm166_vm1, %v4091_v47 }
 0x100   :  { %1150 = vmatprep.mubr.f32.mxu1 %v5521_v0 }
 0x101   :  { %3204 = vmatmul.mubr.msk.f32.gmra.mxu0 %vm166_vm1, %v4067_v44 }
 0x102   :  { %863 = vmatprep.mubr.f32.mxu0 %v5521_v0 }
 0x103   :  { %3233 = vmatmul.mubr.msk.f32.gmra.mxu1 %vm166_vm1, %v4099_v48 }
 0x104   :  { %1156 = vmatprep.mubr.f32.mxu1 %v5521_v0 }
 0x105   :  { %3205 = vmatmul.mubr.msk.f32.gmra.mxu0 %vm166_vm1, %v4075_v45 }
 0x106   :  { %869 = vmatprep.mubr.f32.mxu0 %v5521_v0 }
 0x107   :  { %3234 = vmatmul.mubr.msk.f32.gmra.mxu1 %vm166_vm1, %v4107_v49 }
 0x108   :  { %1162 = vmatprep.mubr.f32.mxu1 %v5521_v0 }
 0x109   :  { %3206 = vmatmul.mubr.msk.f32.gmra.mxu0 %vm166_vm1, %v4083_v46 }
 0x10a   :  { %875 = vmatprep.mubr.f32.mxu0 %v5521_v0 }
 0x10b   :  { %3235 = vmatmul.mubr.msk.f32.gmra.mxu1 %vm166_vm1, %v4247_v3 }
 0x10c   :  { %1168 = vmatprep.mubr.f32.mxu1 %v5521_v0 }
 0x10d   :  { %3207 = vmatmul.mubr.msk.f32.gmra.mxu0 %vm166_vm1, %v4091_v47 }
 0x10e   :  { %881 = vmatprep.mubr.f32.mxu0 %v5521_v0 }
 0x10f   :  { %3236 = vmatmul.mubr.msk.f32.gmra.mxu1 %vm166_vm1, %v4255_v4 }
 0x111   :  { %3208 = vmatmul.mubr.msk.f32.gmra.mxu0 %vm166_vm1, %v4099_v48 }
 0x112   :  { %887 = vmatprep.mubr.f32.mxu0 %v5521_v0 }
 0x115   :  { %v4265_v5 = vpop.f32.mrf.mxu0  ;;  %3209 = vmatmul.mubr.msk.f32.gmra.mxu0 %vm166_vm1, %v4107_v49 }
 0x116   :  { %893 = vmatprep.mubr.f32.mxu0 %v5521_v0 }
 0x117   :  { %v4270_v6 = vpop.f32.mrf.mxu0 }
 0x119   :  { %v4272_v7 = vpop.f32.mrf.mxu0  ;;  %3210 = vmatmul.mubr.msk.f32.gmra.mxu0 %vm166_vm1, %v4247_v3  ;;  %v542_v8 = vpop.f32.mrf.mxu1 }
 0x11a   :  { %1305 = vmatprep.mubr.f32.mxu0 %v5521_v0 }
 0x11b   :  { %v4277_v9 = vpop.f32.mrf.mxu0  ;;  %v4279_v10 = vpop.f32.mrf.mxu1 }
 0x11c   :  { %5523 = vst [vmem:[#allocation19_spill] sm:$0xff] %v4277_v9  ;;  %5524 = vst [vmem:[#allocation20_spill] sm:$0xff] %v4279_v10 }
 0x11d   :  { %v324_v11 = vpop.f32.mrf.mxu0  ;;  %3239 = vmatmul.mubr.msk.f32.vlgmr.msra.gmra.mxu0 %vm166_vm1, %v3944_v23 }
 0x11e   :  { %v4283_v12 = vadd.f32 %v542_v8, %v324_v11  ;;  %1311 = vmatprep.mubr.f32.mxu0 %v5521_v0  ;;  %v548_v13 = vpop.f32.mrf.mxu1 }
 0x11f   :  { %v4286_v14 = vpop.f32.mrf.mxu0 }
 0x120   :  { %5525 = vst [vmem:[#allocation21_spill] sm:$0xff] %v4286_v14  ;;  %v4288_v15 = vpop.f32.mrf.mxu1 }
 0x121   :  { %5526 = vst [vmem:[#allocation22_spill] sm:$0xff] %v4288_v15  ;;  %v330_v16 = vpop.f32.mrf.mxu0  ;;  %3240 = vmatmul.mubr.msk.f32.gmra.mxu0 %vm166_vm1, %v3954_v27 }
 0x122   :  { %v4292_v17 = vadd.f32 %v548_v13, %v330_v16  ;;  %1317 = vmatprep.mubr.f32.mxu0 %v5521_v0  ;;  %v554_v18 = vpop.f32.mrf.mxu1 }
 0x123   :  { %v4295_v19 = vpop.f32.mrf.mxu0 }
 0x124   :  { %5527 = vst [vmem:[#allocation23_spill] sm:$0xff] %v4295_v19  ;;  %v4297_v20 = vpop.f32.mrf.mxu1 }
 0x125   :  { %5528 = vst [vmem:[#allocation24_spill] sm:$0xff] %v4297_v20  ;;  %v336_v21 = vpop.f32.mrf.mxu0  ;;  %3241 = vmatmul.mubr.msk.f32.gmra.mxu0 %vm166_vm1, %v3962_v31 }
 0x126   :  { %v4301_v22 = vadd.f32 %v554_v18, %v336_v21  ;;  %1323 = vmatprep.mubr.f32.mxu0 %v5521_v0  ;;  %v560_v23 = vpop.f32.mrf.mxu1 }
 0x127   :  { %v4304_v24 = vpop.f32.mrf.mxu0 }
 0x128   :  { %5529 = vst [vmem:[#allocation25_spill] sm:$0xff] %v4304_v24  ;;  %v4306_v25 = vpop.f32.mrf.mxu1 }
 0x129   :  { %5530 = vst [vmem:[#allocation26_spill] sm:$0xff] %v4306_v25  ;;  %v342_v26 = vpop.f32.mrf.mxu0  ;;  %3242 = vmatmul.mubr.msk.f32.gmra.mxu0 %vm166_vm1, %v3971_v32 }
 0x12a   :  { %v4310_v27 = vadd.f32 %v560_v23, %v342_v26  ;;  %1329 = vmatprep.mubr.f32.mxu0 %v5521_v0  ;;  %v566_v28 = vpop.f32.mrf.mxu1 }
 0x12b   :  { %v4313_v29 = vpop.f32.mrf.mxu0 }
 0x12c   :  { %5531 = vst [vmem:[#allocation27_spill] sm:$0xff] %v4313_v29  ;;  %v4315_v30 = vpop.f32.mrf.mxu1 }
 0x12d   :  { %5532 = vst [vmem:[#allocation28_spill] sm:$0xff] %v4315_v30  ;;  %v348_v31 = vpop.f32.mrf.mxu0  ;;  %3243 = vmatmul.mubr.msk.f32.gmra.mxu0 %vm166_vm1, %v3979_v33 }
 0x12e   :  { %v4319_v50 = vadd.f32 %v566_v28, %v348_v31  ;;  %1335 = vmatprep.mubr.f32.mxu0 %v5521_v0  ;;  %v572_v51 = vpop.f32.mrf.mxu1 }
 0x12f   :  { %v4322_v52 = vpop.f32.mrf.mxu0 }
 0x130   :  { %5533 = vst [vmem:[#allocation29_spill] sm:$0xff] %v4322_v52  ;;  %v4324_v32 = vpop.f32.mrf.mxu1 }
 0x131   :  { %5534 = vst [vmem:[#allocation30_spill] sm:$0xff] %v4324_v32  ;;  %v354_v53 = vpop.f32.mrf.mxu0  ;;  %3244 = vmatmul.mubr.msk.f32.gmra.mxu0 %vm166_vm1, %v3987_v34 }
 0x132   :  { %v4328_v54 = vadd.f32 %v572_v51, %v354_v53  ;;  %1341 = vmatprep.mubr.f32.mxu0 %v5521_v0  ;;  %v578_v55 = vpop.f32.mrf.mxu1 }
 0x133   :  { %v4331_v56 = vpop.f32.mrf.mxu0 }
 0x134   :  { %5535 = vst [vmem:[#allocation31_spill] sm:$0xff] %v4331_v56  ;;  %v4333_v33 = vpop.f32.mrf.mxu1 }
 0x135   :  { %5536 = vst [vmem:[#allocation32_spill] sm:$0xff] %v4333_v33  ;;  %v360_v57 = vpop.f32.mrf.mxu0  ;;  %3245 = vmatmul.mubr.msk.f32.gmra.mxu0 %vm166_vm1, %v3995_v35 }
 0x136   :  { %v4337_v58 = vadd.f32 %v578_v55, %v360_v57  ;;  %1347 = vmatprep.mubr.f32.mxu0 %v5521_v0  ;;  %v584_v59 = vpop.f32.mrf.mxu1 }
 0x137   :  { %v4340_v60 = vpop.f32.mrf.mxu0 }
 0x138   :  { %5537 = vst [vmem:[#allocation33_spill] sm:$0xff] %v4340_v60  ;;  %v4342_v34 = vpop.f32.mrf.mxu1 }
 0x139   :  { %5538 = vst [vmem:[#allocation34_spill] sm:$0xff] %v4342_v34  ;;  %v366_v61 = vpop.f32.mrf.mxu0  ;;  %3246 = vmatmul.mubr.msk.f32.gmra.mxu0 %vm166_vm1, %v4003_v36 }
 0x13a   :  { %v4346_v62 = vadd.f32 %v584_v59, %v366_v61  ;;  %1353 = vmatprep.mubr.f32.mxu0 %v5521_v0  ;;  %v590_v63 = vpop.f32.mrf.mxu1 }
 0x13b   :  { %v4349_v1 = vpop.f32.mrf.mxu0 }
 0x13c   :  { %5539 = vst [vmem:[#allocation35_spill] sm:$0xff] %v4349_v1  ;;  %v4351_v35 = vpop.f32.mrf.mxu1 }
 0x13d   :  { %v372_v2 = vpop.f32.mrf.mxu0  ;;  %3247 = vmatmul.mubr.msk.f32.gmra.mxu0 %vm166_vm1, %v4011_v37 }
 0x13e   :  { %v4355_v8 = vadd.f32 %v590_v63, %v372_v2  ;;  %1359 = vmatprep.mubr.f32.mxu0 %v5521_v0  ;;  %v596_v11 = vpop.f32.mrf.mxu1 }
 0x13f   :  { %v4358_v13 = vpop.f32.mrf.mxu0 }
 0x140   :  { %v4360_v36 = vpop.f32.mrf.mxu1 }
 0x141   :  { %v378_v16 = vpop.f32.mrf.mxu0  ;;  %3248 = vmatmul.mubr.msk.f32.gmra.mxu0 %vm166_vm1, %v4019_v38 }
 0x142   :  { %v4364_v18 = vadd.f32 %v596_v11, %v378_v16  ;;  %1365 = vmatprep.mubr.f32.mxu0 %v5521_v0  ;;  %v602_v21 = vpop.f32.mrf.mxu1 }
 0x143   :  { %v4367_v23 = vpop.f32.mrf.mxu0 }
 0x144   :  { %v4369_v37 = vpop.f32.mrf.mxu1 }
 0x145   :  { %v384_v26 = vpop.f32.mrf.mxu0  ;;  %3249 = vmatmul.mubr.msk.f32.gmra.mxu0 %vm166_vm1, %v4027_v39 }
 0x146   :  { %v4373_v28 = vadd.f32 %v602_v21, %v384_v26  ;;  %1371 = vmatprep.mubr.f32.mxu0 %v5521_v0  ;;  %v608_v31 = vpop.f32.mrf.mxu1 }
 0x147   :  { %v4376_v51 = vpop.f32.mrf.mxu0 }
 0x148   :  { %v4378_v38 = vpop.f32.mrf.mxu1 }
 0x149   :  { %v390_v53 = vpop.f32.mrf.mxu0  ;;  %3250 = vmatmul.mubr.msk.f32.gmra.mxu0 %vm166_vm1, %v4035_v40 }
 0x14a   :  { %v4382_v55 = vadd.f32 %v608_v31, %v390_v53  ;;  %1377 = vmatprep.mubr.f32.mxu0 %v5521_v0  ;;  %v614_v57 = vpop.f32.mrf.mxu1 }
 0x14b   :  { %v4385_v59 = vpop.f32.mrf.mxu0 }
 0x14c   :  { %v4387_v39 = vpop.f32.mrf.mxu1 }
 0x14d   :  { %v396_v61 = vpop.f32.mrf.mxu0  ;;  %3251 = vmatmul.mubr.msk.f32.gmra.mxu0 %vm166_vm1, %v4043_v41 }
 0x14e   :  { %v4391_v63 = vadd.f32 %v614_v57, %v396_v61  ;;  %1383 = vmatprep.mubr.f32.mxu0 %v5521_v0  ;;  %v620_v2 = vpop.f32.mrf.mxu1 }
 0x14f   :  { %v4394_v11 = vpop.f32.mrf.mxu0 }
 0x150   :  { %v4396_v40 = vpop.f32.mrf.mxu1 }
 0x151   :  { %v402_v16 = vpop.f32.mrf.mxu0  ;;  %3252 = vmatmul.mubr.msk.f32.gmra.mxu0 %vm166_vm1, %v4051_v42 }
 0x152   :  { %v4400_v21 = vadd.f32 %v620_v2, %v402_v16  ;;  %1389 = vmatprep.mubr.f32.mxu0 %v5521_v0  ;;  %v626_v26 = vpop.f32.mrf.mxu1 }
 0x153   :  { %v4403_v31 = vpop.f32.mrf.mxu0 }
 0x154   :  { %v4405_v41 = vpop.f32.mrf.mxu1 }
 0x155   :  { %v408_v53 = vpop.f32.mrf.mxu0  ;;  %3253 = vmatmul.mubr.msk.f32.gmra.mxu0 %vm166_vm1, %v4059_v43 }
 0x156   :  { %v4409_v57 = vadd.f32 %v626_v26, %v408_v53  ;;  %1395 = vmatprep.mubr.f32.mxu0 %v5521_v0  ;;  %v632_v61 = vpop.f32.mrf.mxu1 }
 0x157   :  { %v4412_v34 = vpop.f32.mrf.mxu0 }
 0x158   :  { %v4414_v42 = vpop.f32.mrf.mxu1 }
 0x159   :  { %v414_v2 = vpop.f32.mrf.mxu0  ;;  %3254 = vmatmul.mubr.msk.f32.gmra.mxu0 %vm166_vm1, %v4067_v44 }
 0x15a   :  { %v4418_v16 = vadd.f32 %v632_v61, %v414_v2  ;;  %1401 = vmatprep.mubr.f32.mxu0 %v5521_v0  ;;  %v638_v1 = vpop.f32.mrf.mxu1 }
 0x15b   :  { %v4421_v33 = vpop.f32.mrf.mxu0 }
 0x15c   :  { %v4423_v43 = vpop.f32.mrf.mxu1 }
 0x15d   :  { %5540 = vst [vmem:[#allocation36_spill] sm:$0xff] %v4423_v43  ;;  %v420_v26 = vpop.f32.mrf.mxu0  ;;  %3255 = vmatmul.mubr.msk.f32.gmra.mxu0 %vm166_vm1, %v4075_v45 }
 0x15e   :  { %v4427_v53 = vadd.f32 %v638_v1, %v420_v26  ;;  %1407 = vmatprep.mubr.f32.mxu0 %v5521_v0  ;;  %v644_v60 = vpop.f32.mrf.mxu1 }
 0x15f   :  { %v4430_v32 = vpop.f32.mrf.mxu0 }
 0x160   :  { %5541 = vst [vmem:[#allocation37_spill] sm:$0xff] %v4430_v32  ;;  %v4432_v44 = vpop.f32.mrf.mxu1 }
 0x161   :  { %5542 = vst [vmem:[#allocation38_spill] sm:$0xff] %v4432_v44  ;;  %v426_v61 = vpop.f32.mrf.mxu0  ;;  %3256 = vmatmul.mubr.msk.f32.gmra.mxu0 %vm166_vm1, %v4083_v46 }
 0x162   :  { %v4436_v2 = vadd.f32 %v644_v60, %v426_v61  ;;  %1413 = vmatprep.mubr.f32.mxu0 %v5521_v0  ;;  %v650_v43 = vpop.f32.mrf.mxu1 }
 0x163   :  { %v4439_v56 = vpop.f32.mrf.mxu0 }
 0x164   :  { %5543 = vst [vmem:[#allocation39_spill] sm:$0xff] %v4439_v56  ;;  %v4441_v45 = vpop.f32.mrf.mxu1 }
 0x165   :  { %v432_v1 = vpop.f32.mrf.mxu0  ;;  %3257 = vmatmul.mubr.msk.f32.gmra.mxu0 %vm166_vm1, %v4091_v47 }
 0x166   :  { %v4445_v26 = vadd.f32 %v650_v43, %v432_v1  ;;  %1419 = vmatprep.mubr.f32.mxu0 %v5521_v0  ;;  %v656_v44 = vpop.f32.mrf.mxu1 }
 0x167   :  { %v4448_v32 = vpop.f32.mrf.mxu0 }
 0x168   :  { %v4450_v46 = vpop.f32.mrf.mxu1 }
 0x169   :  { %v438_v60 = vpop.f32.mrf.mxu0  ;;  %3258 = vmatmul.mubr.msk.f32.gmra.mxu0 %vm166_vm1, %v4099_v48 }
 0x16a   :  { %v4454_v61 = vadd.f32 %v656_v44, %v438_v60  ;;  %1425 = vmatprep.mubr.f32.mxu0 %v5521_v0  ;;  %v662_v56 = vpop.f32.mrf.mxu1 }
 0x16b   :  { %v4457_v30 = vpop.f32.mrf.mxu0 }
 0x16c   :  { %v4459_v47 = vpop.f32.mrf.mxu1 }
 0x16d   :  { %v444_v43 = vpop.f32.mrf.mxu0  ;;  %3259 = vmatmul.mubr.msk.f32.gmra.mxu0 %vm166_vm1, %v4107_v49  ;;  %v148_v49 = vld [vmem:[#allocation2 + $0xd8] sm:$0xff] }
 0x16e   :  { %v4463_v1 = vadd.f32 %v662_v56, %v444_v43  ;;  %1431 = vmatprep.mubr.f32.mxu0 %v5521_v0  ;;  %v668_v48 = vpop.f32.mrf.mxu1 }
 0x16f   :  { %v4466_v52 = vpop.f32.mrf.mxu0 }
 0x170   :  { %v4478_v56 = vpop.f32.mrf.mxu1 }
 0x171   :  { %v450_v44 = vpop.f32.mrf.mxu0  ;;  %3260 = vmatmul.mubr.msk.f32.gmra.mxu0 %vm166_vm1, %v4247_v3  ;;  %5545 = vst [vmem:[#allocation41_spill] sm:$0xff] %v4478_v56 }
 0x172   :  { %v4470_v60 = vadd.f32 %v668_v48, %v450_v44  ;;  %1437 = vmatprep.mubr.f32.mxu0 %v5521_v0  ;;  %v1032_v3 = vpop.f32.mrf.mxu1 }
 0x173   :  { %v4473_v25 = vpop.f32.mrf.mxu0 }
 0x174   :  { %5544 = vst [vmem:[#allocation40_spill] sm:$0xff] %v4470_v60  ;;  %v4486_v15 = vpop.f32.mrf.mxu1 }
 0x175   :  { %v530_v29 = vpop.f32.mrf.mxu0  ;;  %3261 = vmatmul.mubr.msk.f32.gmra.mxu0 %vm166_vm1, %v4255_v4 }
 0x176   :  { %1443 = vmatprep.mubr.f32.mxu0 %v5521_v0  ;;  %v531_v44 = vadd.f32 %v530_v29, %v4265_v5 }
 0x177   :  { %v4480_v43 = vpop.f32.mrf.mxu0  ;;  %v1038_v9 = vpop.f32.mrf.mxu1 }
 0x179   :  { %v536_v20 = vpop.f32.mrf.mxu0  ;;  %3262 = vmatmul.mubr.msk.f32.gmra.mxu0 %vm166_vm1, %v148_v49  ;;  %v4500_v29 = vpop.f32.mrf.mxu1 }
 0x17a   :  { %v537_v0 = vadd.f32 %v536_v20, %v4272_v7 }
 0x17b   :  { %v4483_v48 = vpop.f32.mrf.mxu0 }
 0x17c   :  { %5546 = vst [vmem:[#allocation42_spill] sm:$0xff] %v4483_v48 }
 0x17d   :  { %v757_v24 = vpop.f32.mrf.mxu0 }
 0x17e   :  { %v900_v19 = vadd.f32 %v757_v24, %v531_v44 }
 0x17f   :  { %v4488_v4 = vpop.f32.mrf.mxu0 }
 0x180   :  { %v4491_v10 = vadd.f32 %v1032_v3, %v900_v19  ;;  %v4507_v19 = vpop.f32.mrf.mxu1 }
 0x181   :  { %v763_v14 = vpop.f32.mrf.mxu0 }
 0x182   :  { %v902_v60 = vadd.f32 %v763_v14, %v537_v0  ;;  %v4514_v14 = vpop.f32.mrf.mxu1 }
 0x183   :  { %v4493_v56 = vpop.f32.mrf.mxu0 }
 0x184   :  { %v4495_v49 = vadd.f32 %v1038_v9, %v902_v60 }
 0x185   :  { %v769_v48 = vpop.f32.mrf.mxu0 }
 0x186   :  { %v4498_v5 = vadd.f32 %v769_v48, %v4283_v12  ;;  %v4521_v48 = vpop.f32.mrf.mxu1 }
 0x187   :  { %v4502_v24 = vpop.f32.mrf.mxu0 }
 0x189   :  { %v775_v44 = vpop.f32.mrf.mxu0 }
 0x18a   :  { %v4505_v7 = vadd.f32 %v775_v44, %v4292_v17 }
 0x18b   :  { %v4509_v20 = vpop.f32.mrf.mxu0 }
 0x18c   :  { %5547 = vst [vmem:[#allocation43_spill] sm:$0xff] %v4505_v7  ;;  %5548 = vst [vmem:[#allocation44_spill] sm:$0xff] %v4509_v20  ;;  %v4528_v20 = vpop.f32.mrf.mxu1 }
 0x18d   :  { %v781_v0 = vpop.f32.mrf.mxu0 }
 0x18e   :  { %v4512_v9 = vadd.f32 %v781_v0, %v4301_v22 }
 0x18f   :  { %v4516_v12 = vpop.f32.mrf.mxu0 }
 0x190   :  { %5549 = vst [vmem:[#allocation45_spill] sm:$0xff] %v4512_v9  ;;  %5550 = vst [vmem:[#allocation46_spill] sm:$0xff] %v4516_v12  ;;  %v4535_v12 = vpop.f32.mrf.mxu1 }
 0x191   :  { %v787_v60 = vpop.f32.mrf.mxu0  ;;  %5556 = vst [vmem:[#allocation52_spill] sm:$0xff] %v4535_v12 }
 0x192   :  { %v4519_v3 = vadd.f32 %v787_v60, %v4310_v27 }
 0x193   :  { %v4523_v17 = vpop.f32.mrf.mxu0 }
 0x194   :  { %5551 = vst [vmem:[#allocation47_spill] sm:$0xff] %v4519_v3  ;;  %5552 = vst [vmem:[#allocation48_spill] sm:$0xff] %v4523_v17  ;;  %v4542_v17 = vpop.f32.mrf.mxu1 }
 0x195   :  { %v793_v44 = vpop.f32.mrf.mxu0 }
 0x196   :  { %v4526_v7 = vadd.f32 %v793_v44, %v4319_v50  ;;  %v1852_v44 = vld [vmem:[#allocation7 + $0x138] sm:$0xff] }
 0x197   :  { %v4530_v22 = vpop.f32.mrf.mxu0  ;;  %1887 = vmatpush1.msra.mxu1 %v1852_v44 }
 0x198   :  { %5553 = vst [vmem:[#allocation49_spill] sm:$0xff] %v4526_v7  ;;  %5554 = vst [vmem:[#allocation50_spill] sm:$0xff] %v4530_v22 }
 0x199   :  { %v799_v0 = vpop.f32.mrf.mxu0 }
 0x19a   :  { %v4533_v9 = vadd.f32 %v799_v0, %v4328_v54  ;;  %v5560_v54 = vmov 0.0   ;;  %v4550_v0 = vpop.f32.mrf.mxu1 }
 0x19b   :  { %v4537_v27 = vpop.f32.mrf.mxu0  ;;  %1888 = vmatprep.subr.mxu1 %v5560_v54 }
 0x19c   :  { %5555 = vst [vmem:[#allocation51_spill] sm:$0xff] %v4533_v9  ;;  %5557 = vst [vmem:[#allocation53_spill] sm:$0xff] %v4537_v27  ;;  %v1851_v27 = vld [vmem:[#allocation7 + $0x130] sm:$0xff]  ;;  %v4560_v44 = vpop.f32.mrf.mxu1 }
 0x19d   :  { %v805_v60 = vpop.f32.mrf.mxu0  ;;  %1889 = vmatpush1.msra.mxu1 %v1851_v27 }
 0x19e   :  { %v4540_v3 = vadd.f32 %v805_v60, %v4337_v58  ;;  %v593_v58 = vadd.f32 %v4351_v35, %v4358_v13  ;;  %1890 = vmatprep.subr.mxu1 %v5560_v54  ;;  %v4570_v35 = vpop.f32.mrf.mxu1 }
 0x19f   :  { %v4544_v50 = vpop.f32.mrf.mxu0 }
 0x1a0   :  { %5558 = vst [vmem:[#allocation54_spill] sm:$0xff] %v4540_v3 }
 0x1a1   :  { %v811_v7 = vpop.f32.mrf.mxu0 }
 0x1a2   :  { %v4547_v22 = vadd.f32 %v811_v7, %v4346_v62 }
 0x1a3   :  { %v4552_v9 = vpop.f32.mrf.mxu0 }
 0x1a4   :  { %5559 = vst [vmem:[#allocation55_spill] sm:$0xff] %v4547_v22  ;;  %5561 = vst [vmem:[#allocation56_spill] sm:$0xff] %v4552_v9  ;;  %v1850_v22 = vld [vmem:[#allocation7 + $0x128] sm:$0xff]  ;;  %v599_v9 = vadd.f32 %v4360_v36, %v4367_v23  ;;  %v4580_v36 = vpop.f32.mrf.mxu1 }
 0x1a5   :  { %v817_v12 = vpop.f32.mrf.mxu0  ;;  %1891 = vmatpush1.msra.mxu1 %v1850_v22 }
 0x1a6   :  { %v4557_v60 = vadd.f32 %v817_v12, %v4355_v8  ;;  %1892 = vmatprep.subr.mxu1 %v5560_v54  ;;  %v1849_v12 = vld [vmem:[#allocation7 + $0x120] sm:$0xff] }
 0x1a7   :  { %v819_v62 = vpop.f32.mrf.mxu0  ;;  %1893 = vmatpush1.msra.mxu1 %v1849_v12 }
 0x1a8   :  { %5562 = vst [vmem:[#allocation57_spill] sm:$0xff] %v4557_v60  ;;  %v4562_v7 = vadd.f32 %v819_v62, %v593_v58  ;;  %v605_v58 = vadd.f32 %v4369_v37, %v4376_v51  ;;  %1894 = vmatprep.subr.mxu1 %v5560_v54  ;;  %v4590_v37 = vpop.f32.mrf.mxu1 }
 0x1a9   :  { %v823_v3 = vpop.f32.mrf.mxu0 }
 0x1aa   :  { %v4567_v27 = vadd.f32 %v823_v3, %v4364_v18  ;;  %v1848_v3 = vld [vmem:[#allocation7 + $0x118] sm:$0xff] }
 0x1ab   :  { %v825_v8 = vpop.f32.mrf.mxu0  ;;  %1895 = vmatpush1.msra.mxu1 %v1848_v3  ;;  %v1846_v3 = vld [vmem:[#allocation7 + $0x108] sm:$0xff] }
 0x1ac   :  { %v4572_v13 = vadd.f32 %v825_v8, %v599_v9  ;;  %v611_v9 = vadd.f32 %v4378_v38, %v4385_v59  ;;  %1896 = vmatprep.subr.mxu1 %v5560_v54  ;;  %v4600_v38 = vpop.f32.mrf.mxu1 }
 0x1ad   :  { %v829_v60 = vpop.f32.mrf.mxu0 }
 0x1ae   :  { %v4577_v22 = vadd.f32 %v829_v60, %v4373_v28  ;;  %v1847_v60 = vld [vmem:[#allocation7 + $0x110] sm:$0xff] }
 0x1af   :  { %v831_v18 = vpop.f32.mrf.mxu0  ;;  %1897 = vmatpush1.msra.mxu1 %v1847_v60  ;;  %v1845_v60 = vld [vmem:[#allocation7 + $0x100] sm:$0xff] }
 0x1b0   :  { %v4582_v23 = vadd.f32 %v831_v18, %v605_v58  ;;  %v617_v58 = vadd.f32 %v4387_v39, %v4394_v11  ;;  %1898 = vmatprep.subr.mxu1 %v5560_v54  ;;  %v4610_v39 = vpop.f32.mrf.mxu1 }
 0x1b1   :  { %v835_v62 = vpop.f32.mrf.mxu0  ;;  %1899 = vmatpush1.msra.mxu1 %v1846_v3  ;;  %v1844_v3 = vld [vmem:[#allocation7 + $0xf8] sm:$0xff] }
 0x1b2   :  { %v4587_v8 = vadd.f32 %v835_v62, %v4382_v55  ;;  %1900 = vmatprep.subr.mxu1 %v5560_v54 }
 0x1b3   :  { %v837_v28 = vpop.f32.mrf.mxu0  ;;  %1901 = vmatpush1.msra.mxu1 %v1845_v60 }
 0x1b4   :  { %v4592_v51 = vadd.f32 %v837_v28, %v611_v9  ;;  %v623_v9 = vadd.f32 %v4396_v40, %v4403_v31  ;;  %1902 = vmatprep.subr.mxu1 %v5560_v54  ;;  %v4620_v40 = vpop.f32.mrf.mxu1 }
 0x1b5   :  { %v841_v12 = vpop.f32.mrf.mxu0  ;;  %1903 = vmatpush1.msra.mxu1 %v1844_v3 }
 0x1b6   :  { %v4597_v18 = vadd.f32 %v841_v12, %v4391_v63  ;;  %1904 = vmatprep.subr.mxu1 %v5560_v54 }
 0x1b7   :  { %v843_v55 = vpop.f32.mrf.mxu0 }
 0x1b8   :  { %v4602_v59 = vadd.f32 %v843_v55, %v617_v58  ;;  %v629_v58 = vadd.f32 %v4405_v41, %v4412_v34  ;;  %v1842_v34 = vld [vmem:[#allocation7 + $0xe8] sm:$0xff]  ;;  %v4630_v41 = vpop.f32.mrf.mxu1 }
 0x1b9   :  { %v847_v62 = vpop.f32.mrf.mxu0 }
 0x1ba   :  { %v4607_v28 = vadd.f32 %v847_v62, %v4400_v21  ;;  %v1843_v62 = vld [vmem:[#allocation7 + $0xf0] sm:$0xff] }
 0x1bb   :  { %v849_v63 = vpop.f32.mrf.mxu0  ;;  %1905 = vmatpush1.msra.mxu1 %v1843_v62  ;;  %v2115_v62 = vld [vmem:[#allocation7 + $0x1f8] sm:$0xff] }
 0x1bc   :  { %v4612_v11 = vadd.f32 %v849_v63, %v623_v9  ;;  %v635_v63 = vadd.f32 %v4414_v42, %v4421_v33  ;;  %1906 = vmatprep.subr.mxu1 %v5560_v54  ;;  %v4639_v33 = vpop.f32.mrf.mxu1  ;;  %2128 = vmatpush1.msra.mxu0 %v2115_v62  ;;  %v1837_v62 = vld [vmem:[#allocation7 + $0xc0] sm:$0xff] }
 0x1bd   :  { %v853_v12 = vpop.f32.mrf.mxu0  ;;  %1907 = vmatpush1.msra.mxu1 %v1842_v34  ;;  %2129 = vmatprep.subr.mxu0 %v5560_v54 }
 0x1be   :  { %v4617_v55 = vadd.f32 %v853_v12, %v4409_v57  ;;  %1908 = vmatprep.subr.mxu1 %v5560_v54 }
 0x1bf   :  { %v855_v21 = vpop.f32.mrf.mxu0 }
 0x1c0   :  { %v4622_v31 = vadd.f32 %v855_v21, %v629_v58  ;;  %v1841_v58 = vld [vmem:[#allocation7 + $0xe0] sm:$0xff] }
 0x1c1   :  { %v859_v9 = vpop.f32.mrf.mxu0  ;;  %1909 = vmatpush1.msra.mxu1 %v1841_v58 }
 0x1c2   :  { %v4627_v60 = vadd.f32 %v859_v9, %v4418_v16  ;;  %1910 = vmatprep.subr.mxu1 %v5560_v54  ;;  %v1840_v16 = vld [vmem:[#allocation7 + $0xd8] sm:$0xff]  ;;  %v1839_v9 = vld [vmem:[#allocation7 + $0xd0] sm:$0xff] }
 0x1c3   :  { %v861_v57 = vpop.f32.mrf.mxu0  ;;  %1911 = vmatpush1.msra.mxu1 %v1840_v16  ;;  %v2112_v16 = vld [vmem:[#allocation7 + $0x1e0] sm:$0xff] }
 0x1c4   :  { %v4632_v12 = vadd.f32 %v861_v57, %v635_v63  ;;  %v2114_v57 = vld [vmem:[#allocation7 + $0x1f0] sm:$0xff]  ;;  %1912 = vmatprep.subr.mxu1 %v5560_v54 }
 0x1c5   :  { %v865_v21 = vpop.f32.mrf.mxu0  ;;  %1913 = vmatpush1.msra.mxu1 %v1839_v9  ;;  %2130 = vmatpush1.msra.mxu0 %v2114_v57  ;;  %v1860_v9 = vld [vmem:[#allocation7 + $0x178] sm:$0xff] }
 0x1c6   :  { %5563 = vst [vmem:[#allocation58_spill] sm:$0xff] %v4632_v12  ;;  %v4636_v3 = vadd.f32 %v865_v21, %v4427_v53  ;;  %v2113_v53 = vld [vmem:[#allocation7 + $0x1e8] sm:$0xff]  ;;  %2131 = vmatprep.subr.mxu0 %v5560_v54  ;;  %1914 = vmatprep.subr.mxu1 %v5560_v54 }
 0x1c7   :  { %v4641_v42 = vpop.f32.mrf.mxu0  ;;  %v1838_v21 = vld [vmem:[#allocation7 + $0xc8] sm:$0xff]  ;;  %2132 = vmatpush1.msra.mxu0 %v2113_v53  ;;  %v2110_v53 = vld [vmem:[#allocation7 + $0x1d0] sm:$0xff] }
 0x1c8   :  { %5564 = vst [vmem:[#allocation59_spill] sm:$0xff] %v4636_v3  ;;  %5565 = vst [vmem:[#allocation60_spill] sm:$0xff] %v4641_v42  ;;  %v4649_v3 = vpop.f32.mrf.mxu1  ;;  %1915 = vmatpush1.msra.mxu1 %v1838_v21  ;;  %2133 = vmatprep.subr.mxu0 %v5560_v54 }
 0x1c9   :  { %v871_v63 = vpop.f32.mrf.mxu0  ;;  %1916 = vmatprep.subr.mxu1 %v5560_v54  ;;  %2134 = vmatpush1.msra.mxu0 %v2112_v16  ;;  %v1858_v16 = vld [vmem:[#allocation7 + $0x168] sm:$0xff] }
 0x1ca   :  { %v4645_v34 = vadd.f32 %v871_v63, %v4436_v2  ;;  %v653_v63 = vadd.f32 %v4441_v45, %v4448_v32  ;;  %v4662_v57 = vpop.f32.mrf.mxu1  ;;  %1917 = vmatpush1.msra.mxu1 %v1837_v62  ;;  %2135 = vmatprep.subr.mxu0 %v5560_v54  ;;  %v1859_v32 = vld [vmem:[#allocation7 + $0x170] sm:$0xff] }
 0x1cb   :  { %v4651_v58 = vpop.f32.mrf.mxu0  ;;  %1934 = vmatprep.subr.mxu1 %v5560_v54 }
 0x1cc   :  { %5566 = vst [vmem:[#allocation61_spill] sm:$0xff] %v4645_v34  ;;  %5567 = vst [vmem:[#allocation62_spill] sm:$0xff] %v4651_v58  ;;  %v2111_v58 = vld [vmem:[#allocation7 + $0x1d8] sm:$0xff]  ;;  %1935 = vmatpush2.msra.mxu1 %v1860_v9  ;;  %v4675_v62 = vpop.f32.mrf.mxu1 }
 0x1cd   :  { %v877_v2 = vpop.f32.mrf.mxu0  ;;  %2136 = vmatpush1.msra.mxu0 %v2111_v58  ;;  %1936 = vmatprep.subr.mxu1 %v5560_v54 }
 0x1ce   :  { %v4658_v34 = vadd.f32 %v877_v2, %v4445_v26  ;;  %v659_v26 = vadd.f32 %v4450_v46, %v4457_v30  ;;  %v1500_v2 = vlaneseq  ;;  %2137 = vmatprep.subr.mxu0 %v5560_v54  ;;  %1937 = vmatpush2.msra.mxu1 %v1859_v32  ;;  %v2108_v30 = vld [vmem:[#allocation7 + $0x1c0] sm:$0xff]  ;;  %v4688_v32 = vpop.f32.mrf.mxu1 }
 0x1cf   :  { %v879_v12 = vpop.f32.mrf.mxu0  ;;  %2138 = vmatpush1.msra.mxu0 %v2110_v53  ;;  %1938 = vmatprep.subr.mxu1 %v5560_v54  ;;  %v2107_v53 = vld [vmem:[#allocation7 + $0x1b8] sm:$0xff] }
 0x1d0   :  { %v4664_v42 = vadd.f32 %v879_v12, %v653_v63  ;;  %v2109_v12 = vld [vmem:[#allocation7 + $0x1c8] sm:$0xff]  ;;  %2139 = vmatprep.subr.mxu0 %v5560_v54  ;;  %1939 = vmatpush2.msra.mxu1 %v1858_v16 }
 0x1d1   :  { %v883_v45 = vpop.f32.mrf.mxu0  ;;  %2140 = vmatpush1.msra.mxu0 %v2109_v12  ;;  %1940 = vmatprep.subr.mxu1 %v5560_v54  ;;  %v533_v12 = vadd.f32 %v4480_v43, %v4270_v6  ;;  %v4702_v6 = vpop.f32.mrf.mxu1 }
 0x1d2   :  { %v4671_v21 = vadd.f32 %v883_v45, %v4454_v61  ;;  %v665_v61 = vadd.f32 %v4459_v47, %v4466_v52  ;;  %v1501_v45 = vshrl.u32 %v1500_v2, 7  ;;  %2141 = vmatprep.subr.mxu0 %v5560_v54  ;;  %v2106_v52 = vld [vmem:[#allocation7 + $0x1b0] sm:$0xff] }
 0x1d3   :  { %v885_v63 = vpop.f32.mrf.mxu0  ;;  %2142 = vmatpush1.msra.mxu0 %v2108_v30  ;;  %v2105_v30 = vld [vmem:[#allocation7 + $0x1a8] sm:$0xff] }
 0x1d4   :  { %5568 = vst [vmem:[#allocation63_spill] sm:$0xff] %v4671_v21  ;;  %v4677_v58 = vadd.f32 %v885_v63, %v659_v26  ;;  %2143 = vmatprep.subr.mxu0 %v5560_v54  ;;  %v901_v63 = vadd.f32 %v4488_v4, %v533_v12  ;;  %v1506_v4 = vsub.s32 1, %v1501_v45  ;;  %v2104_v12 = vld [vmem:[#allocation7 + $0x1a0] sm:$0xff] }
 0x1d5   :  { %v889_v46 = vpop.f32.mrf.mxu0  ;;  %2144 = vmatpush1.msra.mxu0 %v2107_v53  ;;  %v5575_v53 = vld [vmem:[#allocation19_spill] sm:$0xff] }
 0x1d6   :  { %5569 = vst [vmem:[#allocation64_spill] sm:$0xff] %v4677_v58  ;;  %v4684_v9 = vadd.f32 %v889_v46, %v4463_v1  ;;  %v5572_v1 = vld [vmem:[#allocation41_spill] sm:$0xff]  ;;  %v5573_v46 = vld [vmem:[#allocation40_spill] sm:$0xff]  ;;  %v1502_v58 = vsub.s32 0, %v1501_v45  ;;  %2145 = vmatprep.subr.mxu0 %v5560_v54 }
 0x1d7   :  { %v891_v26 = vpop.f32.mrf.mxu0  ;;  %v671_v2 = vadd.f32 %v5572_v1, %v4473_v25  ;;  %2146 = vmatpush1.msra.mxu0 %v2106_v52  ;;  %v5578_v52 = vld [vmem:[#allocation21_spill] sm:$0xff] }
 0x1d8   :  { %5570 = vst [vmem:[#allocation65_spill] sm:$0xff] %v4684_v9  ;;  %v4692_v16 = vadd.f32 %v891_v26, %v665_v61  ;;  %v1498_v61 = vld [vmem:[%s5511_s2] sm:$0x3]  ;;  %2147 = vmatprep.subr.mxu0 %v5560_v54  ;;  %s3819_s2 = smov 120  }
 0x1d9   :  { %v895_v47 = vpop.f32.mrf.mxu0  ;;  %v5576_v26 = vld [vmem:[#allocation42_spill] sm:$0xff]  ;;  %2148 = vmatpush1.msra.mxu0 %v2105_v30  ;;  %v4715_v21 = vrot.slane %v1498_v61, %v1502_v58  ;;  %v5580_v30 = vld [vmem:[#allocation23_spill] sm:$0xff] }
 0x1da   :  { %5571 = vst [vmem:[#allocation66_spill] sm:$0xff] %v4692_v16  ;;  %v4699_v9 = vadd.f32 %v895_v47, %v5573_v46  ;;  %v539_v25 = vadd.f32 %v5576_v26, %v5575_v53  ;;  %v1176_v46 = vadd.f32 %v4486_v15, %v901_v63  ;;  %2149 = vmatprep.subr.mxu0 %v5560_v54  ;;  %v5579_v53 = vld [vmem:[#allocation20_spill] sm:$0xff] }
 0x1db   :  { %v897_v43 = vpop.f32.mrf.mxu0  ;;  %2150 = vmatpush1.msra.mxu0 %v2104_v12 }
 0x1dc   :  { %5574 = vst [vmem:[#allocation41_spill] sm:$0xff] %v4699_v9  ;;  %v4709_v1 = vadd.f32 %v897_v43, %v671_v2  ;;  %v903_v9 = vadd.f32 %v4493_v56, %v539_v25  ;;  %v545_v2 = vadd.f32 %v5579_v53, %v5578_v52  ;;  %v4720_v43 = vpop.f32.mrf.mxu1  ;;  %2151 = vmatprep.subr.mxu0 %v5560_v54  ;;  %v5581_v25 = vld [vmem:[#allocation22_spill] sm:$0xff]  ;;  %v2103_v53 = vld [vmem:[#allocation7 + $0x198] sm:$0xff] }
 0x1dd   :  { %v1307_v47 = vpop.f32.mrf.mxu0  ;;  %2152 = vmatpush1.msra.mxu0 %v2103_v53 }
 0x1de   :  { %5577 = vst [vmem:[#allocation40_spill] sm:$0xff] %v4709_v1  ;;  %v1450_v16 = vadd.f32 %v1307_v47, %v4491_v10  ;;  %v4722_v1 = vrot.slane %v1498_v61, %v1506_v4  ;;  %v905_v15 = vadd.f32 %v4502_v24, %v545_v2  ;;  %v1178_v10 = vadd.f32 %v4500_v29, %v903_v9  ;;  %v4731_v52 = vpop.f32.mrf.mxu1  ;;  %v1857_v29 = vld [vmem:[#allocation7 + $0x160] sm:$0xff] }
 0x1df   :  { %v1309_v45 = vpop.f32.mrf.mxu0  ;;  %v551_v47 = vadd.f32 %v5581_v25, %v5580_v30  ;;  %v1179_v61 = vadd.f32 %v4507_v19, %v4498_v5  ;;  %1941 = vmatpush2.msra.mxu1 %v1857_v29  ;;  %2153 = vmatprep.subr.mxu0 %v5560_v54  ;;  %v5583_v5 = vld [vmem:[#allocation25_spill] sm:$0xff]  ;;  %v5584_v19 = vld [vmem:[#allocation24_spill] sm:$0xff] }
 0x1e0   :  { %v1451_v26 = vadd.f32 %v1309_v45, %v1176_v46  ;;  %v1510_v58 = vadd.f32 %v4715_v21, %v1450_v16  ;;  %v1180_v9 = vadd.f32 %v4514_v14, %v905_v15  ;;  %v5582_v16 = vld [vmem:[#allocation44_spill] sm:$0xff]  ;;  %1942 = vmatprep.subr.mxu1 %v5560_v54  ;;  %v4746_v15 = vpop.f32.mrf.mxu1 }
 0x1e1   :  { %v1313_v56 = vpop.f32.mrf.mxu0  ;;  %v1855_v29 = vld [vmem:[#allocation7 + $0x150] sm:$0xff] }
 0x1e2   :  { %v1452_v63 = vadd.f32 %v1313_v56, %v4495_v49  ;;  %v1511_v4 = vadd.f32 %v4722_v1, %v1451_v26  ;;  %v907_v49 = vadd.f32 %v5582_v16, %v551_v47  ;;  %v1558_v45 = vmax.f32 %v1510_v58, 0.0  ;;  %v2102_v47 = vld [vmem:[#allocation7 + $0x190] sm:$0xff] }
 0x1e3   :  { %v1315_v12 = vpop.f32.mrf.mxu0  ;;  %v557_v26 = vadd.f32 %v5584_v19, %v5583_v5  ;;  %2154 = vmatpush1.msra.mxu0 %v2102_v47  ;;  %v2100_v47 = vld [vmem:[#allocation7 + $0x180] sm:$0xff] }
 0x1e4   :  { %v1512_v24 = vadd.f32 %v4715_v21, %v1452_v63  ;;  %v1453_v46 = vadd.f32 %v1315_v12, %v1178_v10  ;;  %v5585_v10 = vld [vmem:[#allocation43_spill] sm:$0xff]  ;;  %v1559_v12 = vmax.f32 %v1511_v4, 0.0  ;;  %v1182_v16 = vadd.f32 %v4528_v20, %v907_v49  ;;  %2155 = vmatprep.subr.mxu0 %v5560_v54  ;;  %v4761_v49 = vpop.f32.mrf.mxu1 }
 0x1e5   :  { %v1319_v2 = vpop.f32.mrf.mxu0  ;;  %v1181_v14 = vadd.f32 %v4521_v48, %v5585_v10 }
 0x1e6   :  { %v1560_v56 = vmax.f32 %v1512_v24, 0.0  ;;  %v1513_v30 = vadd.f32 %v4722_v1, %v1453_v46  ;;  %v1454_v25 = vadd.f32 %v1319_v2, %v1179_v61  ;;  %v1856_v61 = vld [vmem:[#allocation7 + $0x158] sm:$0xff]  ;;  %v2101_v46 = vld [vmem:[#allocation7 + $0x188] sm:$0xff]  ;;  %v5586_v2 = vld [vmem:[#allocation46_spill] sm:$0xff] }
 0x1e7   :  { %v1321_v63 = vpop.f32.mrf.mxu0  ;;  %v909_v5 = vadd.f32 %v5586_v2, %v557_v26  ;;  %1943 = vmatpush2.msra.mxu1 %v1856_v61  ;;  %2156 = vmatpush1.msra.mxu0 %v2101_v46  ;;  %v2123_v61 = vld [vmem:[#allocation7 + $0x238] sm:$0xff]  ;;  %v1853_v46 = vld [vmem:[#allocation7 + $0x140] sm:$0xff] }
 0x1e8   :  { %v1561_v58 = vmax.f32 %v1513_v30, 0.0  ;;  %v1455_v24 = vadd.f32 %v1321_v63, %v1180_v9  ;;  %v4748_v53 = vmax.f32 %v1558_v45, %v1560_v56  ;;  %v1514_v48 = vadd.f32 %v4715_v21, %v1454_v25  ;;  %1944 = vmatprep.subr.mxu1 %v5560_v54  ;;  %v5587_v9 = vld [vmem:[#allocation27_spill] sm:$0xff]  ;;  %v5588_v45 = vld [vmem:[#allocation26_spill] sm:$0xff]  ;;  %v5589_v30 = vld [vmem:[#allocation45_spill] sm:$0xff]  ;;  %2157 = vmatprep.subr.mxu0 %v5560_v54 }
 0x1e9   :  { %v1325_v19 = vpop.f32.mrf.mxu0  ;;  %v563_v56 = vadd.f32 %v5588_v45, %v5587_v9  ;;  %v5590_v63 = vld [vmem:[#allocation52_spill] sm:$0xff]  ;;  %1945 = vmatpush2.msra.mxu1 %v1855_v29  ;;  %2158 = vmatpush1.msra.mxu0 %v2100_v47  ;;  %v1184_v2 = vadd.f32 %v4542_v17, %v909_v5 }
 0x1ea   :  { %v1456_v10 = vadd.f32 %v1325_v19, %v1181_v14  ;;  %v4754_v4 = vmax.f32 %v1559_v12, %v1561_v58  ;;  %v1183_v20 = vadd.f32 %v5590_v63, %v5589_v30  ;;  %v1515_v25 = vadd.f32 %v4722_v1, %v1455_v24  ;;  %1946 = vmatprep.subr.mxu1 %v5560_v54  ;;  %v1854_v58 = vld [vmem:[#allocation7 + $0x148] sm:$0xff]  ;;  %v5591_v19 = vld [vmem:[#allocation48_spill] sm:$0xff] }
 0x1eb   :  { %v1327_v26 = vpop.f32.mrf.mxu0  ;;  %v911_v9 = vadd.f32 %v5591_v19, %v563_v56  ;;  %1947 = vmatpush2.msra.mxu1 %v1854_v58  ;;  %2175 = vmatprep.subr.mxu0 %v5560_v54  ;;  %v1562_v29 = vmax.f32 %v1514_v48, 0.0  ;;  %v2122_v5 = vld [vmem:[#allocation7 + $0x230] sm:$0xff] }
 0x1ec   :  { %v1516_v14 = vadd.f32 %v4715_v21, %v1456_v10  ;;  %v1457_v12 = vadd.f32 %v1327_v26, %v1182_v16  ;;  %1948 = vmatprep.subr.mxu1 %v5560_v54  ;;  %2176 = vmatpush2.msra.mxu0 %v2123_v61  ;;  %v5592_v16 = vld [vmem:[#allocation47_spill] sm:$0xff]  ;;  %v4774_v26 = vpop.f32.mrf.mxu1  ;;  %v1563_v56 = vmax.f32 %v1515_v25, 0.0  ;;  %v5594_v58 = vld [vmem:[#allocation28_spill] sm:$0xff] }
 0x1ed   :  { %v1331_v45 = vpop.f32.mrf.mxu0  ;;  %v1185_v63 = vadd.f32 %v4550_v0, %v5592_v16  ;;  %1949 = vmatpush2.msra.mxu1 %v1853_v46  ;;  %2177 = vmatprep.subr.mxu0 %v5560_v54  ;;  %v1186_v0 = vadd.f32 %v4560_v44, %v911_v9  ;;  %v5597_v16 = vld [vmem:[#allocation50_spill] sm:$0xff]  ;;  %v5598_v44 = vld [vmem:[#allocation49_spill] sm:$0xff] }
 0x1ee   :  { %v1564_v30 = vmax.f32 %v1516_v14, 0.0  ;;  %v1517_v24 = vadd.f32 %v4722_v1, %v1457_v12  ;;  %v1458_v10 = vadd.f32 %v1331_v45, %v1183_v20  ;;  %2178 = vmatpush2.msra.mxu0 %v2122_v5  ;;  %v2121_v20 = vld [vmem:[#allocation7 + $0x228] sm:$0xff]  ;;  %1994 = vmatprep.subr.mxu1 %v5560_v54  ;;  %v5593_v12 = vld [vmem:[#allocation29_spill] sm:$0xff]  ;;  %v1187_v9 = vadd.f32 %v4570_v35, %v5598_v44  ;;  %v4794_v5 = vpop.f32.mrf.mxu1 }
 0x1ef   :  { %v1333_v17 = vpop.f32.mrf.mxu0  ;;  %v569_v61 = vadd.f32 %v5594_v58, %v5593_v12  ;;  %2179 = vmatprep.subr.mxu0 %v5560_v54 }
 0x1f0   :  { %v1565_v47 = vmax.f32 %v1517_v24, 0.0  ;;  %v1459_v48 = vadd.f32 %v1333_v17, %v1184_v2  ;;  %v4777_v14 = vmax.f32 %v1562_v29, %v1564_v30  ;;  %v1518_v46 = vadd.f32 %v4715_v21, %v1458_v10  ;;  %2180 = vmatpush2.msra.mxu0 %v2121_v20  ;;  %v2120_v2 = vld [vmem:[#allocation7 + $0x220] sm:$0xff]  ;;  %v5595_v29 = vld [vmem:[#allocation31_spill] sm:$0xff]  ;;  %v5599_v20 = vld [vmem:[#allocation53_spill] sm:$0xff] }
 0x1f1   :  { %v1337_v19 = vpop.f32.mrf.mxu0  ;;  %v5596_v30 = vld [vmem:[#allocation30_spill] sm:$0xff]  ;;  %v913_v17 = vadd.f32 %v5597_v16, %v569_v61  ;;  %2181 = vmatprep.subr.mxu0 %v5560_v54  ;;  %v5600_v16 = vld [vmem:[#allocation33_spill] sm:$0xff] }
 0x1f2   :  { %v1460_v45 = vadd.f32 %v1337_v19, %v1185_v63  ;;  %1658 = vrot.lane.b32.xlu1 %v4777_v14, %s3819_s2  ;;  %v4787_v25 = vmax.f32 %v1563_v56, %v1565_v47  ;;  %v575_v24 = vadd.f32 %v5596_v30, %v5595_v29  ;;  %v2119_v63 = vld [vmem:[#allocation7 + $0x218] sm:$0xff]  ;;  %v1519_v12 = vadd.f32 %v4722_v1, %v1459_v48  ;;  %v5601_v48 = vld [vmem:[#allocation32_spill] sm:$0xff] }
 0x1f3   :  { %v1339_v10 = vpop.f32.mrf.mxu0  ;;  %2182 = vmatpush2.msra.mxu0 %v2120_v2  ;;  %v1566_v35 = vmax.f32 %v1518_v46, 0.0  ;;  %v581_v44 = vadd.f32 %v5601_v48, %v5600_v16  ;;  %v2118_v2 = vld [vmem:[#allocation7 + $0x210] sm:$0xff]  ;;  %v5603_v16 = vld [vmem:[#allocation35_spill] sm:$0xff]  ;;  %v5604_v48 = vld [vmem:[#allocation34_spill] sm:$0xff] }
 0x1f4   :  { %v1520_v56 = vadd.f32 %v4715_v21, %v1460_v45  ;;  %v1461_v47 = vadd.f32 %v1339_v10, %v1186_v0  ;;  %1660 = vrot.lane.b32.xlu0 %v4787_v25, %s3819_s2  ;;  %v915_v58 = vadd.f32 %v5599_v20, %v575_v24  ;;  %2183 = vmatprep.subr.mxu0 %v5560_v54  ;;  %v4807_v45 = vpop.f32.mrf.mxu1  ;;  %v5602_v24 = vld [vmem:[#allocation51_spill] sm:$0xff]  ;;  %v1567_v46 = vmax.f32 %v1519_v12, 0.0 }
 0x1f5   :  { %v1343_v61 = vpop.f32.mrf.mxu0  ;;  %2184 = vmatpush2.msra.mxu0 %v2119_v63  ;;  %v1188_v0 = vadd.f32 %v4580_v36, %v913_v17  ;;  %v1189_v20 = vadd.f32 %v4590_v37, %v5602_v24  ;;  %v917_v36 = vadd.f32 %v4544_v50, %v581_v44  ;;  %v2116_v50 = vld [vmem:[#allocation7 + $0x200] sm:$0xff] }
 0x1f6   :  { %v1568_v19 = vmax.f32 %v1520_v56, 0.0  ;;  %v1521_v29 = vadd.f32 %v4722_v1, %v1461_v47  ;;  %v1462_v30 = vadd.f32 %v1343_v61, %v1187_v9  ;;  %2185 = vmatprep.subr.mxu0 %v5560_v54  ;;  %v2117_v47 = vld [vmem:[#allocation7 + $0x208] sm:$0xff]  ;;  %v1190_v61 = vadd.f32 %v4600_v38, %v915_v58  ;;  %v5605_v44 = vld [vmem:[#allocation54_spill] sm:$0xff] }
 0x1f7   :  { %v1345_v10 = vpop.f32.mrf.mxu0  ;;  %2186 = vmatpush2.msra.mxu0 %v2118_v2 }
 0x1f8   :  { %v1569_v56 = vmax.f32 %v1521_v29, 0.0  ;;  %1741 = vrot.lane.b32.xlu0 %v4777_v14, %s3820_s28  ;;  %v4814_v9 = vmax.f32 %v1566_v35, %v1568_v19  ;;  %v1463_v17 = vadd.f32 %v1345_v10, %v1188_v0  ;;  %2187 = vmatprep.subr.mxu0 %v5560_v54  ;;  %v1522_v37 = vadd.f32 %v4715_v21, %v1462_v30  ;;  %v4824_v19 = vpop.f32.mrf.mxu1  ;;  %v5606_v10 = vld [vmem:[#allocation56_spill] sm:$0xff] }
 0x1f9   :  { %v1349_v63 = vpop.f32.mrf.mxu0  ;;  %2188 = vmatpush2.msra.mxu0 %v2117_v47  ;;  %v587_v35 = vadd.f32 %v5604_v48, %v5603_v16  ;;  %v1191_v0 = vadd.f32 %v4610_v39, %v5605_v44  ;;  %v1192_v30 = vadd.f32 %v4620_v40, %v917_v36  ;;  %v5607_v16 = vld [vmem:[#allocation55_spill] sm:$0xff] }
 0x1fa   :  { %v1464_v12 = vadd.f32 %v1349_v63, %v1189_v20  ;;  %v4820_v29 = vmax.f32 %v1567_v46, %v1569_v56  ;;  %2189 = vmatprep.subr.mxu0 %v5560_v54  ;;  %v1523_v20 = vadd.f32 %v4722_v1, %v1463_v17  ;;  %v1570_v56 = vmax.f32 %v1522_v37, 0.0 }
 0x1fb   :  { %v1351_v2 = vpop.f32.mrf.mxu0  ;;  %v919_v24 = vadd.f32 %v5606_v10, %v587_v35  ;;  %2190 = vmatpush2.msra.mxu0 %v2116_v50  ;;  %v1193_v48 = vadd.f32 %v4630_v41, %v5607_v16  ;;  %v5608_v41 = vld [vmem:[#allocation57_spill] sm:$0xff] }
 0x1fc   :  { %v1524_v38 = vadd.f32 %v4715_v21, %v1464_v12  ;;  %v1465_v58 = vadd.f32 %v1351_v2, %v1190_v61  ;;  %1743 = vrot.lane.b32.xlu0 %v4814_v9, %s3820_s28  ;;  %1664 = vrot.lane.b32.xlu1 %v4820_v29, %s3819_s2  ;;  %v4839_v61 = vpop.f32.mrf.mxu1  ;;  %v1571_v17 = vmax.f32 %v1523_v20, 0.0 }
 0x1fd   :  { %v1355_v46 = vpop.f32.mrf.mxu0  ;;  %2409 = vmatprep.subr.mxu0 %v5560_v54  ;;  %v1194_v37 = vadd.f32 %v4639_v33, %v919_v24 }
 0x1fe   :  { %v1572_v63 = vmax.f32 %v1524_v38, 0.0  ;;  %v1525_v39 = vadd.f32 %v4722_v1, %v1465_v58  ;;  %v1466_v47 = vadd.f32 %v1355_v46, %v1191_v0  ;;  %v4849_v38 = vpop.f32.mrf.mxu1  ;;  %v1195_v46 = vadd.f32 %v4649_v3, %v5608_v41 }
 0x1ff   :  { %v1357_v12 = vpop.f32.mrf.mxu0 }
 0x200   :  { %v4843_v40 = vmax.f32 %v1570_v56, %v1572_v63  ;;  %v1573_v36 = vmax.f32 %v1525_v39, 0.0  ;;  %v1467_v35 = vadd.f32 %v1357_v12, %v1192_v30  ;;  %v1526_v50 = vadd.f32 %v4715_v21, %v1466_v47  ;;  %v4863_v3 = vpop.f32.mrf.mxu1 }
 0x201   :  { %v1361_v2 = vpop.f32.mrf.mxu0  ;;  %v1196_v12 = vadd.f32 %v4662_v57, %v4562_v7 }
 0x202   :  { %v1468_v44 = vadd.f32 %v1361_v2, %v1193_v48  ;;  %v3643_v0 = vpack.i.bf16 %v4843_v40, %v4814_v9  ;;  %v4851_v10 = vmax.f32 %v1571_v17, %v1573_v36  ;;  %v1527_v30 = vadd.f32 %v4722_v1, %v1467_v35 }
 0x203   :  { %v1363_v58 = vpop.f32.mrf.mxu0  ;;  %v1574_v24 = vmax.f32 %v1526_v50, 0.0  ;;  %v1197_v48 = vadd.f32 %v4675_v62, %v4567_v27  ;;  %v1198_v50 = vadd.f32 %v4688_v32, %v4572_v13  ;;  %v1199_v62 = vadd.f32 %v4702_v6, %v4577_v22 }
 0x204   :  { %v1528_v20 = vadd.f32 %v4715_v21, %v1468_v44  ;;  %v1469_v56 = vadd.f32 %v1363_v58, %v1194_v37  ;;  %3644 = vrot.lane.b32.xlu1 %v3643_v0, %s3819_s2  ;;  %1668 = vrot.lane.b32.xlu0 %v4851_v10, %s3819_s2  ;;  %v1575_v36 = vmax.f32 %v1527_v30, 0.0  ;;  %v4876_v0 = vpop.f32.mrf.mxu1  ;;  %v1200_v13 = vadd.f32 %v4720_v43, %v4582_v23 }
 0x205   :  { %v1367_v33 = vpop.f32.mrf.mxu0  ;;  %v1202_v43 = vadd.f32 %v4746_v15, %v4592_v51 }
 0x206   :  { %v1576_v63 = vmax.f32 %v1528_v20, 0.0  ;;  %v1529_v39 = vadd.f32 %v4722_v1, %v1469_v56  ;;  %v1470_v47 = vadd.f32 %v1367_v33, %v1195_v46  ;;  %v4889_v6 = vpop.f32.mrf.mxu1 }
 0x207   :  { %v1369_v16 = vpop.f32.mrf.mxu0 }
 0x208   :  { %v1577_v35 = vmax.f32 %v1529_v39, 0.0  ;;  %1745 = vrot.lane.b32.xlu1 %v4843_v40, %s3820_s28  ;;  %v4869_v17 = vmax.f32 %v1574_v24, %v1576_v63  ;;  %v1471_v2 = vadd.f32 %v1369_v16, %v1196_v12  ;;  %v1530_v7 = vadd.f32 %v4715_v21, %v1470_v47 }
 0x209   :  { %v1373_v37 = vpop.f32.mrf.mxu0  ;;  %v1201_v24 = vadd.f32 %v4731_v52, %v4587_v8  ;;  %v1203_v8 = vadd.f32 %v4761_v49, %v4597_v18 }
 0x20a   :  { %v1472_v57 = vadd.f32 %v1373_v37, %v1197_v48  ;;  %v4874_v44 = vmax.f32 %v1575_v36, %v1577_v35  ;;  %v1531_v32 = vadd.f32 %v4722_v1, %v1471_v2  ;;  %v1578_v30 = vmax.f32 %v1530_v7, 0.0  ;;  %v4900_v35 = vpop.f32.mrf.mxu1 }
 0x20b   :  { %v1375_v27 = vpop.f32.mrf.mxu0 }
 0x20c   :  { %v1532_v58 = vadd.f32 %v4715_v21, %v1472_v57  ;;  %v1473_v41 = vadd.f32 %v1375_v27, %v1198_v50  ;;  %1747 = vrot.lane.b32.xlu1 %v4869_v17, %s3820_s28  ;;  %1672 = vrot.lane.b32.xlu0 %v4874_v44, %s3819_s2  ;;  %v1579_v12 = vmax.f32 %v1531_v32, 0.0  ;;  %v4914_v18 = vpop.f32.mrf.mxu1 }
 0x20d   :  { %v1379_v46 = vpop.f32.mrf.mxu0 }
 0x20e   :  { %v1580_v20 = vmax.f32 %v1532_v58, 0.0  ;;  %v1533_v56 = vadd.f32 %v4722_v1, %v1473_v41  ;;  %v1474_v22 = vadd.f32 %v1379_v46, %v1199_v62  ;;  %v1204_v58 = vadd.f32 %v4774_v26, %v4602_v59 }
 0x20f   :  { %v1381_v33 = vpop.f32.mrf.mxu0  ;;  %v1205_v41 = vadd.f32 %v4794_v5, %v4607_v28  ;;  %v1207_v28 = vadd.f32 %v4824_v19, %v4617_v55  ;;  %v5609_v19 = vld [vmem:[#allocation37_spill] sm:$0xff] }
 0x210   :  { %v4893_v63 = vmax.f32 %v1578_v30, %v1580_v20  ;;  %v1581_v39 = vmax.f32 %v1533_v56, 0.0  ;;  %v1475_v47 = vadd.f32 %v1381_v33, %v1200_v13  ;;  %v1534_v16 = vadd.f32 %v4715_v21, %v1474_v22  ;;  %v1152_v33 = vpop.f32.mrf.mxu1 }
 0x211   :  { %v1385_v23 = vpop.f32.mrf.mxu0  ;;  %v1206_v56 = vadd.f32 %v4807_v45, %v4612_v11  ;;  %v1208_v11 = vadd.f32 %v4839_v61, %v4622_v31  ;;  %v5611_v61 = vld [vmem:[#allocation60_spill] sm:$0xff] }
 0x212   :  { %v1476_v48 = vadd.f32 %v1385_v23, %v1201_v24  ;;  %v3648_v36 = vpack.i.bf16 %v4893_v63, %v4869_v17  ;;  %v4902_v37 = vmax.f32 %v1579_v12, %v1581_v39  ;;  %v1535_v52 = vadd.f32 %v4722_v1, %v1475_v47 }
 0x213   :  { %v1387_v2 = vpop.f32.mrf.mxu0  ;;  %v1582_v15 = vmax.f32 %v1534_v16, 0.0  ;;  %v5610_v16 = vld [vmem:[#allocation36_spill] sm:$0xff] }
 0x214   :  { %v1536_v50 = vadd.f32 %v4715_v21, %v1476_v48  ;;  %v1477_v7 = vadd.f32 %v1387_v2, %v1202_v43  ;;  %3649 = vrot.lane.b32.xlu0 %v3648_v36, %s3819_s2  ;;  %1676 = vrot.lane.b32.xlu1 %v4902_v37, %s3819_s2  ;;  %v1583_v13 = vmax.f32 %v1535_v52, 0.0  ;;  %v641_v48 = vadd.f32 %v5610_v16, %v5609_v19  ;;  %v1154_v36 = vpop.f32.mrf.mxu1 }
 0x215   :  { %v1391_v51 = vpop.f32.mrf.mxu0 }
 0x216   :  { %v1584_v57 = vmax.f32 %v1536_v50, 0.0  ;;  %v1537_v27 = vadd.f32 %v4722_v1, %v1477_v7  ;;  %v1478_v62 = vadd.f32 %v1391_v51, %v1203_v8  ;;  %v1209_v8 = vadd.f32 %v4849_v38, %v4627_v60  ;;  %v1158_v38 = vpop.f32.mrf.mxu1 }
 0x217   :  { %v1393_v49 = vpop.f32.mrf.mxu0  ;;  %v937_v7 = vadd.f32 %v5611_v61, %v641_v48 }
 0x218   :  { %v1585_v32 = vmax.f32 %v1537_v27, 0.0  ;;  %1749 = vrot.lane.b32.xlu0 %v4893_v63, %s3820_s28  ;;  %v4920_v46 = vmax.f32 %v1582_v15, %v1584_v57  ;;  %v1479_v30 = vadd.f32 %v1393_v49, %v1204_v58  ;;  %v1538_v59 = vadd.f32 %v4715_v21, %v1478_v62  ;;  %v5612_v57 = vld [vmem:[#allocation58_spill] sm:$0xff] }
 0x219   :  { %v1397_v20 = vpop.f32.mrf.mxu0  ;;  %v1210_v27 = vadd.f32 %v4863_v3, %v5612_v57 }
 0x21a   :  { %v1480_v26 = vadd.f32 %v1397_v20, %v1205_v41  ;;  %v4925_v22 = vmax.f32 %v1583_v13, %v1585_v32  ;;  %v1539_v45 = vadd.f32 %v4722_v1, %v1479_v30  ;;  %v1586_v12 = vmax.f32 %v1538_v59, 0.0  ;;  %v5613_v41 = vld [vmem:[#allocation39_spill] sm:$0xff]  ;;  %v5614_v13 = vld [vmem:[#allocation38_spill] sm:$0xff] }
 0x21b   :  { %v1399_v24 = vpop.f32.mrf.mxu0  ;;  %v647_v60 = vadd.f32 %v5614_v13, %v5613_v41  ;;  %v5615_v20 = vld [vmem:[#allocation59_spill] sm:$0xff] }
 0x21c   :  { %v1540_v5 = vadd.f32 %v4715_v21, %v1480_v26  ;;  %v1481_v39 = vadd.f32 %v1399_v24, %v1206_v56  ;;  %1751 = vrot.lane.b32.xlu0 %v4920_v46, %s3820_s28  ;;  %1680 = vrot.lane.b32.xlu1 %v4925_v22, %s3819_s2  ;;  %v1587_v51 = vmax.f32 %v1539_v45, 0.0  ;;  %v1211_v56 = vadd.f32 %v4876_v0, %v5615_v20 }
 0x21d   :  { %v1403_v47 = vpop.f32.mrf.mxu0  ;;  %v1212_v24 = vadd.f32 %v4889_v6, %v937_v7 }
 0x21e   :  { %v1588_v23 = vmax.f32 %v1540_v5, 0.0  ;;  %v1541_v43 = vadd.f32 %v4722_v1, %v1481_v39  ;;  %v1482_v55 = vadd.f32 %v1403_v47, %v1207_v28  ;;  %v5616_v28 = vld [vmem:[#allocation62_spill] sm:$0xff] }
 0x21f   :  { %v1405_v2 = vpop.f32.mrf.mxu0  ;;  %v939_v5 = vadd.f32 %v5616_v28, %v647_v60 }
 0x220   :  { %v4942_v52 = vmax.f32 %v1586_v12, %v1588_v23  ;;  %v1589_v50 = vmax.f32 %v1541_v43, 0.0  ;;  %v1483_v31 = vadd.f32 %v1405_v2, %v1208_v11  ;;  %v1542_v62 = vadd.f32 %v4715_v21, %v1482_v55  ;;  %v5617_v12 = vld [vmem:[#allocation61_spill] sm:$0xff]  ;;  %v1160_v43 = vpop.f32.mrf.mxu1 }
 0x221   :  { %v1409_v15 = vpop.f32.mrf.mxu0  ;;  %v1213_v23 = vadd.f32 %v4900_v35, %v5617_v12 }
 0x222   :  { %v1484_v58 = vadd.f32 %v1409_v15, %v1209_v8  ;;  %v3653_v49 = vpack.i.bf16 %v4942_v52, %v4920_v46  ;;  %v4952_v30 = vmax.f32 %v1587_v51, %v1589_v50  ;;  %v1543_v59 = vadd.f32 %v4722_v1, %v1483_v31  ;;  %v1164_v61 = vpop.f32.mrf.mxu1 }
 0x223   :  { %v1411_v32 = vpop.f32.mrf.mxu0  ;;  %v1590_v11 = vmax.f32 %v1542_v62, 0.0  ;;  %v1214_v8 = vadd.f32 %v4914_v18, %v939_v5  ;;  %v1215_v51 = vadd.f32 %v1152_v33, %v4658_v34  ;;  %v1216_v18 = vadd.f32 %v1154_v36, %v4664_v42  ;;  %v5618_v34 = vld [vmem:[#allocation63_spill] sm:$0xff] }
 0x224   :  { %v1544_v3 = vadd.f32 %v4715_v21, %v1484_v58  ;;  %v1485_v26 = vadd.f32 %v1411_v32, %v1210_v27  ;;  %3654 = vrot.lane.b32.xlu1 %v3653_v49, %s3819_s2  ;;  %1684 = vrot.lane.b32.xlu0 %v4952_v30, %s3819_s2  ;;  %v1591_v19 = vmax.f32 %v1543_v59, 0.0  ;;  %v1217_v33 = vadd.f32 %v1158_v38, %v5618_v34  ;;  %v1166_v60 = vpop.f32.mrf.mxu1 }
 0x225   :  { %v1415_v39 = vpop.f32.mrf.mxu0 }
 0x226   :  { %v1592_v45 = vmax.f32 %v1544_v3, 0.0  ;;  %v1545_v47 = vadd.f32 %v4722_v1, %v1485_v26  ;;  %v1486_v0 = vadd.f32 %v1415_v39, %v1211_v56  ;;  %v5619_v3 = vld [vmem:[#allocation64_spill] sm:$0xff]  ;;  %v1170_v5 = vpop.f32.mrf.mxu1 }
 0x227   :  { %v1417_v55 = vpop.f32.mrf.mxu0  ;;  %v1218_v26 = vadd.f32 %v1160_v43, %v5619_v3 }
 0x228   :  { %v1593_v16 = vmax.f32 %v1545_v47, 0.0  ;;  %v1487_v48 = vadd.f32 %v1417_v55, %v1212_v24  ;;  %1753 = vrot.lane.b32.xlu1 %v4942_v52, %s3820_s28  ;;  %v4968_v6 = vmax.f32 %v1590_v11, %v1592_v45  ;;  %v1546_v50 = vadd.f32 %v4715_v21, %v1486_v0  ;;  %v5620_v11 = vld [vmem:[#allocation65_spill] sm:$0xff] }
 0x229   :  { %v1421_v2 = vpop.f32.mrf.mxu0  ;;  %v1219_v45 = vadd.f32 %v1164_v61, %v5620_v11 }
 0x22a   :  { %v1488_v31 = vadd.f32 %v1421_v2, %v1213_v23  ;;  %1686 = vrot.lane.b32.xlu0 %v4968_v6, %s3819_s2  ;;  %v4974_v35 = vmax.f32 %v1591_v19, %v1593_v16  ;;  %v1547_v15 = vadd.f32 %v4722_v1, %v1487_v48  ;;  %v1594_v58 = vmax.f32 %v1546_v50, 0.0  ;;  %v5621_v23 = vld [vmem:[#allocation66_spill] sm:$0xff] }
 0x22b   :  { %v1423_v7 = vpop.f32.mrf.mxu0  ;;  %v1220_v43 = vadd.f32 %v1166_v60, %v5621_v23 }
 0x22c   :  { %v1548_v57 = vadd.f32 %v4715_v21, %v1488_v31  ;;  %v1489_v27 = vadd.f32 %v1423_v7, %v1214_v8  ;;  %1755 = vrot.lane.b32.xlu1 %v4968_v6, %s3820_s28  ;;  %v1595_v20 = vmax.f32 %v1547_v15, 0.0  ;;  %v5622_v8 = vld [vmem:[#allocation41_spill] sm:$0xff]  ;;  %v1172_v31 = vpop.f32.mrf.mxu1 }
 0x22d   :  { %v1427_v62 = vpop.f32.mrf.mxu0  ;;  %v1221_v50 = vadd.f32 %v1170_v5, %v5622_v8 }
 0x22e   :  { %v1596_v49 = vmax.f32 %v1548_v57, 0.0  ;;  %v1549_v41 = vadd.f32 %v4722_v1, %v1489_v27  ;;  %v1490_v13 = vadd.f32 %v1427_v62, %v1215_v51  ;;  %1688 = vrot.lane.b32.xlu0 %v4974_v35, %s3819_s2 }
 0x22f   :  { %v1429_v32 = vpop.f32.mrf.mxu0 }
 0x230   :  { %v1597_v56 = vmax.f32 %v1549_v41, 0.0  ;;  %v1491_v59 = vadd.f32 %v1429_v32, %v1216_v18  ;;  %1656 = vrot.lane.b32.xlu1 %v4754_v4, %s3819_s2  ;;  %v4988_v42 = vmax.f32 %v1594_v58, %v1596_v49  ;;  %v1550_v24 = vadd.f32 %v4715_v21, %v1490_v13  ;;  %v5623_v18 = vld [vmem:[#allocation40_spill] sm:$0xff] }
 0x231   :  { %v1433_v36 = vpop.f32.mrf.mxu0  ;;  %v1222_v62 = vadd.f32 %v1172_v31, %v5623_v18 }
 0x232   :  { %v1492_v28 = vadd.f32 %v1433_v36, %v1217_v33  ;;  %1739 = vrot.lane.b32.xlu0 %v4748_v53, %s3820_s28  ;;  %v4994_v38 = vmax.f32 %v1595_v20, %v1597_v56  ;;  %v1551_v47 = vadd.f32 %v4722_v1, %v1491_v59  ;;  %v1598_v19 = vmax.f32 %v1550_v24, 0.0 }
 0x233   :  { %v1435_v39 = vpop.f32.mrf.mxu0 }
 0x234   :  { %v1552_v0 = vadd.f32 %v4715_v21, %v1492_v28  ;;  %v1493_v12 = vadd.f32 %v1435_v39, %v1218_v26  ;;  %1654 = vrot.lane.b32.xlu1 %v4748_v53, %s3819_s2  ;;  %v1599_v7 = vmax.f32 %v1551_v47, 0.0 }
 0x235   :  { %v1439_v55 = vpop.f32.mrf.mxu0 }
 0x236   :  { %v1600_v16 = vmax.f32 %v1552_v0, 0.0  ;;  %v1553_v48 = vadd.f32 %v4722_v1, %v1493_v12  ;;  %v1494_v2 = vadd.f32 %v1439_v55, %v1219_v45  ;;  %1692 = vrot.lane.b32.xlu0 %v4994_v38, %s3819_s2  ;;  %v1827_v45 = vld [vmem:[#allocation7 + $0x78] sm:$0xff] }
 0x237   :  { %v1441_v61 = vpop.f32.mrf.mxu0 }
 0x238   :  { %v1601_v51 = vmax.f32 %v1553_v48, 0.0  ;;  %v1495_v15 = vadd.f32 %v1441_v61, %v1220_v43  ;;  %1757 = vrot.lane.b32.xlu1 %v4988_v42, %s3820_s28  ;;  %v5008_v57 = vmax.f32 %v1598_v19, %v1600_v16  ;;  %v1554_v58 = vadd.f32 %v4715_v21, %v1494_v2  ;;  %v1826_v43 = vld [vmem:[#allocation7 + $0x70] sm:$0xff]  ;;  %v2397_v61 = vld [vmem:[#allocation7 + $0x378] sm:$0xff] }
 0x239   :  { %v1445_v27 = vpop.f32.mrf.mxu0  ;;  %v1822_v48 = vld [vmem:[#allocation7 + $0x50] sm:$0xff] }
 0x23a   :  { %v1496_v49 = vadd.f32 %v1445_v27, %v1221_v50  ;;  %1690 = vrot.lane.b32.xlu0 %v4988_v42, %s3819_s2  ;;  %v5014_v41 = vmax.f32 %v1599_v7, %v1601_v51  ;;  %v1555_v34 = vadd.f32 %v4722_v1, %v1495_v15  ;;  %v1602_v32 = vmax.f32 %v1554_v58, 0.0  ;;  %v1821_v27 = vld [vmem:[#allocation7 + $0x48] sm:$0xff] }
 0x23b   :  { %v1447_v13 = vpop.f32.mrf.mxu0 }
 0x23c   :  { %v1556_v33 = vadd.f32 %v4715_v21, %v1496_v49  ;;  %v1497_v60 = vadd.f32 %v1447_v13, %v1222_v62  ;;  %1694 = vrot.lane.b32.xlu1 %v5008_v57, %s3819_s2  ;;  %v1603_v59 = vmax.f32 %v1555_v34, 0.0  ;;  %v2396_v62 = vld [vmem:[#allocation7 + $0x370] sm:$0xff]  ;;  %v2395_v13 = vld [vmem:[#allocation7 + $0x368] sm:$0xff]  ;;  %v1819_v34 = vld [vmem:[#allocation7 + $0x38] sm:$0xff] }
 0x23e   :  { %v1604_v20 = vmax.f32 %v1556_v33, 0.0  ;;  %v1557_v56 = vadd.f32 %v4722_v1, %v1497_v60  ;;  %1759 = vrot.lane.b32.xlu0 %v5008_v57, %s3820_s28  ;;  %v1818_v33 = vld [vmem:[#allocation7 + $0x30] sm:$0xff]  ;;  %v2393_v60 = vld [vmem:[#allocation7 + $0x358] sm:$0xff] }
 0x240   :  { %v1605_v36 = vmax.f32 %v1557_v56, 0.0  ;;  %1696 = vrot.lane.b32.xlu1 %v5014_v41, %s3819_s2  ;;  %v5025_v3 = vmax.f32 %v1602_v32, %v1604_v20  ;;  %v1817_v20 = vld [vmem:[#allocation7 + $0x28] sm:$0xff] }
 0x242   :  { %v5027_v26 = vmax.f32 %v1603_v59, %v1605_v36  ;;  %v2392_v36 = vld [vmem:[#allocation7 + $0x350] sm:$0xff] }
 0x244   :  { %1761 = vrot.lane.b32.xlu1 %v5025_v3, %s3820_s28  ;;  %1700 = vrot.lane.b32.xlu0 %v5027_v26, %s3819_s2 }
 0x248   :  { %1698 = vrot.lane.b32.xlu0 %v5025_v3, %s3819_s2 }
 0x264   :  { %v1659_v1 = vpop.permute.xlu1 %1658 }
 0x266   :  { %v1661_v21 = vpop.permute.xlu0 %1660 }
 0x267   :  { %v1704_v24 = vsel %vm1702_vm2, %v1659_v1, %v1661_v21 }
 0x268   :  { %v5041_v11 = vmax.f32 %v4777_v14, %v1704_v24  ;;  %v1825_v14 = vld [vmem:[#allocation7 + $0x68] sm:$0xff] }
 0x26a   :  { %v1742_v28 = vpop.permute.xlu0 %1741 }
 0x26b   :  { %v1777_v5 = vsel %vm1775_vm3, %v1661_v21, %v1742_v28  ;;  %v1816_v21 = vld [vmem:[#allocation7 + $0x20] sm:$0xff] }
 0x26c   :  { %v5038_v39 = vmax.f32 %v4787_v25, %v1777_v5  ;;  %v1824_v25 = vld [vmem:[#allocation7 + $0x60] sm:$0xff] }
 0x26e   :  { %3263 = vmatprep.mubr.msk.f32.mxu1 %vm1861_vm4, %v5038_v39  ;;  %v1744_v47 = vpop.permute.xlu0 %1743  ;;  %v1665_v0 = vpop.permute.xlu1 %1664 }
 0x26f   :  { %v1778_v12 = vsel %vm1775_vm3, %v1665_v0, %v1744_v47  ;;  %1951 = vmatmul.mubr.f32.vlgmr.msra.gmra.mxu1 %v5041_v11 }
 0x270   :  { %v5048_v23 = vmax.f32 %v4820_v29, %v1778_v12  ;;  %1995 = vmatpush1.msra.mxu1 %v1827_v45  ;;  %v1823_v29 = vld [vmem:[#allocation7 + $0x58] sm:$0xff]  ;;  %v2391_v45 = vld [vmem:[#allocation7 + $0x348] sm:$0xff] }
 0x271   :  { %1996 = vmatprep.subr.mxu1 %v5560_v54 }
 0x272   :  { %3264 = vmatprep.mubr.msk.f32.mxu1 %vm1861_vm4, %v5048_v23  ;;  %3279 = vmatprep.mubr.msk.f32.mxu0 %vm1861_vm4, %v5048_v23 }
 0x273   :  { %1997 = vmatpush1.msra.mxu1 %v1826_v43 }
 0x274   :  { %1998 = vmatprep.subr.mxu1 %v5560_v54 }
 0x275   :  { %1999 = vmatpush1.msra.mxu1 %v1825_v14 }
 0x276   :  { %v3645_v55 = vpop.permute.xlu1 %3644  ;;  %2000 = vmatprep.subr.mxu1 %v5560_v54  ;;  %v1669_v8 = vpop.permute.xlu0 %1668 }
 0x277   :  { %v3647_v19 = vunpack.i.h.bf16 %v3645_v55  ;;  %v3646_v16 = vunpack.i.l.bf16 %v3645_v55  ;;  %2001 = vmatpush1.msra.mxu1 %v1824_v25  ;;  %v2390_v25 = vld [vmem:[#allocation7 + $0x340] sm:$0xff] }
 0x278   :  { %2002 = vmatprep.subr.mxu1 %v5560_v54 }
 0x279   :  { %v1705_v2 = vsel %vm1702_vm2, %v3646_v16, %v1665_v0  ;;  %2003 = vmatpush1.msra.mxu1 %v1823_v29  ;;  %v1706_v7 = vsel %vm1702_vm2, %v3647_v19, %v1669_v8  ;;  %v2389_v19 = vld [vmem:[#allocation7 + $0x338] sm:$0xff]  ;;  %v1813_v16 = vld [vmem:[#allocation7 + $0x8] sm:$0xff] }
 0x27a   :  { %v1746_v50 = vpop.permute.xlu1 %1745  ;;  %v5060_v31 = vmax.f32 %v4814_v9, %v1705_v2  ;;  %2004 = vmatprep.subr.mxu1 %v5560_v54  ;;  %v5072_v9 = vmax.f32 %v4843_v40, %v1706_v7  ;;  %v1820_v40 = vld [vmem:[#allocation7 + $0x40] sm:$0xff]  ;;  %v2387_v2 = vld [vmem:[#allocation7 + $0x328] sm:$0xff] }
 0x27b   :  { %v1779_v51 = vsel %vm1775_vm3, %v1669_v8, %v1746_v50  ;;  %2005 = vmatpush1.msra.mxu1 %v1822_v48  ;;  %v1812_v48 = vld [vmem:[#allocation7] sm:$0xff]  ;;  %v1835_v50 = vld [vmem:[#allocation7 + $0xb8] sm:$0xff] }
 0x27c   :  { %v5066_v15 = vmax.f32 %v4851_v10, %v1779_v51  ;;  %1956 = vmatmul.mubr.f32.gmra.mxu1 %v5060_v31  ;;  %2192 = vmatmul.mubr.f32.vlgmr.msra.gmra.mxu0 %v5060_v31  ;;  %v2386_v7 = vld [vmem:[#allocation7 + $0x320] sm:$0xff] }
 0x27d   :  { %2006 = vmatprep.subr.mxu1 %v5560_v54  ;;  %2410 = vmatpush1.msra.mxu0 %v2397_v61 }
 0x27e   :  { %3265 = vmatprep.mubr.msk.f32.mxu1 %vm1861_vm4, %v5066_v15  ;;  %3280 = vmatprep.mubr.msk.f32.mxu0 %vm1861_vm4, %v5066_v15  ;;  %v1748_v18 = vpop.permute.xlu1 %1747  ;;  %v1673_v10 = vpop.permute.xlu0 %1672 }
 0x27f   :  { %v1780_v58 = vsel %vm1775_vm3, %v1673_v10, %v1748_v18  ;;  %2007 = vmatpush1.msra.mxu1 %v1821_v27  ;;  %2411 = vmatprep.subr.mxu0 %v5560_v54  ;;  %v1834_v18 = vld [vmem:[#allocation7 + $0xb0] sm:$0xff] }
 0x280   :  { %v5081_v49 = vmax.f32 %v4874_v44, %v1780_v58  ;;  %1961 = vmatmul.mubr.f32.gmra.mxu1 %v5072_v9  ;;  %2197 = vmatmul.mubr.f32.gmra.mxu0 %v5072_v9  ;;  %v2394_v44 = vld [vmem:[#allocation7 + $0x360] sm:$0xff] }
 0x281   :  { %2008 = vmatprep.subr.mxu1 %v5560_v54  ;;  %2412 = vmatpush1.msra.mxu0 %v2396_v62 }
 0x282   :  { %3266 = vmatprep.mubr.msk.f32.mxu1 %vm1861_vm4, %v5081_v49  ;;  %3281 = vmatprep.mubr.msk.f32.mxu0 %vm1861_vm4, %v5081_v49 }
 0x283   :  { %2009 = vmatpush1.msra.mxu1 %v1820_v40  ;;  %2413 = vmatprep.subr.mxu0 %v5560_v54  ;;  %v2385_v40 = vld [vmem:[#allocation7 + $0x318] sm:$0xff] }
 0x284   :  { %2010 = vmatprep.subr.mxu1 %v5560_v54  ;;  %2414 = vmatpush1.msra.mxu0 %v2395_v13 }
 0x285   :  { %2011 = vmatpush1.msra.mxu1 %v1819_v34  ;;  %2415 = vmatprep.subr.mxu0 %v5560_v54  ;;  %v1833_v34 = vld [vmem:[#allocation7 + $0xa8] sm:$0xff] }
 0x286   :  { %v3650_v32 = vpop.permute.xlu0 %3649  ;;  %2012 = vmatprep.subr.mxu1 %v5560_v54  ;;  %2416 = vmatpush1.msra.mxu0 %v2394_v44  ;;  %v1677_v28 = vpop.permute.xlu1 %1676 }
 0x287   :  { %v3652_v56 = vunpack.i.h.bf16 %v3650_v32  ;;  %v3651_v59 = vunpack.i.l.bf16 %v3650_v32  ;;  %2013 = vmatpush1.msra.mxu1 %v1818_v33  ;;  %2417 = vmatprep.subr.mxu0 %v5560_v54 }
 0x288   :  { %2014 = vmatprep.subr.mxu1 %v5560_v54  ;;  %2418 = vmatpush1.msra.mxu0 %v2393_v60  ;;  %v2384_v60 = vld [vmem:[#allocation7 + $0x310] sm:$0xff] }
 0x289   :  { %v1707_v1 = vsel %vm1702_vm2, %v3651_v59, %v1673_v10  ;;  %2015 = vmatpush1.msra.mxu1 %v1817_v20  ;;  %2419 = vmatprep.subr.mxu0 %v5560_v54  ;;  %v1708_v47 = vsel %vm1702_vm2, %v3652_v56, %v1677_v28  ;;  %v2383_v59 = vld [vmem:[#allocation7 + $0x308] sm:$0xff] }
 0x28a   :  { %v5099_v24 = vmax.f32 %v4869_v17, %v1707_v1  ;;  %v1750_v5 = vpop.permute.xlu0 %1749  ;;  %2016 = vmatprep.subr.mxu1 %v5560_v54  ;;  %2420 = vmatpush1.msra.mxu0 %v2392_v36  ;;  %v1815_v17 = vld [vmem:[#allocation7 + $0x18] sm:$0xff]  ;;  %v5112_v43 = vmax.f32 %v4893_v63, %v1708_v47  ;;  %v1814_v63 = vld [vmem:[#allocation7 + $0x10] sm:$0xff] }
 0x28b   :  { %v1781_v0 = vsel %vm1775_vm3, %v1677_v28, %v1750_v5  ;;  %2017 = vmatpush1.msra.mxu1 %v1816_v21  ;;  %2421 = vmatprep.subr.mxu0 %v5560_v54  ;;  %v1831_v21 = vld [vmem:[#allocation7 + $0x98] sm:$0xff]  ;;  %v2382_v5 = vld [vmem:[#allocation7 + $0x300] sm:$0xff] }
 0x28c   :  { %v5106_v12 = vmax.f32 %v4902_v37, %v1781_v0  ;;  %1966 = vmatmul.mubr.f32.gmra.mxu1 %v5099_v24  ;;  %2202 = vmatmul.mubr.f32.gmra.mxu0 %v5099_v24 }
 0x28d   :  { %2018 = vmatprep.subr.mxu1 %v5560_v54  ;;  %2422 = vmatpush1.msra.mxu0 %v2391_v45  ;;  %v1830_v45 = vld [vmem:[#allocation7 + $0x90] sm:$0xff] }
 0x28e   :  { %3267 = vmatprep.mubr.msk.f32.mxu1 %vm1861_vm4, %v5106_v12  ;;  %3282 = vmatprep.mubr.msk.f32.mxu0 %vm1861_vm4, %v5106_v12  ;;  %v1752_v14 = vpop.permute.xlu0 %1751  ;;  %v1681_v37 = vpop.permute.xlu1 %1680 }
 0x28f   :  { %v1782_v55 = vsel %vm1775_vm3, %v1681_v37, %v1752_v14  ;;  %2019 = vmatpush1.msra.mxu1 %v1815_v17  ;;  %2423 = vmatprep.subr.mxu0 %v5560_v54 }
 0x290   :  { %v5121_v29 = vmax.f32 %v4925_v22, %v1782_v55  ;;  %1971 = vmatmul.mubr.f32.gmra.mxu1 %v5112_v43  ;;  %2207 = vmatmul.mubr.f32.gmra.mxu0 %v5112_v43  ;;  %v2388_v22 = vld [vmem:[#allocation7 + $0x330] sm:$0xff]  ;;  %v1828_v55 = vld [vmem:[#allocation7 + $0x80] sm:$0xff] }
 0x291   :  { %2020 = vmatprep.subr.mxu1 %v5560_v54  ;;  %2424 = vmatpush1.msra.mxu0 %v2390_v25 }
 0x292   :  { %3268 = vmatprep.mubr.msk.f32.mxu1 %vm1861_vm4, %v5121_v29  ;;  %3283 = vmatprep.mubr.msk.f32.mxu0 %vm1861_vm4, %v5121_v29 }
 0x293   :  { %2021 = vmatpush1.msra.mxu1 %v1814_v63  ;;  %2425 = vmatprep.subr.mxu0 %v5560_v54 }
 0x294   :  { %2022 = vmatprep.subr.mxu1 %v5560_v54  ;;  %2426 = vmatpush1.msra.mxu0 %v2389_v19  ;;  %v2404_v19 = vld [vmem:[#allocation7 + $0x3b0] sm:$0xff] }
 0x295   :  { %2023 = vmatpush1.msra.mxu1 %v1813_v16  ;;  %2427 = vmatprep.subr.mxu0 %v5560_v54 }
 0x296   :  { %v3655_v8 = vpop.permute.xlu1 %3654  ;;  %2024 = vmatprep.subr.mxu1 %v5560_v54  ;;  %2428 = vmatpush1.msra.mxu0 %v2388_v22  ;;  %v1685_v27 = vpop.permute.xlu0 %1684 }
 0x297   :  { %v3656_v61 = vunpack.i.l.bf16 %v3655_v8  ;;  %2025 = vmatpush1.msra.mxu1 %v1812_v48  ;;  %2429 = vmatprep.subr.mxu0 %v5560_v54  ;;  %v3657_v51 = vunpack.i.h.bf16 %v3655_v8  ;;  %v2256_v48 = vld [vmem:[#allocation7 + $0x2b8] sm:$0xff] }
 0x298   :  { %2042 = vmatprep.subr.mxu1 %v5560_v54  ;;  %2430 = vmatpush1.msra.mxu0 %v2387_v2 }
 0x299   :  { %v1709_v10 = vsel %vm1702_vm2, %v3656_v61, %v1681_v37  ;;  %2043 = vmatpush2.msra.mxu1 %v1835_v50  ;;  %2431 = vmatprep.subr.mxu0 %v5560_v54  ;;  %v1710_v44 = vsel %vm1702_vm2, %v3657_v51, %v1685_v27  ;;  %v2255_v50 = vld [vmem:[#allocation7 + $0x2b0] sm:$0xff]  ;;  %v2401_v51 = vld [vmem:[#allocation7 + $0x398] sm:$0xff] }
 0x29a   :  { %v5139_v62 = vmax.f32 %v4920_v46, %v1709_v10  ;;  %v1754_v58 = vpop.permute.xlu1 %1753  ;;  %2044 = vmatprep.subr.mxu1 %v5560_v54  ;;  %2432 = vmatpush1.msra.mxu0 %v2386_v7  ;;  %v5154_v20 = vmax.f32 %v4942_v52, %v1710_v44  ;;  %v2399_v10 = vld [vmem:[#allocation7 + $0x388] sm:$0xff] }
 0x29b   :  { %v1783_v13 = vsel %vm1775_vm3, %v1685_v27, %v1754_v58  ;;  %2045 = vmatpush2.msra.mxu1 %v1834_v18  ;;  %2433 = vmatprep.subr.mxu0 %v5560_v54  ;;  %v2254_v27 = vld [vmem:[#allocation7 + $0x2a8] sm:$0xff] }
 0x29c   :  { %v5146_v33 = vmax.f32 %v4952_v30, %v1783_v13  ;;  %1976 = vmatmul.mubr.f32.gmra.mxu1 %v5139_v62  ;;  %2212 = vmatmul.mubr.f32.gmra.mxu0 %v5139_v62  ;;  %v1687_v46 = vpop.permute.xlu0 %1686  ;;  %v1832_v30 = vld [vmem:[#allocation7 + $0xa0] sm:$0xff]  ;;  %v2250_v58 = vld [vmem:[#allocation7 + $0x288] sm:$0xff] }
 0x29d   :  { %2046 = vmatprep.subr.mxu1 %v5560_v54  ;;  %2434 = vmatpush1.msra.mxu0 %v2385_v40  ;;  %v2248_v40 = vld [vmem:[#allocation7 + $0x278] sm:$0xff]  ;;  %v2246_v44 = vld [vmem:[#allocation7 + $0x268] sm:$0xff] }
 0x29e   :  { %3269 = vmatprep.mubr.msk.f32.mxu1 %vm1861_vm4, %v5146_v33  ;;  %2047 = vmatpush2.msra.mxu1 %v1833_v34  ;;  %v1756_v32 = vpop.permute.xlu1 %1755  ;;  %v2247_v34 = vld [vmem:[#allocation7 + $0x270] sm:$0xff] }
 0x29f   :  { %3284 = vmatprep.mubr.msk.f32.mxu0 %vm1861_vm4, %v5146_v33  ;;  %2435 = vmatprep.subr.mxu0 %v5560_v54 }
 0x2a0   :  { %2048 = vmatprep.subr.mxu1 %v5560_v54  ;;  %2436 = vmatpush1.msra.mxu0 %v2384_v60  ;;  %v1689_v56 = vpop.permute.xlu0 %1688  ;;  %v2245_v60 = vld [vmem:[#allocation7 + $0x260] sm:$0xff] }
 0x2a1   :  { %1981 = vmatmul.mubr.f32.gmra.mxu1 %v5154_v20  ;;  %2217 = vmatmul.mubr.f32.gmra.mxu0 %v5154_v20  ;;  %v1711_v36 = vsel %vm1702_vm2, %v1687_v46, %v1689_v56  ;;  %v1784_v52 = vsel %vm1775_vm3, %v1689_v56, %v1756_v32 }
 0x2a2   :  { %2049 = vmatpush2.msra.mxu1 %v1832_v30  ;;  %2437 = vmatprep.subr.mxu0 %v5560_v54  ;;  %v5166_v1 = vmax.f32 %v4974_v35, %v1784_v52  ;;  %v1657_v28 = vpop.permute.xlu1 %1656  ;;  %v5170_v47 = vmax.f32 %v4968_v6, %v1711_v36  ;;  %v1829_v35 = vld [vmem:[#allocation7 + $0x88] sm:$0xff]  ;;  %v2405_v6 = vld [vmem:[#allocation7 + $0x3b8] sm:$0xff] }
 0x2a3   :  { %2050 = vmatprep.subr.mxu1 %v5560_v54  ;;  %2438 = vmatpush1.msra.mxu0 %v2383_v59  ;;  %v2244_v30 = vld [vmem:[#allocation7 + $0x258] sm:$0xff]  ;;  %v2243_v59 = vld [vmem:[#allocation7 + $0x250] sm:$0xff]  ;;  %v2242_v52 = vld [vmem:[#allocation7 + $0x248] sm:$0xff] }
 0x2a4   :  { %2051 = vmatpush2.msra.mxu1 %v1831_v21  ;;  %2439 = vmatprep.subr.mxu0 %v5560_v54  ;;  %v1740_v0 = vpop.permute.xlu0 %1739 }
 0x2a5   :  { %2052 = vmatprep.subr.mxu1 %v5560_v54  ;;  %2440 = vmatpush1.msra.mxu0 %v2382_v5  ;;  %v1776_v17 = vsel %vm1775_vm3, %v1657_v28, %v1740_v0 }
 0x2a6   :  { %3270 = vmatprep.mubr.msk.f32.mxu1 %vm1861_vm4, %v5166_v1  ;;  %2053 = vmatpush2.msra.mxu1 %v1830_v45  ;;  %v1655_v14 = vpop.permute.xlu1 %1654  ;;  %v1789_v25 = vmax.f32 %v4754_v4, %v1776_v17  ;;  %v2403_v4 = vld [vmem:[#allocation7 + $0x3a8] sm:$0xff] }
 0x2a7   :  { %3285 = vmatprep.mubr.msk.f32.mxu0 %vm1861_vm4, %v5166_v1  ;;  %2457 = vmatprep.subr.mxu0 %v5560_v54  ;;  %v1703_v37 = vsel %vm1702_vm2, %v1655_v14, %v1657_v28  ;;  %v2241_v28 = vld [vmem:[#allocation7 + $0x240] sm:$0xff] }
 0x2a8   :  { %1986 = vmatmul.mubr.f32.gmra.mxu1 %v5170_v47  ;;  %2054 = vmatprep.subr.mxu1 %v5560_v54  ;;  %v1693_v63 = vpop.permute.xlu0 %1692  ;;  %v1788_v16 = vmax.f32 %v4748_v53, %v1703_v37  ;;  %v2402_v53 = vld [vmem:[#allocation7 + $0x3a0] sm:$0xff]  ;;  %v2262_v37 = vld [vmem:[#allocation7 + $0x2e8] sm:$0xff] }
 0x2a9   :  { %2222 = vmatmul.mubr.f32.gmra.mxu0 %v5170_v47  ;;  %2055 = vmatpush2.msra.mxu1 %v1829_v35  ;;  %v2264_v35 = vld [vmem:[#allocation7 + $0x2f8] sm:$0xff] }
 0x2aa   :  { %2458 = vmatpush2.msra.mxu0 %v2405_v6  ;;  %2056 = vmatprep.subr.mxu1 %v5560_v54  ;;  %v1758_v22 = vpop.permute.xlu1 %1757 }
 0x2ab   :  { %2459 = vmatprep.subr.mxu0 %v5560_v54  ;;  %2057 = vmatpush2.msra.mxu1 %v1828_v55  ;;  %v1785_v2 = vsel %vm1775_vm3, %v1693_v63, %v1758_v22  ;;  %v2259_v55 = vld [vmem:[#allocation7 + $0x2d0] sm:$0xff] }
 0x2ac   :  { %2460 = vmatpush2.msra.mxu0 %v2404_v19  ;;  %3271 = vmatprep.mubr.msk.f32.mxu1 %vm1861_vm4, %v1789_v25  ;;  %v1691_v8 = vpop.permute.xlu0 %1690  ;;  %v5194_v61 = vmax.f32 %v4994_v38, %v1785_v2  ;;  %v2400_v38 = vld [vmem:[#allocation7 + $0x390] sm:$0xff] }
 0x2ad   :  { %2461 = vmatprep.subr.mxu0 %v5560_v54  ;;  %2268 = vmatprep.subr.mxu1 %v5560_v54  ;;  %v1712_v7 = vsel %vm1702_vm2, %v1691_v8, %v1693_v63  ;;  %v2258_v63 = vld [vmem:[#allocation7 + $0x2c8] sm:$0xff]  ;;  %v2600_v19 = vld [vmem:[#allocation8 + $0xf0] sm:$0xff] }
 0x2ae   :  { %2462 = vmatpush2.msra.mxu0 %v2403_v4  ;;  %2059 = vmatmul.mubr.f32.vlgmr.msra.gmra.mxu1 %v1788_v16  ;;  %v5203_v18 = vmax.f32 %v4988_v42, %v1712_v7  ;;  %v2252_v42 = vld [vmem:[#allocation7 + $0x298] sm:$0xff]  ;;  %v1695_v13 = vpop.permute.xlu1 %1694  ;;  %v2757_v2 = vld [vmem:[#allocation8 + $0x170] sm:$0xff]  ;;  %v2756_v8 = vld [vmem:[#allocation8 + $0x168] sm:$0xff] }
 0x2af   :  { %2463 = vmatprep.subr.mxu0 %v5560_v54  ;;  %2269 = vmatpush1.msra.mxu1 %v2256_v48  ;;  %v2758_v16 = vld [vmem:[#allocation8 + $0x178] sm:$0xff]  ;;  %v2599_v48 = vld [vmem:[#allocation8 + $0xe8] sm:$0xff]  ;;  %v2755_v7 = vld [vmem:[#allocation8 + $0x160] sm:$0xff] }
 0x2b0   :  { %3272 = vmatprep.mubr.msk.f32.mxu1 %vm1861_vm4, %v5038_v39  ;;  %2270 = vmatprep.subr.mxu1 %v5560_v54  ;;  %v2253_v39 = vld [vmem:[#allocation7 + $0x2a0] sm:$0xff]  ;;  %v1760_v46 = vpop.permute.xlu0 %1759 }
 0x2b1   :  { %2464 = vmatpush2.msra.mxu0 %v2402_v53  ;;  %2271 = vmatpush1.msra.mxu1 %v2255_v50 }
 0x2b2   :  { %2465 = vmatprep.subr.mxu0 %v5560_v54  ;;  %2272 = vmatprep.subr.mxu1 %v5560_v54  ;;  %v1697_v32 = vpop.permute.xlu1 %1696 }
 0x2b3   :  { %2466 = vmatpush2.msra.mxu0 %v2401_v51  ;;  %2064 = vmatmul.mubr.f32.gmra.mxu1 %v5041_v11  ;;  %v2398_v11 = vld [vmem:[#allocation7 + $0x380] sm:$0xff]  ;;  %v1786_v36 = vsel %vm1775_vm3, %v1697_v32, %v1760_v46  ;;  %v1713_v5 = vsel %vm1702_vm2, %v1695_v13, %v1697_v32  ;;  %v2592_v13 = vld [vmem:[#allocation8 + $0xb0] sm:$0xff]  ;;  %v2591_v46 = vld [vmem:[#allocation8 + $0xa8] sm:$0xff] }
 0x2b4   :  { %2467 = vmatprep.subr.mxu0 %v5560_v54  ;;  %3286 = vmatprep.mubr.msk.f32.mxu0 %vm1861_vm4, %v5194_v61  ;;  %v1809_v45 = vmax.f32 %v5014_v41, %v1786_v36  ;;  %v1808_v14 = vmax.f32 %v5008_v57, %v1713_v5  ;;  %v2263_v41 = vld [vmem:[#allocation7 + $0x2f0] sm:$0xff]  ;;  %v2261_v57 = vld [vmem:[#allocation7 + $0x2e0] sm:$0xff] }
 0x2b5   :  { %2273 = vmatpush1.msra.mxu1 %v2254_v27  ;;  %3273 = vmatprep.mubr.msk.f32.mxu1 %vm1861_vm4, %v5048_v23  ;;  %v2251_v23 = vld [vmem:[#allocation7 + $0x290] sm:$0xff] }
 0x2b6   :  { %2274 = vmatprep.subr.mxu1 %v5560_v54  ;;  %2468 = vmatpush2.msra.mxu0 %v2400_v38  ;;  %v1701_v56 = vpop.permute.xlu0 %1700  ;;  %v1762_v21 = vpop.permute.xlu1 %1761  ;;  %v2754_v38 = vld [vmem:[#allocation8 + $0x158] sm:$0xff] }
 0x2b7   :  { %2227 = vmatmul.mubr.f32.gmra.mxu0 %v5203_v18  ;;  %2275 = vmatpush1.msra.mxu1 %v2253_v39  ;;  %v1787_v0 = vsel %vm1775_vm3, %v1701_v56, %v1762_v21 }
 0x2b8   :  { %2469 = vmatprep.subr.mxu0 %v5560_v54  ;;  %2276 = vmatprep.subr.mxu1 %v5560_v54  ;;  %v1811_v6 = vmax.f32 %v5027_v26, %v1787_v0  ;;  %v2260_v26 = vld [vmem:[#allocation7 + $0x2d8] sm:$0xff] }
 0x2b9   :  { %2470 = vmatpush2.msra.mxu0 %v2399_v10  ;;  %3295 = vmatprep.mubr.msk.f32.mxu0 %vm1861_vm4, %v5081_v49 }
 0x2ba   :  { %2471 = vmatprep.subr.mxu0 %v5560_v54  ;;  %2069 = vmatmul.mubr.f32.gmra.mxu1 %v5060_v31  ;;  %v2249_v31 = vld [vmem:[#allocation7 + $0x280] sm:$0xff]  ;;  %v1699_v17 = vpop.permute.xlu0 %1698 }
 0x2bb   :  { %2277 = vmatpush1.msra.mxu1 %v2252_v42  ;;  %3274 = vmatprep.mubr.msk.f32.mxu1 %vm1861_vm4, %v5066_v15  ;;  %v2596_v42 = vld [vmem:[#allocation8 + $0xd0] sm:$0xff] }
 0x2bc   :  { %2278 = vmatprep.subr.mxu1 %v5560_v54  ;;  %2472 = vmatpush2.msra.mxu0 %v2398_v11  ;;  %v2753_v11 = vld [vmem:[#allocation8 + $0x150] sm:$0xff] }
 0x2bd   :  { %2279 = vmatpush1.msra.mxu1 %v2251_v23  ;;  %2474 = vmatmul.mubr.f32.vlgmr.msra.gmra.mxu0 %v5099_v24  ;;  %v2595_v23 = vld [vmem:[#allocation8 + $0xc8] sm:$0xff] }
 0x2be   :  { %2280 = vmatprep.subr.mxu1 %v5560_v54  ;;  %3296 = vmatprep.mubr.msk.f32.mxu0 %vm1861_vm4, %v5106_v12 }
 0x2bf   :  { %2074 = vmatmul.mubr.f32.gmra.mxu1 %v5072_v9  ;;  %3479 = vmatprep.subr.mxu0 %v5560_v54 }
 0x2c0   :  { %2281 = vmatpush1.msra.mxu1 %v2250_v58  ;;  %3275 = vmatprep.mubr.msk.f32.mxu1 %vm1861_vm4, %v5081_v49  ;;  %v2752_v58 = vld [vmem:[#allocation8 + $0x148] sm:$0xff] }
 0x2c1   :  { %2282 = vmatprep.subr.mxu1 %v5560_v54  ;;  %2479 = vmatmul.mubr.f32.gmra.mxu0 %v5112_v43 }
 0x2c2   :  { %2283 = vmatpush1.msra.mxu1 %v2249_v31  ;;  %3297 = vmatprep.mubr.msk.f32.mxu0 %vm1861_vm4, %v5121_v29  ;;  %v2594_v31 = vld [vmem:[#allocation8 + $0xc0] sm:$0xff] }
 0x2c3   :  { %2284 = vmatprep.subr.mxu1 %v5560_v54  ;;  %2079 = vmatmul.mubr.f32.gmra.mxu1 %v5099_v24 }
 0x2c4   :  { %2285 = vmatpush1.msra.mxu1 %v2248_v40  ;;  %3276 = vmatprep.mubr.msk.f32.mxu1 %vm1861_vm4, %v5106_v12  ;;  %v2593_v40 = vld [vmem:[#allocation8 + $0xb8] sm:$0xff] }
 0x2c5   :  { %2286 = vmatprep.subr.mxu1 %v5560_v54  ;;  %2484 = vmatmul.mubr.f32.gmra.mxu0 %v5139_v62 }
 0x2c6   :  { %2287 = vmatpush1.msra.mxu1 %v2247_v34  ;;  %3298 = vmatprep.mubr.msk.f32.mxu0 %vm1861_vm4, %v5146_v33 }
 0x2c7   :  { %2288 = vmatprep.subr.mxu1 %v5560_v54  ;;  %2084 = vmatmul.mubr.f32.gmra.mxu1 %v5112_v43 }
 0x2c8   :  { %2289 = vmatpush1.msra.mxu1 %v2246_v44  ;;  %3277 = vmatprep.mubr.msk.f32.mxu1 %vm1861_vm4, %v5121_v29 }
 0x2c9   :  { %2290 = vmatprep.subr.mxu1 %v5560_v54  ;;  %2489 = vmatmul.mubr.f32.gmra.mxu0 %v5154_v20 }
 0x2ca   :  { %2291 = vmatpush1.msra.mxu1 %v2245_v60  ;;  %3299 = vmatprep.mubr.msk.f32.mxu0 %vm1861_vm4, %v5166_v1 }
 0x2cb   :  { %2292 = vmatprep.subr.mxu1 %v5560_v54  ;;  %2089 = vmatmul.mubr.f32.gmra.mxu1 %v5139_v62 }
 0x2cc   :  { %2293 = vmatpush1.msra.mxu1 %v2244_v30  ;;  %3278 = vmatprep.mubr.msk.f32.mxu1 %vm1861_vm4, %v5146_v33 }
 0x2cd   :  { %2294 = vmatprep.subr.mxu1 %v5560_v54  ;;  %2494 = vmatmul.mubr.f32.gmra.mxu0 %v5170_v47 }
 0x2ce   :  { %2295 = vmatpush1.msra.mxu1 %v2243_v59  ;;  %3300 = vmatprep.mubr.msk.f32.mxu0 %vm1861_vm4, %v5194_v61 }
 0x2cf   :  { %2296 = vmatprep.subr.mxu1 %v5560_v54  ;;  %2094 = vmatmul.mubr.f32.gmra.mxu1 %v5154_v20 }
 0x2d0   :  { %2297 = vmatpush1.msra.mxu1 %v2242_v52  ;;  %3287 = vmatprep.mubr.msk.f32.mxu1 %vm1861_vm4, %v5066_v15  ;;  %v1714_v15 = vsel %vm1702_vm2, %v1699_v17, %v1701_v56 }
 0x2d1   :  { %2298 = vmatprep.subr.mxu1 %v5560_v54  ;;  %2499 = vmatmul.mubr.f32.gmra.mxu0 %v5203_v18  ;;  %v1810_v25 = vmax.f32 %v5025_v3, %v1714_v15  ;;  %v2257_v3 = vld [vmem:[#allocation7 + $0x2c0] sm:$0xff] }
 0x2d2   :  { %2299 = vmatpush1.msra.mxu1 %v2241_v28  ;;  %3301 = vmatprep.mubr.msk.f32.mxu0 %vm1861_vm4, %v1809_v45 }
 0x2d3   :  { %2316 = vmatprep.subr.mxu1 %v5560_v54  ;;  %3480 = vmatpush3.msra.mxu0 %v2758_v16 }
 0x2d4   :  { %2317 = vmatpush2.msra.mxu1 %v2264_v35  ;;  %3481 = vmatprep.subr.mxu0 %v5560_v54 }
 0x2d5   :  { %2318 = vmatprep.subr.mxu1 %v5560_v54  ;;  %2504 = vmatmul.mubr.f32.gmra.mxu0 %v1808_v14 }
 0x2d6   :  { %2319 = vmatpush2.msra.mxu1 %v2263_v41  ;;  %3302 = vmatprep.mubr.msk.f32.mxu0 %vm1861_vm4, %v1811_v6 }
 0x2d7   :  { %2320 = vmatprep.subr.mxu1 %v5560_v54  ;;  %3482 = vmatpush3.msra.mxu0 %v2757_v2 }
 0x2d8   :  { %2321 = vmatpush2.msra.mxu1 %v2262_v37  ;;  %3483 = vmatprep.subr.mxu0 %v5560_v54 }
 0x2d9   :  { %2322 = vmatprep.subr.mxu1 %v5560_v54  ;;  %2509 = vmatmul.mubr.f32.gmra.mxu0 %v1810_v25 }
 0x2da   :  { %2323 = vmatpush2.msra.mxu1 %v2261_v57  ;;  %3484 = vmatpush3.msra.mxu0 %v2756_v8 }
 0x2db   :  { %2324 = vmatprep.subr.mxu1 %v5560_v54  ;;  %3485 = vmatprep.subr.mxu0 %v5560_v54 }
 0x2dc   :  { %2325 = vmatpush2.msra.mxu1 %v2260_v26  ;;  %3486 = vmatpush3.msra.mxu0 %v2755_v7 }
 0x2dd   :  { %2326 = vmatprep.subr.mxu1 %v5560_v54  ;;  %3487 = vmatprep.subr.mxu0 %v5560_v54 }
 0x2de   :  { %2327 = vmatpush2.msra.mxu1 %v2259_v55  ;;  %3488 = vmatpush3.msra.mxu0 %v2754_v38 }
 0x2df   :  { %2328 = vmatprep.subr.mxu1 %v5560_v54  ;;  %3489 = vmatprep.subr.mxu0 %v5560_v54 }
 0x2e0   :  { %2329 = vmatpush2.msra.mxu1 %v2258_v63  ;;  %3490 = vmatpush3.msra.mxu0 %v2753_v11 }
 0x2e1   :  { %2330 = vmatprep.subr.mxu1 %v5560_v54  ;;  %3491 = vmatprep.subr.mxu0 %v5560_v54 }
 0x2e2   :  { %2331 = vmatpush2.msra.mxu1 %v2257_v3  ;;  %3492 = vmatpush3.msra.mxu0 %v2752_v58 }
 0x2e3   :  { %2333 = vmatmul.mubr.f32.vlgmr.msra.gmra.mxu1 %v5072_v9  ;;  %3409 = vmatprep.subr.mxu1 %v5560_v54 }
 0x2e4   :  { %3288 = vmatprep.mubr.msk.f32.mxu1 %vm1861_vm4, %v5081_v49  ;;  %3493 = vmatprep.subr.mxu0 %v5560_v54 }
 0x2e5   :  { %3511 = vmatprep.mubr.msk.f32.mxu0 %vm3821_vm5, %v5560_v54 }
 0x2e7   :  { %2338 = vmatmul.mubr.f32.gmra.mxu1 %v5099_v24 }
 0x2e8   :  { %3289 = vmatprep.mubr.msk.f32.mxu1 %vm1861_vm4, %v5106_v12 }
 0x2eb   :  { %2343 = vmatmul.mubr.f32.gmra.mxu1 %v5112_v43 }
 0x2ec   :  { %3290 = vmatprep.mubr.msk.f32.mxu1 %vm1861_vm4, %v5121_v29 }
 0x2ef   :  { %2348 = vmatmul.mubr.f32.gmra.mxu1 %v5139_v62 }
 0x2f0   :  { %3291 = vmatprep.mubr.msk.f32.mxu1 %vm1861_vm4, %v5146_v33 }
 0x2f3   :  { %2353 = vmatmul.mubr.f32.gmra.mxu1 %v5154_v20 }
 0x2f4   :  { %3292 = vmatprep.mubr.msk.f32.mxu1 %vm1861_vm4, %v5166_v1 }
 0x2f7   :  { %2358 = vmatmul.mubr.f32.gmra.mxu1 %v5170_v47  ;;  %v2601_v47 = vld [vmem:[#allocation8 + $0xf8] sm:$0xff] }
 0x2f8   :  { %3293 = vmatprep.mubr.msk.f32.mxu1 %vm1861_vm4, %v5194_v61  ;;  %3410 = vmatpush3.msra.mxu1 %v2601_v47  ;;  %v2598_v61 = vld [vmem:[#allocation8 + $0xe0] sm:$0xff] }
 0x2f9   :  { %3411 = vmatprep.subr.mxu1 %v5560_v54 }
 0x2fa   :  { %3412 = vmatpush3.msra.mxu1 %v2600_v19 }
 0x2fb   :  { %2363 = vmatmul.mubr.f32.gmra.mxu1 %v5203_v18  ;;  %3413 = vmatprep.subr.mxu1 %v5560_v54  ;;  %v2597_v18 = vld [vmem:[#allocation8 + $0xd8] sm:$0xff] }
 0x2fc   :  { %3294 = vmatprep.mubr.msk.f32.mxu1 %vm1861_vm4, %v1809_v45  ;;  %3414 = vmatpush3.msra.mxu1 %v2599_v48 }
 0x2fd   :  { %3415 = vmatprep.subr.mxu1 %v5560_v54 }
 0x2fe   :  { %3416 = vmatpush3.msra.mxu1 %v2598_v61 }
 0x2ff   :  { %2368 = vmatmul.mubr.f32.gmra.mxu1 %v1808_v14  ;;  %3417 = vmatprep.subr.mxu1 %v5560_v54 }
 0x300   :  { %3418 = vmatpush3.msra.mxu1 %v2597_v18  ;;  %3441 = vmatprep.mubr.msk.f32.mxu1 %vm3821_vm5, %v5560_v54 }
 0x301   :  { %3419 = vmatprep.subr.mxu1 %v5560_v54 }
 0x302   :  { %3420 = vmatpush3.msra.mxu1 %v2596_v42 }
 0x303   :  { %3421 = vmatprep.subr.mxu1 %v5560_v54 }
 0x304   :  { %3422 = vmatpush3.msra.mxu1 %v2595_v23 }
 0x305   :  { %3423 = vmatprep.subr.mxu1 %v5560_v54 }
 0x306   :  { %3424 = vmatpush3.msra.mxu1 %v2594_v31 }
 0x307   :  { %3425 = vmatprep.subr.mxu1 %v5560_v54 }
 0x308   :  { %3426 = vmatpush3.msra.mxu1 %v2593_v40 }
 0x309   :  { %3427 = vmatprep.subr.mxu1 %v5560_v54 }
 0x30a   :  { %3428 = vmatpush3.msra.mxu1 %v2592_v13 }
 0x30b   :  { %3429 = vmatprep.subr.mxu1 %v5560_v54 }
 0x30c   :  { %3430 = vmatpush3.msra.mxu1 %v2591_v46  ;;  %v2590_v46 = vld [vmem:[#allocation8 + $0xa0] sm:$0xff] }
 0x30d   :  { %3431 = vmatprep.subr.mxu1 %v5560_v54 }
 0x30e   :  { %3432 = vmatpush3.msra.mxu1 %v2590_v46 }
 0x30f   :  { %3433 = vmatprep.subr.mxu1 %v5560_v54 }
 0x32f   :  { %v5303_v9 = vpop.f32.mrf.mxu1 }
 0x331   :  { %v1954_v49 = vpop.f32.mrf.mxu1 }
 0x33c   :  { %v5305_v24 = vpop.f32.mrf.mxu1  ;;  %v5307_v12 = vpop.f32.mrf.mxu0 }
 0x33e   :  { %v1959_v43 = vpop.f32.mrf.mxu1  ;;  %v2195_v29 = vpop.f32.mrf.mxu0 }
 0x340   :  { %v5309_v62 = vpop.f32.mrf.mxu1  ;;  %v5311_v33 = vpop.f32.mrf.mxu0 }
 0x342   :  { %v1964_v20 = vpop.f32.mrf.mxu1  ;;  %v2200_v1 = vpop.f32.mrf.mxu0 }
 0x34c   :  { %v5313_v22 = vpop.f32.mrf.mxu1  ;;  %v5315_v4 = vpop.f32.mrf.mxu0 }
 0x34e   :  { %v1969_v53 = vpop.f32.mrf.mxu1  ;;  %v2205_v50 = vpop.f32.mrf.mxu0 }
 0x350   :  { %v5321_v51 = vpop.f32.mrf.mxu1  ;;  %v5323_v27 = vpop.f32.mrf.mxu0 }
 0x352   :  { %v1974_v39 = vpop.f32.mrf.mxu1  ;;  %v2210_v10 = vpop.f32.mrf.mxu0 }
 0x35c   :  { %v1977_v34 = vpop.f32.mrf.mxu1  ;;  %v2213_v44 = vpop.f32.mrf.mxu0 }
 0x35e   :  { %v1979_v60 = vpop.f32.mrf.mxu1  ;;  %v2215_v32 = vpop.f32.mrf.mxu0 }
 0x35f   :  { %v2751_v32 = vld [vmem:[#allocation8 + $0x140] sm:$0xff] }
 0x360   :  { %3494 = vmatpush3.msra.mxu0 %v2751_v32 }
 0x361   :  { %v1982_v30 = vpop.f32.mrf.mxu1  ;;  %v2218_v56 = vpop.f32.mrf.mxu0  ;;  %3495 = vmatprep.subr.mxu0 %v5560_v54 }
 0x363   :  { %v1984_v59 = vpop.f32.mrf.mxu1  ;;  %v2220_v36 = vpop.f32.mrf.mxu0 }
 0x364   :  { %v2588_v36 = vld [vmem:[#allocation8 + $0x90] sm:$0xff] }
 0x368   :  { %v1987_v52 = vpop.f32.mrf.mxu1 }
 0x369   :  { %v2223_v21 = vpop.f32.mrf.mxu0 }
 0x36a   :  { %v1989_v28 = vpop.f32.mrf.mxu1 }
 0x36b   :  { %v2225_v5 = vpop.f32.mrf.mxu0  ;;  %v2749_v28 = vld [vmem:[#allocation8 + $0x130] sm:$0xff] }
 0x36e   :  { %v2060_v45 = vpop.f32.mrf.mxu1 }
 0x36f   :  { %v2061_v0 = vadd.f32 %v2060_v45, %v5303_v9  ;;  %v2587_v45 = vld [vmem:[#allocation8 + $0x88] sm:$0xff] }
 0x370   :  { %v2062_v17 = vpop.f32.mrf.mxu1 }
 0x371   :  { %v2232_v35 = vadd.f32 %v5307_v12, %v2061_v0  ;;  %v2748_v17 = vld [vmem:[#allocation8 + $0x128] sm:$0xff] }
 0x373   :  { %v2065_v14 = vpop.f32.mrf.mxu1 }
 0x374   :  { %v2066_v41 = vadd.f32 %v2065_v14, %v5305_v24 }
 0x375   :  { %v2067_v6 = vpop.f32.mrf.mxu1 }
 0x376   :  { %v2233_v15 = vadd.f32 %v5311_v33, %v2066_v41 }
 0x377   :  { %v2228_v37 = vpop.f32.mrf.mxu0 }
 0x379   :  { %v2230_v25 = vpop.f32.mrf.mxu0 }
 0x37a   :  { %v2070_v57 = vpop.f32.mrf.mxu1 }
 0x37b   :  { %v2071_v26 = vadd.f32 %v2070_v57, %v5309_v62  ;;  %v2747_v57 = vld [vmem:[#allocation8 + $0x120] sm:$0xff] }
 0x37c   :  { %v2072_v55 = vpop.f32.mrf.mxu1 }
 0x37d   :  { %v2475_v63 = vpop.f32.mrf.mxu0  ;;  %v5345_v3 = vadd.f32 %v5315_v4, %v2071_v26 }
 0x37f   :  { %v2075_v9 = vpop.f32.mrf.mxu1  ;;  %v2477_v49 = vpop.f32.mrf.mxu0 }
 0x380   :  { %v2076_v12 = vadd.f32 %v2075_v9, %v5313_v22 }
 0x381   :  { %v2077_v43 = vpop.f32.mrf.mxu1  ;;  %v2480_v29 = vpop.f32.mrf.mxu0 }
 0x382   :  { %v5349_v24 = vadd.f32 %v5323_v27, %v2076_v12  ;;  %v2746_v12 = vld [vmem:[#allocation8 + $0x118] sm:$0xff] }
 0x383   :  { %v2080_v33 = vpop.f32.mrf.mxu1  ;;  %v2482_v20 = vpop.f32.mrf.mxu0 }
 0x384   :  { %v2081_v1 = vadd.f32 %v2080_v33, %v5321_v51  ;;  %v2745_v20 = vld [vmem:[#allocation8 + $0x110] sm:$0xff] }
 0x385   :  { %v2082_v47 = vpop.f32.mrf.mxu1  ;;  %v5352_v62 = vpop.f32.mrf.mxu0 }
 0x386   :  { %v5354_v19 = vadd.f32 %v2213_v44, %v2081_v1 }
 0x387   :  { %v2085_v16 = vpop.f32.mrf.mxu1  ;;  %v2487_v4 = vpop.f32.mrf.mxu0 }
 0x388   :  { %v2086_v48 = vadd.f32 %v2085_v16, %v1977_v34 }
 0x389   :  { %v2087_v2 = vpop.f32.mrf.mxu1  ;;  %v5356_v8 = vpop.f32.mrf.mxu0 }
 0x38a   :  { %v5358_v22 = vadd.f32 %v2218_v56, %v2086_v48  ;;  %v2750_v56 = vld [vmem:[#allocation8 + $0x138] sm:$0xff] }
 0x38b   :  { %v2090_v53 = vpop.f32.mrf.mxu1  ;;  %v2492_v50 = vpop.f32.mrf.mxu0  ;;  %3496 = vmatpush3.msra.mxu0 %v2750_v56 }
 0x38c   :  { %v2091_v61 = vadd.f32 %v2090_v53, %v1982_v30  ;;  %v2589_v30 = vld [vmem:[#allocation8 + $0x98] sm:$0xff]  ;;  %3497 = vmatprep.subr.mxu0 %v5560_v54 }
 0x38d   :  { %v2092_v7 = vpop.f32.mrf.mxu1  ;;  %v5360_v27 = vpop.f32.mrf.mxu0  ;;  %3434 = vmatpush3.msra.mxu1 %v2589_v30  ;;  %3498 = vmatpush3.msra.mxu0 %v2749_v28 }
 0x38e   :  { %v5362_v51 = vadd.f32 %v2223_v21, %v2091_v61  ;;  %3435 = vmatprep.subr.mxu1 %v5560_v54  ;;  %3499 = vmatprep.subr.mxu0 %v5560_v54 }
 0x38f   :  { %v2095_v18 = vpop.f32.mrf.mxu1  ;;  %v2497_v38 = vpop.f32.mrf.mxu0  ;;  %3436 = vmatpush3.msra.mxu1 %v2588_v36  ;;  %3500 = vmatpush3.msra.mxu0 %v2748_v17  ;;  %v2583_v36 = vld [vmem:[#allocation8 + $0x70] sm:$0xff]  ;;  %v2577_v17 = vld [vmem:[#allocation8 + $0x40] sm:$0xff] }
 0x390   :  { %v2096_v39 = vadd.f32 %v2095_v18, %v1987_v52  ;;  %v5376_v52 = vld [vmem:[%s5513_s4] ss:$0 sm:$0xff]  ;;  %3437 = vmatprep.subr.mxu1 %v5560_v54  ;;  %3501 = vmatprep.subr.mxu0 %v5560_v54  ;;  %s3822_s4 = smov 112  }
 0x391   :  { %v2097_v10 = vpop.f32.mrf.mxu1  ;;  %v5364_v42 = vpop.f32.mrf.mxu0  ;;  %3438 = vmatpush3.msra.mxu1 %v2587_v45  ;;  %3502 = vmatpush3.msra.mxu0 %v2747_v57  ;;  %v2579_v45 = vld [vmem:[#allocation8 + $0x50] sm:$0xff] }
 0x392   :  { %v5366_v11 = vadd.f32 %v2228_v37, %v2096_v39  ;;  %3439 = vmatprep.subr.mxu1 %v5560_v54  ;;  %v2586_v37 = vld [vmem:[#allocation8 + $0x80] sm:$0xff]  ;;  %3503 = vmatprep.subr.mxu0 %v5560_v54 }
 0x393   :  { %v2502_v23 = vpop.f32.mrf.mxu0  ;;  %3440 = vmatpush3.msra.mxu1 %v2586_v37  ;;  %3504 = vmatpush3.msra.mxu0 %v2746_v12  ;;  %v2571_v37 = vld [vmem:[#allocation8 + $0x10] sm:$0xff]  ;;  %v2843_v12 = vld [vmem:[#allocation8 + $0x1e0] sm:$0xff] }
 0x394   :  { %3444 = vmatprep.subr.mxu1 %v5560_v54  ;;  %3505 = vmatprep.subr.mxu0 %v5560_v54 }
 0x395   :  { %v5368_v58 = vpop.f32.mrf.mxu0  ;;  %3506 = vmatpush3.msra.mxu0 %v2745_v20  ;;  %v2838_v20 = vld [vmem:[#allocation8 + $0x1b8] sm:$0xff] }
 0x396   :  { %3507 = vmatprep.subr.mxu0 %v5560_v54 }
 0x397   :  { %v2507_v31 = vpop.f32.mrf.mxu0 }
 0x399   :  { %v5370_v40 = vpop.f32.mrf.mxu0 }
 0x39b   :  { %v2512_v13 = vpop.f32.mrf.mxu0 }
 0x3a3   :  { %v2334_v34 = vpop.f32.mrf.mxu1 }
 0x3a4   :  { %v2373_v44 = vadd.f32 %v2334_v34, %v2232_v35 }
 0x3a5   :  { %v2336_v60 = vpop.f32.mrf.mxu1 }
 0x3a6   :  { %v2514_v59 = vadd.f32 %v2475_v63, %v2373_v44 }
 0x3a7   :  { %v2339_v21 = vpop.f32.mrf.mxu1 }
 0x3a8   :  { %v2374_v5 = vadd.f32 %v2339_v21, %v2233_v15  ;;  %v2529_v35 = vadd.f32 %v5376_v52, %v2514_v59 }
 0x3a9   :  { %v2341_v0 = vpop.f32.mrf.mxu1 }
 0x3aa   :  { %v2515_v14 = vadd.f32 %v2480_v29, %v2374_v5  ;;  %v2537_v26 = vmax.f32 %v2529_v35, 0.0  ;;  %v2580_v5 = vld [vmem:[#allocation8 + $0x58] sm:$0xff]  ;;  %v2578_v0 = vld [vmem:[#allocation8 + $0x48] sm:$0xff] }
 0x3ab   :  { %v2344_v41 = vpop.f32.mrf.mxu1  ;;  %v2576_v35 = vld [vmem:[#allocation8 + $0x38] sm:$0xff] }
 0x3ac   :  { %v2530_v6 = vadd.f32 %v5376_v52, %v2515_v14  ;;  %v2375_v15 = vadd.f32 %v2344_v41, %v5345_v3  ;;  %v2575_v14 = vld [vmem:[#allocation8 + $0x30] sm:$0xff]  ;;  %v2574_v41 = vld [vmem:[#allocation8 + $0x28] sm:$0xff] }
 0x3ad   :  { %v2346_v25 = vpop.f32.mrf.mxu1 }
 0x3ae   :  { %v2538_v55 = vmax.f32 %v2530_v6, 0.0  ;;  %v2516_v63 = vadd.f32 %v5352_v62, %v2375_v15  ;;  %v2744_v62 = vld [vmem:[#allocation8 + $0x108] sm:$0xff]  ;;  %v2573_v6 = vld [vmem:[#allocation8 + $0x20] sm:$0xff]  ;;  %v2572_v15 = vld [vmem:[#allocation8 + $0x18] sm:$0xff] }
 0x3af   :  { %v2349_v3 = vpop.f32.mrf.mxu1  ;;  %3508 = vmatpush3.msra.mxu0 %v2744_v62  ;;  %v2570_v25 = vld [vmem:[#allocation8 + $0x8] sm:$0xff]  ;;  %v2834_v62 = vld [vmem:[#allocation8 + $0x198] sm:$0xff] }
 0x3b0   :  { %v2376_v9 = vadd.f32 %v2349_v3, %v5349_v24  ;;  %v5395_v49 = vmax.f32 %v2537_v26, %v2538_v55  ;;  %v2531_v29 = vadd.f32 %v5376_v52, %v2516_v63  ;;  %3509 = vmatprep.subr.mxu0 %v5560_v54  ;;  %v2569_v26 = vld [vmem:[#allocation8] sm:$0xff]  ;;  %v2846_v63 = vld [vmem:[#allocation8 + $0x1f8] sm:$0xff]  ;;  %v2845_v3 = vld [vmem:[#allocation8 + $0x1f0] sm:$0xff] }
 0x3b1   :  { %v2351_v43 = vpop.f32.mrf.mxu1 }
 0x3b2   :  { %v2517_v33 = vadd.f32 %v5356_v8, %v2376_v9  ;;  %2553 = vrot.lane.b32.xlu0 %v5395_v49, %s3822_s4  ;;  %v2539_v4 = vmax.f32 %v2531_v29, 0.0  ;;  %v2743_v8 = vld [vmem:[#allocation8 + $0x100] sm:$0xff]  ;;  %v2844_v9 = vld [vmem:[#allocation8 + $0x1e8] sm:$0xff]  ;;  %v2841_v43 = vld [vmem:[#allocation8 + $0x1d0] sm:$0xff] }
 0x3b3   :  { %v2354_v1 = vpop.f32.mrf.mxu1  ;;  %3510 = vmatpush3.msra.mxu0 %v2743_v8  ;;  %v2840_v29 = vld [vmem:[#allocation8 + $0x1c8] sm:$0xff] }
 0x3b4   :  { %v2532_v24 = vadd.f32 %v5376_v52, %v2517_v33  ;;  %v2377_v47 = vadd.f32 %v2354_v1, %v5354_v19  ;;  %3549 = vmatprep.subr.mxu0 %v5560_v54  ;;  %v2839_v33 = vld [vmem:[#allocation8 + $0x1c0] sm:$0xff]  ;;  %v2837_v1 = vld [vmem:[#allocation8 + $0x1b0] sm:$0xff] }
 0x3b5   :  { %v2356_v16 = vpop.f32.mrf.mxu1 }
 0x3b6   :  { %v2540_v48 = vmax.f32 %v2532_v24, 0.0  ;;  %v2518_v2 = vadd.f32 %v5360_v27, %v2377_v47  ;;  %v2836_v24 = vld [vmem:[#allocation8 + $0x1a8] sm:$0xff]  ;;  %v2835_v47 = vld [vmem:[#allocation8 + $0x1a0] sm:$0xff]  ;;  %v2833_v16 = vld [vmem:[#allocation8 + $0x190] sm:$0xff] }
 0x3b7   :  { %v2359_v53 = vpop.f32.mrf.mxu1 }
 0x3b8   :  { %v2378_v50 = vadd.f32 %v2359_v53, %v5358_v22  ;;  %v2546_v61 = vmax.f32 %v2539_v4, %v2540_v48  ;;  %v2533_v7 = vadd.f32 %v5376_v52, %v2518_v2  ;;  %v2832_v4 = vld [vmem:[#allocation8 + $0x188] sm:$0xff]  ;;  %v2831_v2 = vld [vmem:[#allocation8 + $0x180] sm:$0xff]  ;;  %v2942_v53 = vld [vmem:[#allocation10 + $0x78] sm:$0xff] }
 0x3b9   :  { %v2361_v19 = vpop.f32.mrf.mxu1 }
 0x3ba   :  { %v2519_v18 = vadd.f32 %v5364_v42, %v2378_v50  ;;  %2555 = vrot.lane.b32.xlu1 %v2546_v61, %s3822_s4  ;;  %v2541_v23 = vmax.f32 %v2533_v7, 0.0  ;;  %v2941_v50 = vld [vmem:[#allocation10 + $0x70] sm:$0xff]  ;;  %v2939_v19 = vld [vmem:[#allocation10 + $0x60] sm:$0xff]  ;;  %v2938_v7 = vld [vmem:[#allocation10 + $0x58] sm:$0xff] }
 0x3bb   :  { %v2364_v38 = vpop.f32.mrf.mxu1 }
 0x3bc   :  { %v2534_v27 = vadd.f32 %v5376_v52, %v2519_v18  ;;  %v2379_v39 = vadd.f32 %v2364_v38, %v5362_v51  ;;  %v2937_v18 = vld [vmem:[#allocation10 + $0x50] sm:$0xff]  ;;  %v2936_v38 = vld [vmem:[#allocation10 + $0x48] sm:$0xff] }
 0x3bd   :  { %v2366_v10 = vpop.f32.mrf.mxu1 }
 0x3be   :  { %v2542_v31 = vmax.f32 %v2534_v27, 0.0  ;;  %v2520_v22 = vadd.f32 %v5368_v58, %v2379_v39  ;;  %v2935_v27 = vld [vmem:[#allocation10 + $0x40] sm:$0xff]  ;;  %v2934_v39 = vld [vmem:[#allocation10 + $0x38] sm:$0xff]  ;;  %v2933_v10 = vld [vmem:[#allocation10 + $0x30] sm:$0xff] }
 0x3bf   :  { %v2369_v13 = vpop.f32.mrf.mxu1 }
 0x3c0   :  { %v2380_v34 = vadd.f32 %v2369_v13, %v5366_v11  ;;  %v2547_v44 = vmax.f32 %v2541_v23, %v2542_v31  ;;  %v2535_v60 = vadd.f32 %v5376_v52, %v2520_v22  ;;  %v2584_v11 = vld [vmem:[#allocation8 + $0x78] sm:$0xff]  ;;  %v2932_v23 = vld [vmem:[#allocation10 + $0x28] sm:$0xff]  ;;  %v2931_v31 = vld [vmem:[#allocation10 + $0x20] sm:$0xff] }
 0x3c1   :  { %v2371_v46 = vpop.f32.mrf.mxu1  ;;  %v2930_v22 = vld [vmem:[#allocation10 + $0x18] sm:$0xff]  ;;  %v2929_v13 = vld [vmem:[#allocation10 + $0x10] sm:$0xff] }
 0x3c2   :  { %v2521_v42 = vadd.f32 %v5370_v40, %v2380_v34  ;;  %2557 = vrot.lane.b32.xlu1 %v2547_v44, %s3822_s4  ;;  %v2543_v30 = vmax.f32 %v2535_v60, 0.0  ;;  %v2582_v40 = vld [vmem:[#allocation8 + $0x68] sm:$0xff]  ;;  %v3036_v46 = vld [vmem:[#allocation11 + $0x78] sm:$0xff]  ;;  %v3035_v60 = vld [vmem:[#allocation11 + $0x70] sm:$0xff] }
 0x3c3   :  { %v2928_v34 = vld [vmem:[#allocation10 + $0x8] sm:$0xff] }
 0x3c4   :  { %v2536_v32 = vadd.f32 %v5376_v52, %v2521_v42  ;;  %v2581_v52 = vld [vmem:[#allocation8 + $0x60] sm:$0xff]  ;;  %v3034_v42 = vld [vmem:[#allocation11 + $0x68] sm:$0xff] }
 0x3c6   :  { %v2544_v51 = vmax.f32 %v2536_v32, 0.0  ;;  %v3033_v32 = vld [vmem:[#allocation11 + $0x60] sm:$0xff] }
 0x3c8   :  { %v5421_v56 = vmax.f32 %v2543_v30, %v2544_v51  ;;  %v3032_v30 = vld [vmem:[#allocation11 + $0x58] sm:$0xff]  ;;  %v3031_v51 = vld [vmem:[#allocation11 + $0x50] sm:$0xff] }
 0x3ca   :  { %2559 = vrot.lane.b32.xlu0 %v5421_v56, %s3822_s4 }
 0x424   :  { %v2554_v57 = vpop.permute.xlu0 %2553 }
 0x425   :  { %v2565_v55 = vmax.f32 %v5395_v49, %v2554_v57  ;;  %v2842_v49 = vld [vmem:[#allocation8 + $0x1d8] sm:$0xff] }
 0x42c   :  { %v2556_v58 = vpop.permute.xlu1 %2555 }
 0x42d   :  { %v2566_v59 = vmax.f32 %v2546_v61, %v2556_v58  ;;  %v2940_v61 = vld [vmem:[#allocation10 + $0x68] sm:$0xff]  ;;  %v3029_v58 = vld [vmem:[#allocation11 + $0x40] sm:$0xff] }
 0x42f   :  { %3442 = vmatmul.mubr.f32.vlgmr.msra.gmra.mxu1 %v2566_v59  ;;  %v3028_v59 = vld [vmem:[#allocation11 + $0x38] sm:$0xff] }
 0x430   :  { %3445 = vmatpush3.msra.mxu1 %v2584_v11  ;;  %3476 = vmatprep.mubr.msk.f32.mxu1 %vm3821_vm5, %v5560_v54  ;;  %v3027_v11 = vld [vmem:[#allocation11 + $0x30] sm:$0xff] }
 0x431   :  { %3446 = vmatprep.subr.mxu1 %v5560_v54 }
 0x432   :  { %3447 = vmatpush3.msra.mxu1 %v2583_v36  ;;  %v3026_v36 = vld [vmem:[#allocation11 + $0x28] sm:$0xff] }
 0x433   :  { %3448 = vmatprep.subr.mxu1 %v5560_v54 }
 0x434   :  { %3449 = vmatpush3.msra.mxu1 %v2582_v40  ;;  %v2558_v21 = vpop.permute.xlu1 %2557  ;;  %v3025_v40 = vld [vmem:[#allocation11 + $0x20] sm:$0xff] }
 0x435   :  { %v2567_v28 = vmax.f32 %v2547_v44, %v2558_v21  ;;  %3450 = vmatprep.subr.mxu1 %v5560_v54  ;;  %v2927_v44 = vld [vmem:[#allocation10] sm:$0xff] }
 0x436   :  { %3451 = vmatpush3.msra.mxu1 %v2581_v52  ;;  %v3024_v52 = vld [vmem:[#allocation11 + $0x18] sm:$0xff] }
 0x437   :  { %3452 = vmatprep.subr.mxu1 %v5560_v54  ;;  %3512 = vmatmul.mubr.f32.vlgmr.msra.gmra.mxu0 %v2567_v28 }
 0x438   :  { %3453 = vmatpush3.msra.mxu1 %v2580_v5  ;;  %3581 = vmatprep.mubr.msk.f32.mxu0 %vm3821_vm5, %v5560_v54 }
 0x439   :  { %3454 = vmatprep.subr.mxu1 %v5560_v54  ;;  %3550 = vmatpush3.msra.mxu0 %v2942_v53 }
 0x43a   :  { %3455 = vmatpush3.msra.mxu1 %v2579_v45  ;;  %3551 = vmatprep.subr.mxu0 %v5560_v54 }
 0x43b   :  { %3456 = vmatprep.subr.mxu1 %v5560_v54  ;;  %3552 = vmatpush3.msra.mxu0 %v2941_v50 }
 0x43c   :  { %3457 = vmatpush3.msra.mxu1 %v2578_v0  ;;  %v2560_v48 = vpop.permute.xlu0 %2559  ;;  %3553 = vmatprep.subr.mxu0 %v5560_v54 }
 0x43d   :  { %3458 = vmatprep.subr.mxu1 %v5560_v54  ;;  %v2568_v8 = vmax.f32 %v5421_v56, %v2560_v48  ;;  %3554 = vmatpush3.msra.mxu0 %v2940_v61  ;;  %v3030_v56 = vld [vmem:[#allocation11 + $0x48] sm:$0xff] }
 0x43e   :  { %3459 = vmatpush3.msra.mxu1 %v2577_v17  ;;  %3555 = vmatprep.subr.mxu0 %v5560_v54 }
 0x43f   :  { %3460 = vmatprep.subr.mxu1 %v5560_v54  ;;  %3556 = vmatpush3.msra.mxu0 %v2939_v19 }
 0x440   :  { %3461 = vmatpush3.msra.mxu1 %v2576_v35  ;;  %3557 = vmatprep.subr.mxu0 %v5560_v54 }
 0x441   :  { %3462 = vmatprep.subr.mxu1 %v5560_v54  ;;  %3558 = vmatpush3.msra.mxu0 %v2938_v7 }
 0x442   :  { %3463 = vmatpush3.msra.mxu1 %v2575_v14  ;;  %3559 = vmatprep.subr.mxu0 %v5560_v54 }
 0x443   :  { %3464 = vmatprep.subr.mxu1 %v5560_v54  ;;  %3560 = vmatpush3.msra.mxu0 %v2937_v18 }
 0x444   :  { %3465 = vmatpush3.msra.mxu1 %v2574_v41  ;;  %3561 = vmatprep.subr.mxu0 %v5560_v54 }
 0x445   :  { %3466 = vmatprep.subr.mxu1 %v5560_v54  ;;  %3562 = vmatpush3.msra.mxu0 %v2936_v38 }
 0x446   :  { %3467 = vmatpush3.msra.mxu1 %v2573_v6  ;;  %3563 = vmatprep.subr.mxu0 %v5560_v54  ;;  %v3304_v6 = vld [vmem:[%s5515_s6] ss:$0 sm:$0xff] }
 0x447   :  { %3468 = vmatprep.subr.mxu1 %v5560_v54  ;;  %3564 = vmatpush3.msra.mxu0 %v2935_v27 }
 0x448   :  { %3469 = vmatpush3.msra.mxu1 %v2572_v15  ;;  %3565 = vmatprep.subr.mxu0 %v5560_v54 }
 0x449   :  { %3470 = vmatprep.subr.mxu1 %v5560_v54  ;;  %3566 = vmatpush3.msra.mxu0 %v2934_v39 }
 0x44a   :  { %3471 = vmatpush3.msra.mxu1 %v2571_v37  ;;  %3567 = vmatprep.subr.mxu0 %v5560_v54 }
 0x44b   :  { %3472 = vmatprep.subr.mxu1 %v5560_v54  ;;  %3568 = vmatpush3.msra.mxu0 %v2933_v10 }
 0x44c   :  { %3473 = vmatpush3.msra.mxu1 %v2570_v25  ;;  %3569 = vmatprep.subr.mxu0 %v5560_v54 }
 0x44d   :  { %3474 = vmatprep.subr.mxu1 %v5560_v54  ;;  %3570 = vmatpush3.msra.mxu0 %v2932_v23 }
 0x44e   :  { %3475 = vmatpush3.msra.mxu1 %v2569_v26  ;;  %3571 = vmatprep.subr.mxu0 %v5560_v54  ;;  %v3023_v26 = vld [vmem:[#allocation11 + $0x10] sm:$0xff] }
 0x44f   :  { %3477 = vmatmul.mubr.f32.vlgmr.msra.gmra.mxu1 %v2565_v55  ;;  %3514 = vmatprep.subr.mxu1 %v5560_v54  ;;  %v3022_v55 = vld [vmem:[#allocation11 + $0x8] sm:$0xff] }
 0x450   :  { %3515 = vmatpush3.msra.mxu1 %v2846_v63  ;;  %3546 = vmatprep.mubr.msk.f32.mxu1 %vm3821_vm5, %v5560_v54  ;;  %v3021_v63 = vld [vmem:[#allocation11] sm:$0xff] }
 0x451   :  { %3516 = vmatprep.subr.mxu1 %v5560_v54  ;;  %3572 = vmatpush3.msra.mxu0 %v2931_v31 }
 0x452   :  { %3517 = vmatpush3.msra.mxu1 %v2845_v3  ;;  %3573 = vmatprep.subr.mxu0 %v5560_v54  ;;  %v3305_v3 = vld [vmem:[%s5517_s8] ss:$0 sm:$0xff] }
 0x453   :  { %3518 = vmatprep.subr.mxu1 %v5560_v54  ;;  %3574 = vmatpush3.msra.mxu0 %v2930_v22 }
 0x454   :  { %3519 = vmatpush3.msra.mxu1 %v2844_v9  ;;  %3575 = vmatprep.subr.mxu0 %v5560_v54 }
 0x455   :  { %3520 = vmatprep.subr.mxu1 %v5560_v54  ;;  %3576 = vmatpush3.msra.mxu0 %v2929_v13 }
 0x456   :  { %3521 = vmatpush3.msra.mxu1 %v2843_v12  ;;  %3577 = vmatprep.subr.mxu0 %v5560_v54 }
 0x457   :  { %3522 = vmatprep.subr.mxu1 %v5560_v54  ;;  %3578 = vmatpush3.msra.mxu0 %v2928_v34 }
 0x458   :  { %3523 = vmatpush3.msra.mxu1 %v2842_v49  ;;  %3579 = vmatprep.subr.mxu0 %v5560_v54 }
 0x459   :  { %3524 = vmatprep.subr.mxu1 %v5560_v54  ;;  %3580 = vmatpush3.msra.mxu0 %v2927_v44 }
 0x45a   :  { %3525 = vmatpush3.msra.mxu1 %v2841_v43 }
 0x45b   :  { %3526 = vmatprep.subr.mxu1 %v5560_v54 }
 0x45c   :  { %3527 = vmatpush3.msra.mxu1 %v2840_v29  ;;  %v3306_v29 = vld [vmem:[%s5519_s10] ss:$0 sm:$0xff] }
 0x45d   :  { %3528 = vmatprep.subr.mxu1 %v5560_v54 }
 0x45e   :  { %3529 = vmatpush3.msra.mxu1 %v2839_v33 }
 0x45f   :  { %3530 = vmatprep.subr.mxu1 %v5560_v54 }
 0x460   :  { %3531 = vmatpush3.msra.mxu1 %v2838_v20 }
 0x461   :  { %3532 = vmatprep.subr.mxu1 %v5560_v54 }
 0x462   :  { %3533 = vmatpush3.msra.mxu1 %v2837_v1 }
 0x463   :  { %3534 = vmatprep.subr.mxu1 %v5560_v54 }
 0x464   :  { %3535 = vmatpush3.msra.mxu1 %v2836_v24 }
 0x465   :  { %3536 = vmatprep.subr.mxu1 %v5560_v54 }
 0x466   :  { %3537 = vmatpush3.msra.mxu1 %v2835_v47 }
 0x467   :  { %3538 = vmatprep.subr.mxu1 %v5560_v54 }
 0x468   :  { %3539 = vmatpush3.msra.mxu1 %v2834_v62 }
 0x469   :  { %3540 = vmatprep.subr.mxu1 %v5560_v54 }
 0x46a   :  { %3541 = vmatpush3.msra.mxu1 %v2833_v16 }
 0x46b   :  { %3542 = vmatprep.subr.mxu1 %v5560_v54 }
 0x46c   :  { %3543 = vmatpush3.msra.mxu1 %v2832_v4 }
 0x46d   :  { %3544 = vmatprep.subr.mxu1 %v5560_v54 }
 0x46e   :  { %3545 = vmatpush3.msra.mxu1 %v2831_v2 }
 0x46f   :  { %3547 = vmatmul.mubr.f32.vlgmr.msra.gmra.mxu1 %v2568_v8  ;;  %3584 = vmatprep.subr.mxu1 %v5560_v54 }
 0x470   :  { %3616 = vmatprep.mubr.msk.f32.mxu1 %vm3821_vm5, %v5560_v54  ;;  %3585 = vmatpush3.msra.mxu1 %v3036_v46 }
 0x471   :  { %3586 = vmatprep.subr.mxu1 %v5560_v54 }
 0x472   :  { %3587 = vmatpush3.msra.mxu1 %v3035_v60 }
 0x473   :  { %3588 = vmatprep.subr.mxu1 %v5560_v54 }
 0x474   :  { %3589 = vmatpush3.msra.mxu1 %v3034_v42 }
 0x475   :  { %3590 = vmatprep.subr.mxu1 %v5560_v54 }
 0x476   :  { %3591 = vmatpush3.msra.mxu1 %v3033_v32 }
 0x477   :  { %3592 = vmatprep.subr.mxu1 %v5560_v54 }
 0x478   :  { %3593 = vmatpush3.msra.mxu1 %v3032_v30 }
 0x479   :  { %3594 = vmatprep.subr.mxu1 %v5560_v54 }
 0x47a   :  { %3595 = vmatpush3.msra.mxu1 %v3031_v51 }
 0x47b   :  { %3596 = vmatprep.subr.mxu1 %v5560_v54 }
 0x47c   :  { %3597 = vmatpush3.msra.mxu1 %v3030_v56 }
 0x47d   :  { %3598 = vmatprep.subr.mxu1 %v5560_v54 }
 0x47e   :  { %3599 = vmatpush3.msra.mxu1 %v3029_v58 }
 0x47f   :  { %3600 = vmatprep.subr.mxu1 %v5560_v54 }
 0x480   :  { %3601 = vmatpush3.msra.mxu1 %v3028_v59 }
 0x481   :  { %3602 = vmatprep.subr.mxu1 %v5560_v54 }
 0x482   :  { %3603 = vmatpush3.msra.mxu1 %v3027_v11 }
 0x483   :  { %3604 = vmatprep.subr.mxu1 %v5560_v54 }
 0x484   :  { %3605 = vmatpush3.msra.mxu1 %v3026_v36 }
 0x485   :  { %3606 = vmatprep.subr.mxu1 %v5560_v54 }
 0x486   :  { %3607 = vmatpush3.msra.mxu1 %v3025_v40 }
 0x487   :  { %3608 = vmatprep.subr.mxu1 %v5560_v54 }
 0x488   :  { %3609 = vmatpush3.msra.mxu1 %v3024_v52 }
 0x489   :  { %3610 = vmatprep.subr.mxu1 %v5560_v54 }
 0x48a   :  { %3611 = vmatpush3.msra.mxu1 %v3023_v26 }
 0x48b   :  { %3612 = vmatprep.subr.mxu1 %v5560_v54 }
 0x48c   :  { %3613 = vmatpush3.msra.mxu1 %v3022_v55 }
 0x48d   :  { %3614 = vmatprep.subr.mxu1 %v5560_v54 }
 0x48e   :  { %3615 = vmatpush3.msra.mxu1 %v3021_v63 }
 0x4ef   :  { %v2668_v21 = vpop.f32.mrf.mxu1 }
 0x4f1   :  { %v3443_v28 = vpop.f32.mrf.mxu1 }
 0x4f7   :  { %v2825_v5 = vpop.f32.mrf.mxu0 }
 0x4f9   :  { %v3513_v45 = vpop.f32.mrf.mxu0 }
 0x50f   :  { %v2738_v0 = vpop.f32.mrf.mxu1 }
 0x510   :  { %v2739_v35 = vadd.f32 %v2738_v0, %v2668_v21 }
 0x511   :  { %v3478_v17 = vpop.f32.mrf.mxu1 }
 0x512   :  { %v2829_v14 = vadd.f32 %v2825_v5, %v2739_v35 }
 0x52f   :  { %v2913_v41 = vpop.f32.mrf.mxu1 }
 0x530   :  { %v2917_v15 = vadd.f32 %v2913_v41, %v2829_v14 }
 0x531   :  { %v3548_v37 = vpop.f32.mrf.mxu1 }
 0x532   :  { %v2925_v25 = vadd.f32 %v3304_v6, %v2917_v15 }
 0x534   :  { %v2926_v57 = vmax.f32 %v2925_v25, 0.0 }
 0x536   :  { %3582 = vmatmul.mubr.f32.vlgmr.msra.gmra.mxu0 %v2926_v57 }
 0x5f6   :  { %v3016_v9 = vpop.f32.mrf.mxu0 }
 0x5f7   :  { %v3017_v12 = vadd.f32 %v3305_v3, %v3016_v9 }
 0x5f8   :  { %v3583_v49 = vpop.f32.mrf.mxu0 }
 0x5f9   :  { %v3020_v43 = vmax.f32 %v3017_v12, 0.0 }
 0x5fb   :  { %3617 = vmatmul.mubr.f32.vlgmr.msra.gmra.mxu1 %v3020_v43 }
 0x6bb   :  { %v3110_v33 = vpop.f32.mrf.mxu1 }
 0x6bc   :  { %v3111_v20 = vadd.f32 %v3306_v29, %v3110_v33 }
 0x6bd   :  { %v3618_v54 = vpop.f32.mrf.mxu1 }
 0x6be   :  { %3114 = vst [vmem:[#allocation13] sm:$0xff] %v3111_v20 }
 0x6bf   :  { %3789 = shalt.err (!%p3786_p6)
}
 0x6c0   :  { %3124 = dma.vmem_to_hbm [thread:$0]  %s3122_s17, 128, %s5520_s11, [#allocation4]  }
 0x6c1   :  { %3806 = dma.done.wait [#allocation4], 128  }
 0x6c2   :  { %3807 = vsyncadd [#allocation4], 4294967168 }
 0x6c3   :  { %3128 = vsyncpa [#allocation3], 1 }
 0x6c4   :  { %3129 = vsyncpa [#allocation6], 1 }
 0x6c5   :  { %3130 = vsyncpa [#allocation9], 1 }
 0x6c6   :  { %3131 = vsyncpa [#allocation12], 1 }
 0x6c7   :  { %3132 = vsyncpa [#allocation4], 1 }

</bundles_post_ra>
